<compile_context>
chip_gen: v7x
topology: tpu7x:2x2x1
jax: 0.10.0
libtpu: 0.0.40
codegen_flags: <defaults>
</compile_context>

<pallas_src>
import functools

import jax
import jax.numpy as jnp
from jax.experimental import pallas as pl
from jax.experimental.pallas import tpu as pltpu


# ---------------------------------------------------------------------------
# Fused kernel: conv3x3 s2 + BN + GELU  ->  conv3x3 s2 + BN
# ---------------------------------------------------------------------------
def _stem_kernel(x_ref, w1_ref, b1_ref, w2_ref, b2_ref, o_ref,
                 im1_ref, ps2_ref, im2_ref):
    # x_ref  : (1, H4, 4, W4, 4*Cin)   x_ref[0,p,rm,q,cm*Cin+c] == x[4p+rm, 4q+cm, c]
    # w1_ref : (9*Cin, Cmid)   BN-folded, K order (ki, kj, c)
    # b1_ref : (1, Cmid)       BN-folded bias
    # w2_ref : (9*Cmid, Cout), b2_ref: (1, Cout)
    # o_ref  : (1, H4*W4, Cout)
    # im1_ref: (H4, W4, 9*Cin)          stage-1 im2col scratch (reused per class)
    # ps2_ref: (2, 2, H4+1, W4+1, Cmid) stage-1 output, padded + phase-split
    # im2_ref: (H4, W4, 9*Cmid)         stage-2 im2col scratch
    h4, w4 = x_ref.shape[1], x_ref.shape[3]
    cin = x_ref.shape[4] // 4
    cmid = w1_ref.shape[1]
    k1 = w1_ref.shape[0]
    k2 = w2_ref.shape[0]
    f32 = jnp.float32
    inv_sqrt2 = 0.7071067811865476
    h_tile = min(h4, max(1, 256 // w4))           # ~256 output pixels per matmul tile

    w1 = w1_ref[...]
    b1 = b1_ref[...]
    w2 = w2_ref[...]
    b2 = b2_ref[...]

    # ps2[ph, pw, i, j, :] == pad1(y1)[2*i + ph, 2*j + pw, :]; zero the pad border.
    ps2_ref[...] = jnp.zeros(ps2_ref.shape, f32)

    # -------------------- stage 1: conv3x3 s2 (+BN) + GELU --------------------
    # Computed per output-parity class (a, b): output pixels (2p+a, 2q+b),
    # p in [0, H4), q in [0, W4).  Tap (ki, kj) reads input (4p+d, 4q+e) with
    # d = 2a+ki-1, e = 2b+kj-1 (in [-1, 3]); -1 means the zero padding border.
    for a in range(2):
        for b in range(2):
            for ki in range(3):
                d = 2 * a + ki - 1
                if d >= 0:
                    plane = x_ref[0, :, d, :, :]              # (h4, w4, 4*cin)
                    rdst = slice(0, h4)
                elif h4 > 1:
                    plane = x_ref[0, 0:h4 - 1, 3, :, :]       # row 4p-1 == group p-1, rm=3
                    rdst = slice(1, h4)
                else:
                    plane = None
                for kj in range(3):
                    e = 2 * b + kj - 1
                    t = ki * 3 + kj
                    tc = slice(t * cin, (t + 1) * cin)
                    if d < 0:                                  # top padding row
                        im1_ref[0:1, :, tc] = jnp.zeros((1, w4, cin), f32)
                    if e < 0:                                  # left padding col
                        im1_ref[:, 0:1, tc] = jnp.zeros((h4, 1, cin), f32)
                    if plane is None:
                        continue
                    if e >= 0:
                        val = plane[:, :, e * cin:(e + 1) * cin]
                        cdst = slice(0, w4)
                    elif w4 > 1:
                        val = plane[:, 0:w4 - 1, 3 * cin:4 * cin]
                        cdst = slice(1, w4)
                    else:
                        continue
                    im1_ref[rdst, cdst, tc] = val

            # one K = 9*Cin matmul per M-tile; write into this class's ps2 slot
            ph, pw = 1 - a, 1 - b
            for h0 in range(0, h4, h_tile):
                ht = min(h_tile, h4 - h0)
                lhs = im1_ref[h0:h0 + ht, :, :].reshape(ht * w4, k1)
                y = jnp.dot(lhs, w1, preferred_element_type=f32) + b1
                # exact erf GELU (matches torch.nn.GELU default)
                y = 0.5 * y * (1.0 + jax.lax.erf(y * inv_sqrt2))
                ps2_ref[ph, pw, a + h0:a + h0 + ht, b:b + w4, :] = (
                    y.reshape(ht, w4, cmid))

    # -------------------- stage 2: conv3x3 s2 (+BN) --------------------
    # Tap (ki, kj) of output (i4, j4) reads ps2[ki%2, kj%2, i4+ki//2, j4+kj//2, :].
    for ki in range(3):
        for kj in range(3):
            t = ki * 3 + kj
            im2_ref[:, :, t * cmid:(t + 1) * cmid] = ps2_ref[
                ki % 2, kj % 2, ki // 2:ki // 2 + h4, kj // 2:kj // 2 + w4, :]

    for h0 in range(0, h4, h_tile):
        ht = min(h_tile, h4 - h0)
        lhs = im2_ref[h0:h0 + ht, :, :].reshape(ht * w4, k2)
        y = jnp.dot(lhs, w2, preferred_element_type=f32) + b2
        o_ref[0, h0 * w4:(h0 + ht) * w4, :] = y.astype(o_ref.dtype)


# ---------------------------------------------------------------------------
# BN folding:  BN(conv(x) + b) == conv_{w*s}(x) + ((b - mean)*s + beta)
# ---------------------------------------------------------------------------
def _fold_bn(w, b, gamma, beta, mean, var, eps=1e-5):
    s = gamma / jnp.sqrt(var + eps)                 # (Cout,)
    w_f = (w * s).reshape(-1, w.shape[-1])          # (3,3,Cin,Cout) -> (9*Cin, Cout)
    b_f = ((b - mean) * s + beta).reshape(1, -1)    # (1, Cout)
    return w_f.astype(jnp.float32), b_f.astype(jnp.float32)


# ---------------------------------------------------------------------------
# Full StemConv forward
# ---------------------------------------------------------------------------
def stem_conv_forward(x_nchw, params):
    """x: (B, Cin, H, W) -> ((B, H/4*W/4, Cout), H/4, W/4)."""
    (w1, b1, g1, be1, m1, v1, w2, b2, g2, be2, m2, v2) = params
    B, Cin, H, W = x_nchw.shape
    assert H % 4 == 0 and W % 4 == 0, "requires H, W % 4 == 0"
    Cmid = w1.shape[-1]
    Cout = w2.shape[-1]
    H4, W4 = H // 4, W // 4

    w1f, b1f = _fold_bn(w1, b1, g1, be1, m1, v1)
    w2f, b2f = _fold_bn(w2, b2, g2, be2, m2, v2)

    x = jnp.transpose(x_nchw, (0, 2, 3, 1))          # NHWC (one pass over the raw input)
    x4 = x.reshape(B, H4, 4, W4, 4 * Cin)            # FREE reshape: exposes mod-4 phases

    out = pl.pallas_call(
        _stem_kernel,
        out_shape=jax.ShapeDtypeStruct((B, H4 * W4, Cout), x.dtype),
        grid=(B,),
        in_specs=[
            pl.BlockSpec((1, H4, 4, W4, 4 * Cin), lambda bb: (bb, 0, 0, 0, 0)),
            pl.BlockSpec((9 * Cin, Cmid), lambda bb: (0, 0)),
            pl.BlockSpec((1, Cmid), lambda bb: (0, 0)),
            pl.BlockSpec((9 * Cmid, Cout), lambda bb: (0, 0)),
            pl.BlockSpec((1, Cout), lambda bb: (0, 0)),
        ],
        out_specs=pl.BlockSpec((1, H4 * W4, Cout), lambda bb: (bb, 0, 0)),
        scratch_shapes=[
            pltpu.VMEM((H4, W4, 9 * Cin), jnp.float32),
            pltpu.VMEM((2, 2, H4 + 1, W4 + 1, Cmid), jnp.float32),
            pltpu.VMEM((H4, W4, 9 * Cmid), jnp.float32),
        ],
        compiler_params=pltpu.CompilerParams(
            dimension_semantics=("parallel",),
            vmem_limit_bytes=48 * 1024 * 1024,       # fits v7x's 64 MiB physical VMEM
        ),
    )(x4, w1f, b1f, w2f, b2f)
    return out, H4, W4


# ---------------------------------------------------------------------------
# Pure-JAX reference (XLA conv) for a correctness check
# ---------------------------------------------------------------------------
def _reference(x_nchw, params):
    (w1, b1, g1, be1, m1, v1, w2, b2, g2, be2, m2, v2) = params

    def conv_bn(x, w, b, g, be, m, v):
        y = jax.lax.conv_general_dilated(
            x, w, window_strides=(2, 2), padding=((1, 1), (1, 1)),
            dimension_numbers=("NHWC", "HWIO", "NHWC"),
            precision=jax.lax.Precision.HIGHEST) + b
        s = g / jnp.sqrt(v + 1e-5)
        return (y - m) * s + be

    x = jnp.transpose(x_nchw, (0, 2, 3, 1))
    y1 = conv_bn(x, w1, b1, g1, be1, m1, v1)
    y1 = 0.5 * y1 * (1.0 + jax.lax.erf(y1 * 0.7071067811865476))
    y2 = conv_bn(y1, w2, b2, g2, be2, m2, v2)
    return y2.reshape(y2.shape[0], -1, y2.shape[-1])


# ---------------------------------------------------------------------------
# Deterministic synthetic parameters (HWIO conv weights + raw BN params)
# ---------------------------------------------------------------------------
def make_params(key, cin, cmid, cout):
    ks = iter(jax.random.split(key, 12))

    def nrm(shape, scale=0.1):
        return (scale * jax.random.normal(next(ks), shape)).astype(jnp.float32)

    def bn(c):
        gamma = (1.0 + 0.1 * jax.random.normal(next(ks), (c,))).astype(jnp.float32)
        beta = (0.1 * jax.random.normal(next(ks), (c,))).astype(jnp.float32)
        mean = (0.1 * jax.random.normal(next(ks), (c,))).astype(jnp.float32)
        var = (1.0 + 0.1 * jnp.abs(jax.random.normal(next(ks), (c,)))).astype(jnp.float32)
        return gamma, beta, mean, var

    w1 = nrm((3, 3, cin, cmid))      # HWIO == torch (Co,Ci,Kh,Kw).transpose(2,3,1,0)
    b1 = nrm((cmid,), 0.01)
    g1, be1, m1, v1 = bn(cmid)
    w2 = nrm((3, 3, cmid, cout))
    b2 = nrm((cout,), 0.01)
    g2, be2, m2, v2 = bn(cout)
    return (w1, b1, g1, be1, m1, v1, w2, b2, g2, be2, m2, v2)


# ---------------------------------------------------------------------------
if __name__ == "__main__":
    B, Cin, H, W = 2, 3, 32, 32
    out_channels = 64
    Cmid = out_channels // 2

    key = jax.random.PRNGKey(0)
    kx, kp = jax.random.split(key)
    x = jax.random.normal(kx, (B, Cin, H, W), dtype=jnp.float32)
    params = make_params(kp, Cin, Cmid, out_channels)

    fwd = jax.jit(functools.partial(stem_conv_forward, params=params))
    y, Ho, Wo = fwd(x)
    jax.block_until_ready(y)

    assert y.shape == (B, (H // 4) * (W // 4), out_channels)
    assert int(Ho) == H // 4 and int(Wo) == W // 4

    y_ref = jax.jit(_reference)(x, params)
    jax.block_until_ready(y_ref)
    assert jnp.allclose(y, y_ref, rtol=2e-3, atol=2e-3), (
        float(jnp.max(jnp.abs(y - y_ref))))

    print("KERNEL_OK")
</pallas_src>

<mosaic_0001>
module attributes {stable_mosaic.version = 11 : i64} {
  func.func @_stem_kernel(%arg0: i32, %arg1: memref<1x8x4x8x12xf32, #tpu.memory_space<vmem>>, %arg2: memref<27x32xf32, #tpu.memory_space<vmem>>, %arg3: memref<1x32xf32, #tpu.memory_space<vmem>>, %arg4: memref<288x64xf32, #tpu.memory_space<vmem>>, %arg5: memref<1x64xf32, #tpu.memory_space<vmem>>, %arg6: memref<1x64x64xf32, #tpu.memory_space<vmem>>, %arg7: memref<8x8x27xf32, #tpu.memory_space<vmem>>, %arg8: memref<2x2x9x9x32xf32, #tpu.memory_space<vmem>>, %arg9: memref<8x8x288xf32, #tpu.memory_space<vmem>>) attributes {dimension_semantics = [#tpu.dimension_semantics<parallel>], iteration_bounds = array<i64: 2>, scalar_prefetch = 0 : i64, scratch_operands = 3 : i64, tpu.core_type = #tpu.core_type<tc>, window_params = [{transform_indices = @transform_0, window_bounds = array<i64: 1, 8, 4, 8, 12>}, {pipeline_mode = #tpu.pipeline_mode<synchronous>, transform_indices = @transform_1, window_bounds = array<i64: 27, 32>}, {pipeline_mode = #tpu.pipeline_mode<synchronous>, transform_indices = @transform_2, window_bounds = array<i64: 1, 32>}, {pipeline_mode = #tpu.pipeline_mode<synchronous>, transform_indices = @transform_3, window_bounds = array<i64: 288, 64>}, {pipeline_mode = #tpu.pipeline_mode<synchronous>, transform_indices = @transform_4, window_bounds = array<i64: 1, 64>}, {transform_indices = @transform_5, window_bounds = array<i64: 1, 64, 64>}]} {
    %c0 = arith.constant 0 : index
    %c0_0 = arith.constant 0 : index
    %0 = vector.load %arg2[%c0, %c0_0] : memref<27x32xf32, #tpu.memory_space<vmem>>, vector<27x32xf32>
    %c0_1 = arith.constant 0 : index
    %c0_2 = arith.constant 0 : index
    %1 = vector.load %arg3[%c0_1, %c0_2] : memref<1x32xf32, #tpu.memory_space<vmem>>, vector<1x32xf32>
    %c0_3 = arith.constant 0 : index
    %c0_4 = arith.constant 0 : index
    %2 = vector.load %arg4[%c0_3, %c0_4] : memref<288x64xf32, #tpu.memory_space<vmem>>, vector<288x64xf32>
    %c0_5 = arith.constant 0 : index
    %c0_6 = arith.constant 0 : index
    %3 = vector.load %arg5[%c0_5, %c0_6] : memref<1x64xf32, #tpu.memory_space<vmem>>, vector<1x64xf32>
    %cst = arith.constant 0.000000e+00 : f32
    %4 = vector.broadcast %cst : f32 to vector<2x2x9x9x32xf32>
    %c0_7 = arith.constant 0 : index
    %c0_8 = arith.constant 0 : index
    %c0_9 = arith.constant 0 : index
    %c0_10 = arith.constant 0 : index
    %c0_11 = arith.constant 0 : index
    %5 = vector.load %arg8[%c0_7, %c0_8, %c0_9, %c0_10, %c0_11] : memref<2x2x9x9x32xf32, #tpu.memory_space<vmem>>, vector<2x2x9x9x32xf32>
    tpu.vector_store %arg8[%c0_7, %c0_8, %c0_9, %c0_10, %c0_11], %4 {strides = array<i32>} : memref<2x2x9x9x32xf32, #tpu.memory_space<vmem>>, vector<2x2x9x9x32xf32>,
    %c0_12 = arith.constant 0 : index
    %c0_13 = arith.constant 0 : index
    %c3 = arith.constant 3 : index
    %c0_14 = arith.constant 0 : index
    %c0_15 = arith.constant 0 : index
    %6 = vector.load %arg1[%c0_12, %c0_13, %c3, %c0_14, %c0_15] : memref<1x8x4x8x12xf32, #tpu.memory_space<vmem>>, vector<1x7x1x8x12xf32>
    %7 = vector.shape_cast %6 : vector<1x7x1x8x12xf32> to vector<7x8x12xf32>
    %cst_16 = arith.constant 0.000000e+00 : f32
    %8 = vector.broadcast %cst_16 : f32 to vector<1x8x3xf32>
    %c0_17 = arith.constant 0 : index
    %c0_18 = arith.constant 0 : index
    %c0_19 = arith.constant 0 : index
    %9 = vector.load %arg7[%c0_17, %c0_18, %c0_19] : memref<8x8x27xf32, #tpu.memory_space<vmem>>, vector<1x8x3xf32>
    tpu.vector_store %arg7[%c0_17, %c0_18, %c0_19], %8 {strides = array<i32>} : memref<8x8x27xf32, #tpu.memory_space<vmem>>, vector<1x8x3xf32>,
    %cst_20 = arith.constant 0.000000e+00 : f32
    %10 = vector.broadcast %cst_20 : f32 to vector<8x1x3xf32>
    %c0_21 = arith.constant 0 : index
    %c0_22 = arith.constant 0 : index
    %c0_23 = arith.constant 0 : index
    %11 = vector.load %arg7[%c0_21, %c0_22, %c0_23] : memref<8x8x27xf32, #tpu.memory_space<vmem>>, vector<8x1x3xf32>
    tpu.vector_store %arg7[%c0_21, %c0_22, %c0_23], %10 {strides = array<i32>} : memref<8x8x27xf32, #tpu.memory_space<vmem>>, vector<8x1x3xf32>,
    %12 = vector.extract_strided_slice %7 {offsets = [0, 0, 9], sizes = [7, 7, 3], strides = [1, 1, 1]} : vector<7x8x12xf32> to vector<7x7x3xf32>
    %c1 = arith.constant 1 : index
    %c1_24 = arith.constant 1 : index
    %c0_25 = arith.constant 0 : index
    %13 = vector.load %arg7[%c1, %c1_24, %c0_25] : memref<8x8x27xf32, #tpu.memory_space<vmem>>, vector<7x7x3xf32>
    tpu.vector_store %arg7[%c1, %c1_24, %c0_25], %12 {strides = array<i32>} : memref<8x8x27xf32, #tpu.memory_space<vmem>>, vector<7x7x3xf32>,
    %cst_26 = arith.constant 0.000000e+00 : f32
    %14 = vector.broadcast %cst_26 : f32 to vector<1x8x3xf32>
    %c0_27 = arith.constant 0 : index
    %c0_28 = arith.constant 0 : index
    %c3_29 = arith.constant 3 : index
    %15 = vector.load %arg7[%c0_27, %c0_28, %c3_29] : memref<8x8x27xf32, #tpu.memory_space<vmem>>, vector<1x8x3xf32>
    tpu.vector_store %arg7[%c0_27, %c0_28, %c3_29], %14 {strides = array<i32>} : memref<8x8x27xf32, #tpu.memory_space<vmem>>, vector<1x8x3xf32>,
    %16 = vector.extract_strided_slice %7 {offsets = [0, 0, 0], sizes = [7, 8, 3], strides = [1, 1, 1]} : vector<7x8x12xf32> to vector<7x8x3xf32>
    %c1_30 = arith.constant 1 : index
    %c0_31 = arith.constant 0 : index
    %c3_32 = arith.constant 3 : index
    %17 = vector.load %arg7[%c1_30, %c0_31, %c3_32] : memref<8x8x27xf32, #tpu.memory_space<vmem>>, vector<7x8x3xf32>
    tpu.vector_store %arg7[%c1_30, %c0_31, %c3_32], %16 {strides = array<i32>} : memref<8x8x27xf32, #tpu.memory_space<vmem>>, vector<7x8x3xf32>,
    %cst_33 = arith.constant 0.000000e+00 : f32
    %18 = vector.broadcast %cst_33 : f32 to vector<1x8x3xf32>
    %c0_34 = arith.constant 0 : index
    %c0_35 = arith.constant 0 : index
    %c6 = arith.constant 6 : index
    %19 = vector.load %arg7[%c0_34, %c0_35, %c6] : memref<8x8x27xf32, #tpu.memory_space<vmem>>, vector<1x8x3xf32>
    tpu.vector_store %arg7[%c0_34, %c0_35, %c6], %18 {strides = array<i32>} : memref<8x8x27xf32, #tpu.memory_space<vmem>>, vector<1x8x3xf32>,
    %20 = vector.extract_strided_slice %7 {offsets = [0, 0, 3], sizes = [7, 8, 3], strides = [1, 1, 1]} : vector<7x8x12xf32> to vector<7x8x3xf32>
    %c1_36 = arith.constant 1 : index
    %c0_37 = arith.constant 0 : index
    %c6_38 = arith.constant 6 : index
    %21 = vector.load %arg7[%c1_36, %c0_37, %c6_38] : memref<8x8x27xf32, #tpu.memory_space<vmem>>, vector<7x8x3xf32>
    tpu.vector_store %arg7[%c1_36, %c0_37, %c6_38], %20 {strides = array<i32>} : memref<8x8x27xf32, #tpu.memory_space<vmem>>, vector<7x8x3xf32>,
    %c0_39 = arith.constant 0 : index
    %c0_40 = arith.constant 0 : index
    %c0_41 = arith.constant 0 : index
    %c0_42 = arith.constant 0 : index
    %c0_43 = arith.constant 0 : index
    %22 = vector.load %arg1[%c0_39, %c0_40, %c0_41, %c0_42, %c0_43] : memref<1x8x4x8x12xf32, #tpu.memory_space<vmem>>, vector<1x8x1x8x12xf32>
    %23 = vector.shape_cast %22 : vector<1x8x1x8x12xf32> to vector<8x8x12xf32>
    %cst_44 = arith.constant 0.000000e+00 : f32
    %24 = vector.broadcast %cst_44 : f32 to vector<8x1x3xf32>
    %c0_45 = arith.constant 0 : index
    %c0_46 = arith.constant 0 : index
    %c9 = arith.constant 9 : index
    %25 = vector.load %arg7[%c0_45, %c0_46, %c9] : memref<8x8x27xf32, #tpu.memory_space<vmem>>, vector<8x1x3xf32>
    tpu.vector_store %arg7[%c0_45, %c0_46, %c9], %24 {strides = array<i32>} : memref<8x8x27xf32, #tpu.memory_space<vmem>>, vector<8x1x3xf32>,
    %26 = vector.extract_strided_slice %23 {offsets = [0, 0, 9], sizes = [8, 7, 3], strides = [1, 1, 1]} : vector<8x8x12xf32> to vector<8x7x3xf32>
    %c0_47 = arith.constant 0 : index
    %c1_48 = arith.constant 1 : index
    %c9_49 = arith.constant 9 : index
    %27 = vector.load %arg7[%c0_47, %c1_48, %c9_49] : memref<8x8x27xf32, #tpu.memory_space<vmem>>, vector<8x7x3xf32>
    tpu.vector_store %arg7[%c0_47, %c1_48, %c9_49], %26 {strides = array<i32>} : memref<8x8x27xf32, #tpu.memory_space<vmem>>, vector<8x7x3xf32>,
    %28 = vector.extract_strided_slice %23 {offsets = [0, 0, 0], sizes = [8, 8, 3], strides = [1, 1, 1]} : vector<8x8x12xf32> to vector<8x8x3xf32>
    %c0_50 = arith.constant 0 : index
    %c0_51 = arith.constant 0 : index
    %c12 = arith.constant 12 : index
    %29 = vector.load %arg7[%c0_50, %c0_51, %c12] : memref<8x8x27xf32, #tpu.memory_space<vmem>>, vector<8x8x3xf32>
    tpu.vector_store %arg7[%c0_50, %c0_51, %c12], %28 {strides = array<i32>} : memref<8x8x27xf32, #tpu.memory_space<vmem>>, vector<8x8x3xf32>,
    %30 = vector.extract_strided_slice %23 {offsets = [0, 0, 3], sizes = [8, 8, 3], strides = [1, 1, 1]} : vector<8x8x12xf32> to vector<8x8x3xf32>
    %c0_52 = arith.constant 0 : index
    %c0_53 = arith.constant 0 : index
    %c15 = arith.constant 15 : index
    %31 = vector.load %arg7[%c0_52, %c0_53, %c15] : memref<8x8x27xf32, #tpu.memory_space<vmem>>, vector<8x8x3xf32>
    tpu.vector_store %arg7[%c0_52, %c0_53, %c15], %30 {strides = array<i32>} : memref<8x8x27xf32, #tpu.memory_space<vmem>>, vector<8x8x3xf32>,
    %c0_54 = arith.constant 0 : index
    %c0_55 = arith.constant 0 : index
    %c1_56 = arith.constant 1 : index
    %c0_57 = arith.constant 0 : index
    %c0_58 = arith.constant 0 : index
    %32 = vector.load %arg1[%c0_54, %c0_55, %c1_56, %c0_57, %c0_58] : memref<1x8x4x8x12xf32, #tpu.memory_space<vmem>>, vector<1x8x1x8x12xf32>
    %33 = vector.shape_cast %32 : vector<1x8x1x8x12xf32> to vector<8x8x12xf32>
    %cst_59 = arith.constant 0.000000e+00 : f32
    %34 = vector.broadcast %cst_59 : f32 to vector<8x1x3xf32>
    %c0_60 = arith.constant 0 : index
    %c0_61 = arith.constant 0 : index
    %c18 = arith.constant 18 : index
    %35 = vector.load %arg7[%c0_60, %c0_61, %c18] : memref<8x8x27xf32, #tpu.memory_space<vmem>>, vector<8x1x3xf32>
    tpu.vector_store %arg7[%c0_60, %c0_61, %c18], %34 {strides = array<i32>} : memref<8x8x27xf32, #tpu.memory_space<vmem>>, vector<8x1x3xf32>,
    %36 = vector.extract_strided_slice %33 {offsets = [0, 0, 9], sizes = [8, 7, 3], strides = [1, 1, 1]} : vector<8x8x12xf32> to vector<8x7x3xf32>
    %c0_62 = arith.constant 0 : index
    %c1_63 = arith.constant 1 : index
    %c18_64 = arith.constant 18 : index
    %37 = vector.load %arg7[%c0_62, %c1_63, %c18_64] : memref<8x8x27xf32, #tpu.memory_space<vmem>>, vector<8x7x3xf32>
    tpu.vector_store %arg7[%c0_62, %c1_63, %c18_64], %36 {strides = array<i32>} : memref<8x8x27xf32, #tpu.memory_space<vmem>>, vector<8x7x3xf32>,
    %38 = vector.extract_strided_slice %33 {offsets = [0, 0, 0], sizes = [8, 8, 3], strides = [1, 1, 1]} : vector<8x8x12xf32> to vector<8x8x3xf32>
    %c0_65 = arith.constant 0 : index
    %c0_66 = arith.constant 0 : index
    %c21 = arith.constant 21 : index
    %39 = vector.load %arg7[%c0_65, %c0_66, %c21] : memref<8x8x27xf32, #tpu.memory_space<vmem>>, vector<8x8x3xf32>
    tpu.vector_store %arg7[%c0_65, %c0_66, %c21], %38 {strides = array<i32>} : memref<8x8x27xf32, #tpu.memory_space<vmem>>, vector<8x8x3xf32>,
    %40 = vector.extract_strided_slice %33 {offsets = [0, 0, 3], sizes = [8, 8, 3], strides = [1, 1, 1]} : vector<8x8x12xf32> to vector<8x8x3xf32>
    %c0_67 = arith.constant 0 : index
    %c0_68 = arith.constant 0 : index
    %c24 = arith.constant 24 : index
    %41 = vector.load %arg7[%c0_67, %c0_68, %c24] : memref<8x8x27xf32, #tpu.memory_space<vmem>>, vector<8x8x3xf32>
    tpu.vector_store %arg7[%c0_67, %c0_68, %c24], %40 {strides = array<i32>} : memref<8x8x27xf32, #tpu.memory_space<vmem>>, vector<8x8x3xf32>,
    %c0_69 = arith.constant 0 : index
    %c0_70 = arith.constant 0 : index
    %c0_71 = arith.constant 0 : index
    %42 = vector.load %arg7[%c0_69, %c0_70, %c0_71] : memref<8x8x27xf32, #tpu.memory_space<vmem>>, vector<8x8x27xf32>
    %43 = vector.shape_cast %42 : vector<8x8x27xf32> to vector<64x27xf32>
    %cst_72 = arith.constant dense<0.000000e+00> : vector<64x32xf32>
    %44 = tpu.matmul %43, %0, %cst_72 {dimension_numbers = #tpu.dot_dimension_numbers<[1], [0], [0], [1], [0, 0, 1, 1], [], []>} : vector<64x27xf32>, vector<27x32xf32>, vector<64x32xf32> -> vector<64x32xf32>
    %45 = vector.broadcast %1 : vector<1x32xf32> to vector<64x32xf32>
    %46 = arith.addf %44, %45 : vector<64x32xf32>
    %cst_73 = arith.constant 5.000000e-01 : f32
    %47 = vector.broadcast %cst_73 : f32 to vector<64x32xf32>
    %48 = arith.mulf %47, %46 : vector<64x32xf32>
    %cst_74 = arith.constant 0.707106769 : f32
    %49 = vector.broadcast %cst_74 : f32 to vector<64x32xf32>
    %50 = arith.mulf %46, %49 : vector<64x32xf32>
    %51 = math.erf %50 : vector<64x32xf32>
    %cst_75 = arith.constant 1.000000e+00 : f32
    %52 = vector.broadcast %cst_75 : f32 to vector<64x32xf32>
    %53 = arith.addf %52, %51 : vector<64x32xf32>
    %54 = arith.mulf %48, %53 : vector<64x32xf32>
    %55 = vector.shape_cast %54 : vector<64x32xf32> to vector<8x8x32xf32>
    %c1_76 = arith.constant 1 : index
    %c1_77 = arith.constant 1 : index
    %c0_78 = arith.constant 0 : index
    %c0_79 = arith.constant 0 : index
    %c0_80 = arith.constant 0 : index
    %56 = vector.load %arg8[%c1_76, %c1_77, %c0_78, %c0_79, %c0_80] : memref<2x2x9x9x32xf32, #tpu.memory_space<vmem>>, vector<1x1x8x8x32xf32>
    %57 = vector.shape_cast %56 : vector<1x1x8x8x32xf32> to vector<8x8x32xf32>
    %58 = vector.shape_cast %55 : vector<8x8x32xf32> to vector<1x1x8x8x32xf32>
    tpu.vector_store %arg8[%c1_76, %c1_77, %c0_78, %c0_79, %c0_80], %58 {strides = array<i32>} : memref<2x2x9x9x32xf32, #tpu.memory_space<vmem>>, vector<1x1x8x8x32xf32>,
    %c0_81 = arith.constant 0 : index
    %c0_82 = arith.constant 0 : index
    %c3_83 = arith.constant 3 : index
    %c0_84 = arith.constant 0 : index
    %c0_85 = arith.constant 0 : index
    %59 = vector.load %arg1[%c0_81, %c0_82, %c3_83, %c0_84, %c0_85] : memref<1x8x4x8x12xf32, #tpu.memory_space<vmem>>, vector<1x7x1x8x12xf32>
    %60 = vector.shape_cast %59 : vector<1x7x1x8x12xf32> to vector<7x8x12xf32>
    %cst_86 = arith.constant 0.000000e+00 : f32
    %61 = vector.broadcast %cst_86 : f32 to vector<1x8x3xf32>
    %c0_87 = arith.constant 0 : index
    %c0_88 = arith.constant 0 : index
    %c0_89 = arith.constant 0 : index
    %62 = vector.load %arg7[%c0_87, %c0_88, %c0_89] : memref<8x8x27xf32, #tpu.memory_space<vmem>>, vector<1x8x3xf32>
    tpu.vector_store %arg7[%c0_87, %c0_88, %c0_89], %61 {strides = array<i32>} : memref<8x8x27xf32, #tpu.memory_space<vmem>>, vector<1x8x3xf32>,
    %63 = vector.extract_strided_slice %60 {offsets = [0, 0, 3], sizes = [7, 8, 3], strides = [1, 1, 1]} : vector<7x8x12xf32> to vector<7x8x3xf32>
    %c1_90 = arith.constant 1 : index
    %c0_91 = arith.constant 0 : index
    %c0_92 = arith.constant 0 : index
    %64 = vector.load %arg7[%c1_90, %c0_91, %c0_92] : memref<8x8x27xf32, #tpu.memory_space<vmem>>, vector<7x8x3xf32>
    tpu.vector_store %arg7[%c1_90, %c0_91, %c0_92], %63 {strides = array<i32>} : memref<8x8x27xf32, #tpu.memory_space<vmem>>, vector<7x8x3xf32>,
    %cst_93 = arith.constant 0.000000e+00 : f32
    %65 = vector.broadcast %cst_93 : f32 to vector<1x8x3xf32>
    %c0_94 = arith.constant 0 : index
    %c0_95 = arith.constant 0 : index
    %c3_96 = arith.constant 3 : index
    %66 = vector.load %arg7[%c0_94, %c0_95, %c3_96] : memref<8x8x27xf32, #tpu.memory_space<vmem>>, vector<1x8x3xf32>
    tpu.vector_store %arg7[%c0_94, %c0_95, %c3_96], %65 {strides = array<i32>} : memref<8x8x27xf32, #tpu.memory_space<vmem>>, vector<1x8x3xf32>,
    %67 = vector.extract_strided_slice %60 {offsets = [0, 0, 6], sizes = [7, 8, 3], strides = [1, 1, 1]} : vector<7x8x12xf32> to vector<7x8x3xf32>
    %c1_97 = arith.constant 1 : index
    %c0_98 = arith.constant 0 : index
    %c3_99 = arith.constant 3 : index
    %68 = vector.load %arg7[%c1_97, %c0_98, %c3_99] : memref<8x8x27xf32, #tpu.memory_space<vmem>>, vector<7x8x3xf32>
    tpu.vector_store %arg7[%c1_97, %c0_98, %c3_99], %67 {strides = array<i32>} : memref<8x8x27xf32, #tpu.memory_space<vmem>>, vector<7x8x3xf32>,
    %cst_100 = arith.constant 0.000000e+00 : f32
    %69 = vector.broadcast %cst_100 : f32 to vector<1x8x3xf32>
    %c0_101 = arith.constant 0 : index
    %c0_102 = arith.constant 0 : index
    %c6_103 = arith.constant 6 : index
    %70 = vector.load %arg7[%c0_101, %c0_102, %c6_103] : memref<8x8x27xf32, #tpu.memory_space<vmem>>, vector<1x8x3xf32>
    tpu.vector_store %arg7[%c0_101, %c0_102, %c6_103], %69 {strides = array<i32>} : memref<8x8x27xf32, #tpu.memory_space<vmem>>, vector<1x8x3xf32>,
    %71 = vector.extract_strided_slice %60 {offsets = [0, 0, 9], sizes = [7, 8, 3], strides = [1, 1, 1]} : vector<7x8x12xf32> to vector<7x8x3xf32>
    %c1_104 = arith.constant 1 : index
    %c0_105 = arith.constant 0 : index
    %c6_106 = arith.constant 6 : index
    %72 = vector.load %arg7[%c1_104, %c0_105, %c6_106] : memref<8x8x27xf32, #tpu.memory_space<vmem>>, vector<7x8x3xf32>
    tpu.vector_store %arg7[%c1_104, %c0_105, %c6_106], %71 {strides = array<i32>} : memref<8x8x27xf32, #tpu.memory_space<vmem>>, vector<7x8x3xf32>,
    %c0_107 = arith.constant 0 : index
    %c0_108 = arith.constant 0 : index
    %c0_109 = arith.constant 0 : index
    %c0_110 = arith.constant 0 : index
    %c0_111 = arith.constant 0 : index
    %73 = vector.load %arg1[%c0_107, %c0_108, %c0_109, %c0_110, %c0_111] : memref<1x8x4x8x12xf32, #tpu.memory_space<vmem>>, vector<1x8x1x8x12xf32>
    %74 = vector.shape_cast %73 : vector<1x8x1x8x12xf32> to vector<8x8x12xf32>
    %75 = vector.extract_strided_slice %74 {offsets = [0, 0, 3], sizes = [8, 8, 3], strides = [1, 1, 1]} : vector<8x8x12xf32> to vector<8x8x3xf32>
    %c0_112 = arith.constant 0 : index
    %c0_113 = arith.constant 0 : index
    %c9_114 = arith.constant 9 : index
    %76 = vector.load %arg7[%c0_112, %c0_113, %c9_114] : memref<8x8x27xf32, #tpu.memory_space<vmem>>, vector<8x8x3xf32>
    tpu.vector_store %arg7[%c0_112, %c0_113, %c9_114], %75 {strides = array<i32>} : memref<8x8x27xf32, #tpu.memory_space<vmem>>, vector<8x8x3xf32>,
    %77 = vector.extract_strided_slice %74 {offsets = [0, 0, 6], sizes = [8, 8, 3], strides = [1, 1, 1]} : vector<8x8x12xf32> to vector<8x8x3xf32>
    %c0_115 = arith.constant 0 : index
    %c0_116 = arith.constant 0 : index
    %c12_117 = arith.constant 12 : index
    %78 = vector.load %arg7[%c0_115, %c0_116, %c12_117] : memref<8x8x27xf32, #tpu.memory_space<vmem>>, vector<8x8x3xf32>
    tpu.vector_store %arg7[%c0_115, %c0_116, %c12_117], %77 {strides = array<i32>} : memref<8x8x27xf32, #tpu.memory_space<vmem>>, vector<8x8x3xf32>,
    %79 = vector.extract_strided_slice %74 {offsets = [0, 0, 9], sizes = [8, 8, 3], strides = [1, 1, 1]} : vector<8x8x12xf32> to vector<8x8x3xf32>
    %c0_118 = arith.constant 0 : index
    %c0_119 = arith.constant 0 : index
    %c15_120 = arith.constant 15 : index
    %80 = vector.load %arg7[%c0_118, %c0_119, %c15_120] : memref<8x8x27xf32, #tpu.memory_space<vmem>>, vector<8x8x3xf32>
    tpu.vector_store %arg7[%c0_118, %c0_119, %c15_120], %79 {strides = array<i32>} : memref<8x8x27xf32, #tpu.memory_space<vmem>>, vector<8x8x3xf32>,
    %c0_121 = arith.constant 0 : index
    %c0_122 = arith.constant 0 : index
    %c1_123 = arith.constant 1 : index
    %c0_124 = arith.constant 0 : index
    %c0_125 = arith.constant 0 : index
    %81 = vector.load %arg1[%c0_121, %c0_122, %c1_123, %c0_124, %c0_125] : memref<1x8x4x8x12xf32, #tpu.memory_space<vmem>>, vector<1x8x1x8x12xf32>
    %82 = vector.shape_cast %81 : vector<1x8x1x8x12xf32> to vector<8x8x12xf32>
    %83 = vector.extract_strided_slice %82 {offsets = [0, 0, 3], sizes = [8, 8, 3], strides = [1, 1, 1]} : vector<8x8x12xf32> to vector<8x8x3xf32>
    %c0_126 = arith.constant 0 : index
    %c0_127 = arith.constant 0 : index
    %c18_128 = arith.constant 18 : index
    %84 = vector.load %arg7[%c0_126, %c0_127, %c18_128] : memref<8x8x27xf32, #tpu.memory_space<vmem>>, vector<8x8x3xf32>
    tpu.vector_store %arg7[%c0_126, %c0_127, %c18_128], %83 {strides = array<i32>} : memref<8x8x27xf32, #tpu.memory_space<vmem>>, vector<8x8x3xf32>,
    %85 = vector.extract_strided_slice %82 {offsets = [0, 0, 6], sizes = [8, 8, 3], strides = [1, 1, 1]} : vector<8x8x12xf32> to vector<8x8x3xf32>
    %c0_129 = arith.constant 0 : index
    %c0_130 = arith.constant 0 : index
    %c21_131 = arith.constant 21 : index
    %86 = vector.load %arg7[%c0_129, %c0_130, %c21_131] : memref<8x8x27xf32, #tpu.memory_space<vmem>>, vector<8x8x3xf32>
    tpu.vector_store %arg7[%c0_129, %c0_130, %c21_131], %85 {strides = array<i32>} : memref<8x8x27xf32, #tpu.memory_space<vmem>>, vector<8x8x3xf32>,
    %87 = vector.extract_strided_slice %82 {offsets = [0, 0, 9], sizes = [8, 8, 3], strides = [1, 1, 1]} : vector<8x8x12xf32> to vector<8x8x3xf32>
    %c0_132 = arith.constant 0 : index
    %c0_133 = arith.constant 0 : index
    %c24_134 = arith.constant 24 : index
    %88 = vector.load %arg7[%c0_132, %c0_133, %c24_134] : memref<8x8x27xf32, #tpu.memory_space<vmem>>, vector<8x8x3xf32>
    tpu.vector_store %arg7[%c0_132, %c0_133, %c24_134], %87 {strides = array<i32>} : memref<8x8x27xf32, #tpu.memory_space<vmem>>, vector<8x8x3xf32>,
    %c0_135 = arith.constant 0 : index
    %c0_136 = arith.constant 0 : index
    %c0_137 = arith.constant 0 : index
    %89 = vector.load %arg7[%c0_135, %c0_136, %c0_137] : memref<8x8x27xf32, #tpu.memory_space<vmem>>, vector<8x8x27xf32>
    %90 = vector.shape_cast %89 : vector<8x8x27xf32> to vector<64x27xf32>
    %cst_138 = arith.constant dense<0.000000e+00> : vector<64x32xf32>
    %91 = tpu.matmul %90, %0, %cst_138 {dimension_numbers = #tpu.dot_dimension_numbers<[1], [0], [0], [1], [0, 0, 1, 1], [], []>} : vector<64x27xf32>, vector<27x32xf32>, vector<64x32xf32> -> vector<64x32xf32>
    %92 = vector.broadcast %1 : vector<1x32xf32> to vector<64x32xf32>
    %93 = arith.addf %91, %92 : vector<64x32xf32>
    %cst_139 = arith.constant 5.000000e-01 : f32
    %94 = vector.broadcast %cst_139 : f32 to vector<64x32xf32>
    %95 = arith.mulf %94, %93 : vector<64x32xf32>
    %cst_140 = arith.constant 0.707106769 : f32
    %96 = vector.broadcast %cst_140 : f32 to vector<64x32xf32>
    %97 = arith.mulf %93, %96 : vector<64x32xf32>
    %98 = math.erf %97 : vector<64x32xf32>
    %cst_141 = arith.constant 1.000000e+00 : f32
    %99 = vector.broadcast %cst_141 : f32 to vector<64x32xf32>
    %100 = arith.addf %99, %98 : vector<64x32xf32>
    %101 = arith.mulf %95, %100 : vector<64x32xf32>
    %102 = vector.shape_cast %101 : vector<64x32xf32> to vector<8x8x32xf32>
    %c1_142 = arith.constant 1 : index
    %c0_143 = arith.constant 0 : index
    %c0_144 = arith.constant 0 : index
    %c1_145 = arith.constant 1 : index
    %c0_146 = arith.constant 0 : index
    %103 = vector.load %arg8[%c1_142, %c0_143, %c0_144, %c1_145, %c0_146] : memref<2x2x9x9x32xf32, #tpu.memory_space<vmem>>, vector<1x1x8x8x32xf32>
    %104 = vector.shape_cast %103 : vector<1x1x8x8x32xf32> to vector<8x8x32xf32>
    %105 = vector.shape_cast %102 : vector<8x8x32xf32> to vector<1x1x8x8x32xf32>
    tpu.vector_store %arg8[%c1_142, %c0_143, %c0_144, %c1_145, %c0_146], %105 {strides = array<i32>} : memref<2x2x9x9x32xf32, #tpu.memory_space<vmem>>, vector<1x1x8x8x32xf32>,
    %c0_147 = arith.constant 0 : index
    %c0_148 = arith.constant 0 : index
    %c1_149 = arith.constant 1 : index
    %c0_150 = arith.constant 0 : index
    %c0_151 = arith.constant 0 : index
    %106 = vector.load %arg1[%c0_147, %c0_148, %c1_149, %c0_150, %c0_151] : memref<1x8x4x8x12xf32, #tpu.memory_space<vmem>>, vector<1x8x1x8x12xf32>
    %107 = vector.shape_cast %106 : vector<1x8x1x8x12xf32> to vector<8x8x12xf32>
    %cst_152 = arith.constant 0.000000e+00 : f32
    %108 = vector.broadcast %cst_152 : f32 to vector<8x1x3xf32>
    %c0_153 = arith.constant 0 : index
    %c0_154 = arith.constant 0 : index
    %c0_155 = arith.constant 0 : index
    %109 = vector.load %arg7[%c0_153, %c0_154, %c0_155] : memref<8x8x27xf32, #tpu.memory_space<vmem>>, vector<8x1x3xf32>
    tpu.vector_store %arg7[%c0_153, %c0_154, %c0_155], %108 {strides = array<i32>} : memref<8x8x27xf32, #tpu.memory_space<vmem>>, vector<8x1x3xf32>,
    %110 = vector.extract_strided_slice %107 {offsets = [0, 0, 9], sizes = [8, 7, 3], strides = [1, 1, 1]} : vector<8x8x12xf32> to vector<8x7x3xf32>
    %c0_156 = arith.constant 0 : index
    %c1_157 = arith.constant 1 : index
    %c0_158 = arith.constant 0 : index
    %111 = vector.load %arg7[%c0_156, %c1_157, %c0_158] : memref<8x8x27xf32, #tpu.memory_space<vmem>>, vector<8x7x3xf32>
    tpu.vector_store %arg7[%c0_156, %c1_157, %c0_158], %110 {strides = array<i32>} : memref<8x8x27xf32, #tpu.memory_space<vmem>>, vector<8x7x3xf32>,
    %112 = vector.extract_strided_slice %107 {offsets = [0, 0, 0], sizes = [8, 8, 3], strides = [1, 1, 1]} : vector<8x8x12xf32> to vector<8x8x3xf32>
    %c0_159 = arith.constant 0 : index
    %c0_160 = arith.constant 0 : index
    %c3_161 = arith.constant 3 : index
    %113 = vector.load %arg7[%c0_159, %c0_160, %c3_161] : memref<8x8x27xf32, #tpu.memory_space<vmem>>, vector<8x8x3xf32>
    tpu.vector_store %arg7[%c0_159, %c0_160, %c3_161], %112 {strides = array<i32>} : memref<8x8x27xf32, #tpu.memory_space<vmem>>, vector<8x8x3xf32>,
    %114 = vector.extract_strided_slice %107 {offsets = [0, 0, 3], sizes = [8, 8, 3], strides = [1, 1, 1]} : vector<8x8x12xf32> to vector<8x8x3xf32>
    %c0_162 = arith.constant 0 : index
    %c0_163 = arith.constant 0 : index
    %c6_164 = arith.constant 6 : index
    %115 = vector.load %arg7[%c0_162, %c0_163, %c6_164] : memref<8x8x27xf32, #tpu.memory_space<vmem>>, vector<8x8x3xf32>
    tpu.vector_store %arg7[%c0_162, %c0_163, %c6_164], %114 {strides = array<i32>} : memref<8x8x27xf32, #tpu.memory_space<vmem>>, vector<8x8x3xf32>,
    %c0_165 = arith.constant 0 : index
    %c0_166 = arith.constant 0 : index
    %c2 = arith.constant 2 : index
    %c0_167 = arith.constant 0 : index
    %c0_168 = arith.constant 0 : index
    %116 = vector.load %arg1[%c0_165, %c0_166, %c2, %c0_167, %c0_168] : memref<1x8x4x8x12xf32, #tpu.memory_space<vmem>>, vector<1x8x1x8x12xf32>
    %117 = vector.shape_cast %116 : vector<1x8x1x8x12xf32> to vector<8x8x12xf32>
    %cst_169 = arith.constant 0.000000e+00 : f32
    %118 = vector.broadcast %cst_169 : f32 to vector<8x1x3xf32>
    %c0_170 = arith.constant 0 : index
    %c0_171 = arith.constant 0 : index
    %c9_172 = arith.constant 9 : index
    %119 = vector.load %arg7[%c0_170, %c0_171, %c9_172] : memref<8x8x27xf32, #tpu.memory_space<vmem>>, vector<8x1x3xf32>
    tpu.vector_store %arg7[%c0_170, %c0_171, %c9_172], %118 {strides = array<i32>} : memref<8x8x27xf32, #tpu.memory_space<vmem>>, vector<8x1x3xf32>,
    %120 = vector.extract_strided_slice %117 {offsets = [0, 0, 9], sizes = [8, 7, 3], strides = [1, 1, 1]} : vector<8x8x12xf32> to vector<8x7x3xf32>
    %c0_173 = arith.constant 0 : index
    %c1_174 = arith.constant 1 : index
    %c9_175 = arith.constant 9 : index
    %121 = vector.load %arg7[%c0_173, %c1_174, %c9_175] : memref<8x8x27xf32, #tpu.memory_space<vmem>>, vector<8x7x3xf32>
    tpu.vector_store %arg7[%c0_173, %c1_174, %c9_175], %120 {strides = array<i32>} : memref<8x8x27xf32, #tpu.memory_space<vmem>>, vector<8x7x3xf32>,
    %122 = vector.extract_strided_slice %117 {offsets = [0, 0, 0], sizes = [8, 8, 3], strides = [1, 1, 1]} : vector<8x8x12xf32> to vector<8x8x3xf32>
    %c0_176 = arith.constant 0 : index
    %c0_177 = arith.constant 0 : index
    %c12_178 = arith.constant 12 : index
    %123 = vector.load %arg7[%c0_176, %c0_177, %c12_178] : memref<8x8x27xf32, #tpu.memory_space<vmem>>, vector<8x8x3xf32>
    tpu.vector_store %arg7[%c0_176, %c0_177, %c12_178], %122 {strides = array<i32>} : memref<8x8x27xf32, #tpu.memory_space<vmem>>, vector<8x8x3xf32>,
    %124 = vector.extract_strided_slice %117 {offsets = [0, 0, 3], sizes = [8, 8, 3], strides = [1, 1, 1]} : vector<8x8x12xf32> to vector<8x8x3xf32>
    %c0_179 = arith.constant 0 : index
    %c0_180 = arith.constant 0 : index
    %c15_181 = arith.constant 15 : index
    %125 = vector.load %arg7[%c0_179, %c0_180, %c15_181] : memref<8x8x27xf32, #tpu.memory_space<vmem>>, vector<8x8x3xf32>
    tpu.vector_store %arg7[%c0_179, %c0_180, %c15_181], %124 {strides = array<i32>} : memref<8x8x27xf32, #tpu.memory_space<vmem>>, vector<8x8x3xf32>,
    %c0_182 = arith.constant 0 : index
    %c0_183 = arith.constant 0 : index
    %c3_184 = arith.constant 3 : index
    %c0_185 = arith.constant 0 : index
    %c0_186 = arith.constant 0 : index
    %126 = vector.load %arg1[%c0_182, %c0_183, %c3_184, %c0_185, %c0_186] : memref<1x8x4x8x12xf32, #tpu.memory_space<vmem>>, vector<1x8x1x8x12xf32>
    %127 = vector.shape_cast %126 : vector<1x8x1x8x12xf32> to vector<8x8x12xf32>
    %cst_187 = arith.constant 0.000000e+00 : f32
    %128 = vector.broadcast %cst_187 : f32 to vector<8x1x3xf32>
    %c0_188 = arith.constant 0 : index
    %c0_189 = arith.constant 0 : index
    %c18_190 = arith.constant 18 : index
    %129 = vector.load %arg7[%c0_188, %c0_189, %c18_190] : memref<8x8x27xf32, #tpu.memory_space<vmem>>, vector<8x1x3xf32>
    tpu.vector_store %arg7[%c0_188, %c0_189, %c18_190], %128 {strides = array<i32>} : memref<8x8x27xf32, #tpu.memory_space<vmem>>, vector<8x1x3xf32>,
    %130 = vector.extract_strided_slice %127 {offsets = [0, 0, 9], sizes = [8, 7, 3], strides = [1, 1, 1]} : vector<8x8x12xf32> to vector<8x7x3xf32>
    %c0_191 = arith.constant 0 : index
    %c1_192 = arith.constant 1 : index
    %c18_193 = arith.constant 18 : index
    %131 = vector.load %arg7[%c0_191, %c1_192, %c18_193] : memref<8x8x27xf32, #tpu.memory_space<vmem>>, vector<8x7x3xf32>
    tpu.vector_store %arg7[%c0_191, %c1_192, %c18_193], %130 {strides = array<i32>} : memref<8x8x27xf32, #tpu.memory_space<vmem>>, vector<8x7x3xf32>,
    %132 = vector.extract_strided_slice %127 {offsets = [0, 0, 0], sizes = [8, 8, 3], strides = [1, 1, 1]} : vector<8x8x12xf32> to vector<8x8x3xf32>
    %c0_194 = arith.constant 0 : index
    %c0_195 = arith.constant 0 : index
    %c21_196 = arith.constant 21 : index
    %133 = vector.load %arg7[%c0_194, %c0_195, %c21_196] : memref<8x8x27xf32, #tpu.memory_space<vmem>>, vector<8x8x3xf32>
    tpu.vector_store %arg7[%c0_194, %c0_195, %c21_196], %132 {strides = array<i32>} : memref<8x8x27xf32, #tpu.memory_space<vmem>>, vector<8x8x3xf32>,
    %134 = vector.extract_strided_slice %127 {offsets = [0, 0, 3], sizes = [8, 8, 3], strides = [1, 1, 1]} : vector<8x8x12xf32> to vector<8x8x3xf32>
    %c0_197 = arith.constant 0 : index
    %c0_198 = arith.constant 0 : index
    %c24_199 = arith.constant 24 : index
    %135 = vector.load %arg7[%c0_197, %c0_198, %c24_199] : memref<8x8x27xf32, #tpu.memory_space<vmem>>, vector<8x8x3xf32>
    tpu.vector_store %arg7[%c0_197, %c0_198, %c24_199], %134 {strides = array<i32>} : memref<8x8x27xf32, #tpu.memory_space<vmem>>, vector<8x8x3xf32>,
    %c0_200 = arith.constant 0 : index
    %c0_201 = arith.constant 0 : index
    %c0_202 = arith.constant 0 : index
    %136 = vector.load %arg7[%c0_200, %c0_201, %c0_202] : memref<8x8x27xf32, #tpu.memory_space<vmem>>, vector<8x8x27xf32>
    %137 = vector.shape_cast %136 : vector<8x8x27xf32> to vector<64x27xf32>
    %cst_203 = arith.constant dense<0.000000e+00> : vector<64x32xf32>
    %138 = tpu.matmul %137, %0, %cst_203 {dimension_numbers = #tpu.dot_dimension_numbers<[1], [0], [0], [1], [0, 0, 1, 1], [], []>} : vector<64x27xf32>, vector<27x32xf32>, vector<64x32xf32> -> vector<64x32xf32>
    %139 = vector.broadcast %1 : vector<1x32xf32> to vector<64x32xf32>
    %140 = arith.addf %138, %139 : vector<64x32xf32>
    %cst_204 = arith.constant 5.000000e-01 : f32
    %141 = vector.broadcast %cst_204 : f32 to vector<64x32xf32>
    %142 = arith.mulf %141, %140 : vector<64x32xf32>
    %cst_205 = arith.constant 0.707106769 : f32
    %143 = vector.broadcast %cst_205 : f32 to vector<64x32xf32>
    %144 = arith.mulf %140, %143 : vector<64x32xf32>
    %145 = math.erf %144 : vector<64x32xf32>
    %cst_206 = arith.constant 1.000000e+00 : f32
    %146 = vector.broadcast %cst_206 : f32 to vector<64x32xf32>
    %147 = arith.addf %146, %145 : vector<64x32xf32>
    %148 = arith.mulf %142, %147 : vector<64x32xf32>
    %149 = vector.shape_cast %148 : vector<64x32xf32> to vector<8x8x32xf32>
    %c0_207 = arith.constant 0 : index
    %c1_208 = arith.constant 1 : index
    %c1_209 = arith.constant 1 : index
    %c0_210 = arith.constant 0 : index
    %c0_211 = arith.constant 0 : index
    %150 = vector.load %arg8[%c0_207, %c1_208, %c1_209, %c0_210, %c0_211] : memref<2x2x9x9x32xf32, #tpu.memory_space<vmem>>, vector<1x1x8x8x32xf32>
    %151 = vector.shape_cast %150 : vector<1x1x8x8x32xf32> to vector<8x8x32xf32>
    %152 = vector.shape_cast %149 : vector<8x8x32xf32> to vector<1x1x8x8x32xf32>
    tpu.vector_store %arg8[%c0_207, %c1_208, %c1_209, %c0_210, %c0_211], %152 {strides = array<i32>} : memref<2x2x9x9x32xf32, #tpu.memory_space<vmem>>, vector<1x1x8x8x32xf32>,
    %c0_212 = arith.constant 0 : index
    %c0_213 = arith.constant 0 : index
    %c1_214 = arith.constant 1 : index
    %c0_215 = arith.constant 0 : index
    %c0_216 = arith.constant 0 : index
    %153 = vector.load %arg1[%c0_212, %c0_213, %c1_214, %c0_215, %c0_216] : memref<1x8x4x8x12xf32, #tpu.memory_space<vmem>>, vector<1x8x1x8x12xf32>
    %154 = vector.shape_cast %153 : vector<1x8x1x8x12xf32> to vector<8x8x12xf32>
    %155 = vector.extract_strided_slice %154 {offsets = [0, 0, 3], sizes = [8, 8, 3], strides = [1, 1, 1]} : vector<8x8x12xf32> to vector<8x8x3xf32>
    %c0_217 = arith.constant 0 : index
    %c0_218 = arith.constant 0 : index
    %c0_219 = arith.constant 0 : index
    %156 = vector.load %arg7[%c0_217, %c0_218, %c0_219] : memref<8x8x27xf32, #tpu.memory_space<vmem>>, vector<8x8x3xf32>
    tpu.vector_store %arg7[%c0_217, %c0_218, %c0_219], %155 {strides = array<i32>} : memref<8x8x27xf32, #tpu.memory_space<vmem>>, vector<8x8x3xf32>,
    %157 = vector.extract_strided_slice %154 {offsets = [0, 0, 6], sizes = [8, 8, 3], strides = [1, 1, 1]} : vector<8x8x12xf32> to vector<8x8x3xf32>
    %c0_220 = arith.constant 0 : index
    %c0_221 = arith.constant 0 : index
    %c3_222 = arith.constant 3 : index
    %158 = vector.load %arg7[%c0_220, %c0_221, %c3_222] : memref<8x8x27xf32, #tpu.memory_space<vmem>>, vector<8x8x3xf32>
    tpu.vector_store %arg7[%c0_220, %c0_221, %c3_222], %157 {strides = array<i32>} : memref<8x8x27xf32, #tpu.memory_space<vmem>>, vector<8x8x3xf32>,
    %159 = vector.extract_strided_slice %154 {offsets = [0, 0, 9], sizes = [8, 8, 3], strides = [1, 1, 1]} : vector<8x8x12xf32> to vector<8x8x3xf32>
    %c0_223 = arith.constant 0 : index
    %c0_224 = arith.constant 0 : index
    %c6_225 = arith.constant 6 : index
    %160 = vector.load %arg7[%c0_223, %c0_224, %c6_225] : memref<8x8x27xf32, #tpu.memory_space<vmem>>, vector<8x8x3xf32>
    tpu.vector_store %arg7[%c0_223, %c0_224, %c6_225], %159 {strides = array<i32>} : memref<8x8x27xf32, #tpu.memory_space<vmem>>, vector<8x8x3xf32>,
    %c0_226 = arith.constant 0 : index
    %c0_227 = arith.constant 0 : index
    %c2_228 = arith.constant 2 : index
    %c0_229 = arith.constant 0 : index
    %c0_230 = arith.constant 0 : index
    %161 = vector.load %arg1[%c0_226, %c0_227, %c2_228, %c0_229, %c0_230] : memref<1x8x4x8x12xf32, #tpu.memory_space<vmem>>, vector<1x8x1x8x12xf32>
    %162 = vector.shape_cast %161 : vector<1x8x1x8x12xf32> to vector<8x8x12xf32>
    %163 = vector.extract_strided_slice %162 {offsets = [0, 0, 3], sizes = [8, 8, 3], strides = [1, 1, 1]} : vector<8x8x12xf32> to vector<8x8x3xf32>
    %c0_231 = arith.constant 0 : index
    %c0_232 = arith.constant 0 : index
    %c9_233 = arith.constant 9 : index
    %164 = vector.load %arg7[%c0_231, %c0_232, %c9_233] : memref<8x8x27xf32, #tpu.memory_space<vmem>>, vector<8x8x3xf32>
    tpu.vector_store %arg7[%c0_231, %c0_232, %c9_233], %163 {strides = array<i32>} : memref<8x8x27xf32, #tpu.memory_space<vmem>>, vector<8x8x3xf32>,
    %165 = vector.extract_strided_slice %162 {offsets = [0, 0, 6], sizes = [8, 8, 3], strides = [1, 1, 1]} : vector<8x8x12xf32> to vector<8x8x3xf32>
    %c0_234 = arith.constant 0 : index
    %c0_235 = arith.constant 0 : index
    %c12_236 = arith.constant 12 : index
    %166 = vector.load %arg7[%c0_234, %c0_235, %c12_236] : memref<8x8x27xf32, #tpu.memory_space<vmem>>, vector<8x8x3xf32>
    tpu.vector_store %arg7[%c0_234, %c0_235, %c12_236], %165 {strides = array<i32>} : memref<8x8x27xf32, #tpu.memory_space<vmem>>, vector<8x8x3xf32>,
    %167 = vector.extract_strided_slice %162 {offsets = [0, 0, 9], sizes = [8, 8, 3], strides = [1, 1, 1]} : vector<8x8x12xf32> to vector<8x8x3xf32>
    %c0_237 = arith.constant 0 : index
    %c0_238 = arith.constant 0 : index
    %c15_239 = arith.constant 15 : index
    %168 = vector.load %arg7[%c0_237, %c0_238, %c15_239] : memref<8x8x27xf32, #tpu.memory_space<vmem>>, vector<8x8x3xf32>
    tpu.vector_store %arg7[%c0_237, %c0_238, %c15_239], %167 {strides = array<i32>} : memref<8x8x27xf32, #tpu.memory_space<vmem>>, vector<8x8x3xf32>,
    %c0_240 = arith.constant 0 : index
    %c0_241 = arith.constant 0 : index
    %c3_242 = arith.constant 3 : index
    %c0_243 = arith.constant 0 : index
    %c0_244 = arith.constant 0 : index
    %169 = vector.load %arg1[%c0_240, %c0_241, %c3_242, %c0_243, %c0_244] : memref<1x8x4x8x12xf32, #tpu.memory_space<vmem>>, vector<1x8x1x8x12xf32>
    %170 = vector.shape_cast %169 : vector<1x8x1x8x12xf32> to vector<8x8x12xf32>
    %171 = vector.extract_strided_slice %170 {offsets = [0, 0, 3], sizes = [8, 8, 3], strides = [1, 1, 1]} : vector<8x8x12xf32> to vector<8x8x3xf32>
    %c0_245 = arith.constant 0 : index
    %c0_246 = arith.constant 0 : index
    %c18_247 = arith.constant 18 : index
    %172 = vector.load %arg7[%c0_245, %c0_246, %c18_247] : memref<8x8x27xf32, #tpu.memory_space<vmem>>, vector<8x8x3xf32>
    tpu.vector_store %arg7[%c0_245, %c0_246, %c18_247], %171 {strides = array<i32>} : memref<8x8x27xf32, #tpu.memory_space<vmem>>, vector<8x8x3xf32>,
    %173 = vector.extract_strided_slice %170 {offsets = [0, 0, 6], sizes = [8, 8, 3], strides = [1, 1, 1]} : vector<8x8x12xf32> to vector<8x8x3xf32>
    %c0_248 = arith.constant 0 : index
    %c0_249 = arith.constant 0 : index
    %c21_250 = arith.constant 21 : index
    %174 = vector.load %arg7[%c0_248, %c0_249, %c21_250] : memref<8x8x27xf32, #tpu.memory_space<vmem>>, vector<8x8x3xf32>
    tpu.vector_store %arg7[%c0_248, %c0_249, %c21_250], %173 {strides = array<i32>} : memref<8x8x27xf32, #tpu.memory_space<vmem>>, vector<8x8x3xf32>,
    %175 = vector.extract_strided_slice %170 {offsets = [0, 0, 9], sizes = [8, 8, 3], strides = [1, 1, 1]} : vector<8x8x12xf32> to vector<8x8x3xf32>
    %c0_251 = arith.constant 0 : index
    %c0_252 = arith.constant 0 : index
    %c24_253 = arith.constant 24 : index
    %176 = vector.load %arg7[%c0_251, %c0_252, %c24_253] : memref<8x8x27xf32, #tpu.memory_space<vmem>>, vector<8x8x3xf32>
    tpu.vector_store %arg7[%c0_251, %c0_252, %c24_253], %175 {strides = array<i32>} : memref<8x8x27xf32, #tpu.memory_space<vmem>>, vector<8x8x3xf32>,
    %c0_254 = arith.constant 0 : index
    %c0_255 = arith.constant 0 : index
    %c0_256 = arith.constant 0 : index
    %177 = vector.load %arg7[%c0_254, %c0_255, %c0_256] : memref<8x8x27xf32, #tpu.memory_space<vmem>>, vector<8x8x27xf32>
    %178 = vector.shape_cast %177 : vector<8x8x27xf32> to vector<64x27xf32>
    %cst_257 = arith.constant dense<0.000000e+00> : vector<64x32xf32>
    %179 = tpu.matmul %178, %0, %cst_257 {dimension_numbers = #tpu.dot_dimension_numbers<[1], [0], [0], [1], [0, 0, 1, 1], [], []>} : vector<64x27xf32>, vector<27x32xf32>, vector<64x32xf32> -> vector<64x32xf32>
    %180 = vector.broadcast %1 : vector<1x32xf32> to vector<64x32xf32>
    %181 = arith.addf %179, %180 : vector<64x32xf32>
    %cst_258 = arith.constant 5.000000e-01 : f32
    %182 = vector.broadcast %cst_258 : f32 to vector<64x32xf32>
    %183 = arith.mulf %182, %181 : vector<64x32xf32>
    %cst_259 = arith.constant 0.707106769 : f32
    %184 = vector.broadcast %cst_259 : f32 to vector<64x32xf32>
    %185 = arith.mulf %181, %184 : vector<64x32xf32>
    %186 = math.erf %185 : vector<64x32xf32>
    %cst_260 = arith.constant 1.000000e+00 : f32
    %187 = vector.broadcast %cst_260 : f32 to vector<64x32xf32>
    %188 = arith.addf %187, %186 : vector<64x32xf32>
    %189 = arith.mulf %183, %188 : vector<64x32xf32>
    %190 = vector.shape_cast %189 : vector<64x32xf32> to vector<8x8x32xf32>
    %c0_261 = arith.constant 0 : index
    %c0_262 = arith.constant 0 : index
    %c1_263 = arith.constant 1 : index
    %c1_264 = arith.constant 1 : index
    %c0_265 = arith.constant 0 : index
    %191 = vector.load %arg8[%c0_261, %c0_262, %c1_263, %c1_264, %c0_265] : memref<2x2x9x9x32xf32, #tpu.memory_space<vmem>>, vector<1x1x8x8x32xf32>
    %192 = vector.shape_cast %191 : vector<1x1x8x8x32xf32> to vector<8x8x32xf32>
    %193 = vector.shape_cast %190 : vector<8x8x32xf32> to vector<1x1x8x8x32xf32>
    tpu.vector_store %arg8[%c0_261, %c0_262, %c1_263, %c1_264, %c0_265], %193 {strides = array<i32>} : memref<2x2x9x9x32xf32, #tpu.memory_space<vmem>>, vector<1x1x8x8x32xf32>,
    %c0_266 = arith.constant 0 : index
    %c0_267 = arith.constant 0 : index
    %c0_268 = arith.constant 0 : index
    %c0_269 = arith.constant 0 : index
    %c0_270 = arith.constant 0 : index
    %194 = vector.load %arg8[%c0_266, %c0_267, %c0_268, %c0_269, %c0_270] : memref<2x2x9x9x32xf32, #tpu.memory_space<vmem>>, vector<1x1x8x8x32xf32>
    %195 = vector.shape_cast %194 : vector<1x1x8x8x32xf32> to vector<8x8x32xf32>
    %c0_271 = arith.constant 0 : index
    %c0_272 = arith.constant 0 : index
    %c0_273 = arith.constant 0 : index
    %196 = vector.load %arg9[%c0_271, %c0_272, %c0_273] : memref<8x8x288xf32, #tpu.memory_space<vmem>>, vector<8x8x32xf32>
    tpu.vector_store %arg9[%c0_271, %c0_272, %c0_273], %195 {strides = array<i32>} : memref<8x8x288xf32, #tpu.memory_space<vmem>>, vector<8x8x32xf32>,
    %c0_274 = arith.constant 0 : index
    %c1_275 = arith.constant 1 : index
    %c0_276 = arith.constant 0 : index
    %c0_277 = arith.constant 0 : index
    %c0_278 = arith.constant 0 : index
    %197 = vector.load %arg8[%c0_274, %c1_275, %c0_276, %c0_277, %c0_278] : memref<2x2x9x9x32xf32, #tpu.memory_space<vmem>>, vector<1x1x8x8x32xf32>
    %198 = vector.shape_cast %197 : vector<1x1x8x8x32xf32> to vector<8x8x32xf32>
    %c0_279 = arith.constant 0 : index
    %c0_280 = arith.constant 0 : index
    %c32 = arith.constant 32 : index
    %199 = vector.load %arg9[%c0_279, %c0_280, %c32] : memref<8x8x288xf32, #tpu.memory_space<vmem>>, vector<8x8x32xf32>
    tpu.vector_store %arg9[%c0_279, %c0_280, %c32], %198 {strides = array<i32>} : memref<8x8x288xf32, #tpu.memory_space<vmem>>, vector<8x8x32xf32>,
    %c0_281 = arith.constant 0 : index
    %c0_282 = arith.constant 0 : index
    %c0_283 = arith.constant 0 : index
    %c1_284 = arith.constant 1 : index
    %c0_285 = arith.constant 0 : index
    %200 = vector.load %arg8[%c0_281, %c0_282, %c0_283, %c1_284, %c0_285] : memref<2x2x9x9x32xf32, #tpu.memory_space<vmem>>, vector<1x1x8x8x32xf32>
    %201 = vector.shape_cast %200 : vector<1x1x8x8x32xf32> to vector<8x8x32xf32>
    %c0_286 = arith.constant 0 : index
    %c0_287 = arith.constant 0 : index
    %c64 = arith.constant 64 : index
    %202 = vector.load %arg9[%c0_286, %c0_287, %c64] : memref<8x8x288xf32, #tpu.memory_space<vmem>>, vector<8x8x32xf32>
    tpu.vector_store %arg9[%c0_286, %c0_287, %c64], %201 {strides = array<i32>} : memref<8x8x288xf32, #tpu.memory_space<vmem>>, vector<8x8x32xf32>,
    %c1_288 = arith.constant 1 : index
    %c0_289 = arith.constant 0 : index
    %c0_290 = arith.constant 0 : index
    %c0_291 = arith.constant 0 : index
    %c0_292 = arith.constant 0 : index
    %203 = vector.load %arg8[%c1_288, %c0_289, %c0_290, %c0_291, %c0_292] : memref<2x2x9x9x32xf32, #tpu.memory_space<vmem>>, vector<1x1x8x8x32xf32>
    %204 = vector.shape_cast %203 : vector<1x1x8x8x32xf32> to vector<8x8x32xf32>
    %c0_293 = arith.constant 0 : index
    %c0_294 = arith.constant 0 : index
    %c96 = arith.constant 96 : index
    %205 = vector.load %arg9[%c0_293, %c0_294, %c96] : memref<8x8x288xf32, #tpu.memory_space<vmem>>, vector<8x8x32xf32>
    tpu.vector_store %arg9[%c0_293, %c0_294, %c96], %204 {strides = array<i32>} : memref<8x8x288xf32, #tpu.memory_space<vmem>>, vector<8x8x32xf32>,
    %c1_295 = arith.constant 1 : index
    %c1_296 = arith.constant 1 : index
    %c0_297 = arith.constant 0 : index
    %c0_298 = arith.constant 0 : index
    %c0_299 = arith.constant 0 : index
    %206 = vector.load %arg8[%c1_295, %c1_296, %c0_297, %c0_298, %c0_299] : memref<2x2x9x9x32xf32, #tpu.memory_space<vmem>>, vector<1x1x8x8x32xf32>
    %207 = vector.shape_cast %206 : vector<1x1x8x8x32xf32> to vector<8x8x32xf32>
    %c0_300 = arith.constant 0 : index
    %c0_301 = arith.constant 0 : index
    %c128 = arith.constant 128 : index
    %208 = vector.load %arg9[%c0_300, %c0_301, %c128] : memref<8x8x288xf32, #tpu.memory_space<vmem>>, vector<8x8x32xf32>
    tpu.vector_store %arg9[%c0_300, %c0_301, %c128], %207 {strides = array<i32>} : memref<8x8x288xf32, #tpu.memory_space<vmem>>, vector<8x8x32xf32>,
    %c1_302 = arith.constant 1 : index
    %c0_303 = arith.constant 0 : index
    %c0_304 = arith.constant 0 : index
    %c1_305 = arith.constant 1 : index
    %c0_306 = arith.constant 0 : index
    %209 = vector.load %arg8[%c1_302, %c0_303, %c0_304, %c1_305, %c0_306] : memref<2x2x9x9x32xf32, #tpu.memory_space<vmem>>, vector<1x1x8x8x32xf32>
    %210 = vector.shape_cast %209 : vector<1x1x8x8x32xf32> to vector<8x8x32xf32>
    %c0_307 = arith.constant 0 : index
    %c0_308 = arith.constant 0 : index
    %c160 = arith.constant 160 : index
    %211 = vector.load %arg9[%c0_307, %c0_308, %c160] : memref<8x8x288xf32, #tpu.memory_space<vmem>>, vector<8x8x32xf32>
    tpu.vector_store %arg9[%c0_307, %c0_308, %c160], %210 {strides = array<i32>} : memref<8x8x288xf32, #tpu.memory_space<vmem>>, vector<8x8x32xf32>,
    %c0_309 = arith.constant 0 : index
    %c0_310 = arith.constant 0 : index
    %c1_311 = arith.constant 1 : index
    %c0_312 = arith.constant 0 : index
    %c0_313 = arith.constant 0 : index
    %212 = vector.load %arg8[%c0_309, %c0_310, %c1_311, %c0_312, %c0_313] : memref<2x2x9x9x32xf32, #tpu.memory_space<vmem>>, vector<1x1x8x8x32xf32>
    %213 = vector.shape_cast %212 : vector<1x1x8x8x32xf32> to vector<8x8x32xf32>
    %c0_314 = arith.constant 0 : index
    %c0_315 = arith.constant 0 : index
    %c192 = arith.constant 192 : index
    %214 = vector.load %arg9[%c0_314, %c0_315, %c192] : memref<8x8x288xf32, #tpu.memory_space<vmem>>, vector<8x8x32xf32>
    tpu.vector_store %arg9[%c0_314, %c0_315, %c192], %213 {strides = array<i32>} : memref<8x8x288xf32, #tpu.memory_space<vmem>>, vector<8x8x32xf32>,
    %c0_316 = arith.constant 0 : index
    %c1_317 = arith.constant 1 : index
    %c1_318 = arith.constant 1 : index
    %c0_319 = arith.constant 0 : index
    %c0_320 = arith.constant 0 : index
    %215 = vector.load %arg8[%c0_316, %c1_317, %c1_318, %c0_319, %c0_320] : memref<2x2x9x9x32xf32, #tpu.memory_space<vmem>>, vector<1x1x8x8x32xf32>
    %216 = vector.shape_cast %215 : vector<1x1x8x8x32xf32> to vector<8x8x32xf32>
    %c0_321 = arith.constant 0 : index
    %c0_322 = arith.constant 0 : index
    %c224 = arith.constant 224 : index
    %217 = vector.load %arg9[%c0_321, %c0_322, %c224] : memref<8x8x288xf32, #tpu.memory_space<vmem>>, vector<8x8x32xf32>
    tpu.vector_store %arg9[%c0_321, %c0_322, %c224], %216 {strides = array<i32>} : memref<8x8x288xf32, #tpu.memory_space<vmem>>, vector<8x8x32xf32>,
    %c0_323 = arith.constant 0 : index
    %c0_324 = arith.constant 0 : index
    %c1_325 = arith.constant 1 : index
    %c1_326 = arith.constant 1 : index
    %c0_327 = arith.constant 0 : index
    %218 = vector.load %arg8[%c0_323, %c0_324, %c1_325, %c1_326, %c0_327] : memref<2x2x9x9x32xf32, #tpu.memory_space<vmem>>, vector<1x1x8x8x32xf32>
    %219 = vector.shape_cast %218 : vector<1x1x8x8x32xf32> to vector<8x8x32xf32>
    %c0_328 = arith.constant 0 : index
    %c0_329 = arith.constant 0 : index
    %c256 = arith.constant 256 : index
    %220 = vector.load %arg9[%c0_328, %c0_329, %c256] : memref<8x8x288xf32, #tpu.memory_space<vmem>>, vector<8x8x32xf32>
    tpu.vector_store %arg9[%c0_328, %c0_329, %c256], %219 {strides = array<i32>} : memref<8x8x288xf32, #tpu.memory_space<vmem>>, vector<8x8x32xf32>,
    %c0_330 = arith.constant 0 : index
    %c0_331 = arith.constant 0 : index
    %c0_332 = arith.constant 0 : index
    %221 = vector.load %arg9[%c0_330, %c0_331, %c0_332] : memref<8x8x288xf32, #tpu.memory_space<vmem>>, vector<8x8x288xf32>
    %222 = vector.shape_cast %221 : vector<8x8x288xf32> to vector<64x288xf32>
    %cst_333 = arith.constant dense<0.000000e+00> : vector<64x64xf32>
    %223 = tpu.matmul %222, %2, %cst_333 {dimension_numbers = #tpu.dot_dimension_numbers<[1], [0], [0], [1], [0, 0, 1, 1], [], []>} : vector<64x288xf32>, vector<288x64xf32>, vector<64x64xf32> -> vector<64x64xf32>
    %224 = vector.broadcast %3 : vector<1x64xf32> to vector<64x64xf32>
    %225 = arith.addf %223, %224 : vector<64x64xf32>
    %c0_334 = arith.constant 0 : index
    %c0_335 = arith.constant 0 : index
    %c0_336 = arith.constant 0 : index
    %226 = vector.load %arg6[%c0_334, %c0_335, %c0_336] : memref<1x64x64xf32, #tpu.memory_space<vmem>>, vector<1x64x64xf32>
    %227 = vector.shape_cast %226 : vector<1x64x64xf32> to vector<64x64xf32>
    %228 = vector.shape_cast %225 : vector<64x64xf32> to vector<1x64x64xf32>
    tpu.vector_store %arg6[%c0_334, %c0_335, %c0_336], %228 {strides = array<i32>} : memref<1x64x64xf32, #tpu.memory_space<vmem>>, vector<1x64x64xf32>,
    return
  }
  func.func @transform_0(%arg0: i32) -> (i32, i32, i32, i32, i32) {
    %c0_i32 = arith.constant 0 : i32
    %c0_i32_0 = arith.constant 0 : i32
    %c0_i32_1 = arith.constant 0 : i32
    %c0_i32_2 = arith.constant 0 : i32
    %c0_i32_3 = arith.constant 0 : i32
    return %arg0, %c0_i32, %c0_i32_0, %c0_i32_1, %c0_i32_2 : i32, i32, i32, i32, i32
  }
  func.func @transform_1(%arg0: i32) -> (i32, i32) {
    %c0_i32 = arith.constant 0 : i32
    %c0_i32_0 = arith.constant 0 : i32
    %c0_i32_1 = arith.constant 0 : i32
    return %c0_i32, %c0_i32_0 : i32, i32
  }
  func.func @transform_2(%arg0: i32) -> (i32, i32) {
    %c0_i32 = arith.constant 0 : i32
    %c0_i32_0 = arith.constant 0 : i32
    %c0_i32_1 = arith.constant 0 : i32
    return %c0_i32, %c0_i32_0 : i32, i32
  }
  func.func @transform_3(%arg0: i32) -> (i32, i32) {
    %c0_i32 = arith.constant 0 : i32
    %c0_i32_0 = arith.constant 0 : i32
    %c0_i32_1 = arith.constant 0 : i32
    return %c0_i32, %c0_i32_0 : i32, i32
  }
  func.func @transform_4(%arg0: i32) -> (i32, i32) {
    %c0_i32 = arith.constant 0 : i32
    %c0_i32_0 = arith.constant 0 : i32
    %c0_i32_1 = arith.constant 0 : i32
    return %c0_i32, %c0_i32_0 : i32, i32
  }
  func.func @transform_5(%arg0: i32) -> (i32, i32, i32) {
    %c0_i32 = arith.constant 0 : i32
    %c0_i32_0 = arith.constant 0 : i32
    %c0_i32_1 = arith.constant 0 : i32
    return %arg0, %c0_i32, %c0_i32_0 : i32, i32, i32
  }
}

</mosaic_0001>

<bundles_post_ra>
// kernel: stem_conv_forward.1
= control target key start
LH: loop header
LB: loop body
LE: loop exit
PB: predicated region body
PF: predicated region fallthrough
CT: control target
= control target key end

     0   :  { %10 = vsyncpa [#allocation6], 0  ;;  %s4770_s0 = inlined_call_operand.vmem [shape: f32[2,8,4,8,12], index: 0, kind: input, shape index: {}]   ;;  %s4771_s1 = inlined_call_operand.vmem [shape: f32[27,32], index: 1, kind: input, shape index: {}]   ;;  %s4772_s2 = inlined_call_operand.vmem [shape: f32[1,32], index: 2, kind: input, shape index: {}]   ;;  %s4773_s3 = inlined_call_operand.vmem [shape: f32[288,64], index: 3, kind: input, shape index: {}]   ;;  %s4774_s4 = inlined_call_operand.vmem [shape: f32[1,64], index: 4, kind: input, shape index: {}]   ;;  %s4775_s5 = inlined_call_operand.hbm [shape: f32[2,64,64], index: 5, kind: output, shape index: {}]  }
   0x1   :  { %12 = vsyncpa [#allocation6 + $0x1], 0  ;;  %s3363_s18 = smov 0   ;;  %s3365_s19 = smov 0  }
   0x2   :  { %s3367_s20 = smov 0   ;;  %s3369_s21 = smov 0  }
   0x3 LB: > { %s3384_s22 = sadd.s32 4294967295, %s3315_s21   ;;  %s2701_s23 = sadd.s32 4294967294, %s3315_s21   ;;  %s3315_s21 = sphi %s3369_s21, %s4869_s21   ;;  %s3311_s20 = sphi %s3367_s20, %s4868_s20   ;;  %s3307_s19 = sphi %s3365_s19, %s4867_s19   ;;  %s3303_s18 = sphi %s3363_s18, %s4866_s18  }
   0x4   : > { %s3388_s24 = sadd.s32 1, %s3315_s21   ;;  %s135_s25 = sadd.s32 1, %s3311_s20 }
   0x5   : > { %s132_s26 = ssub.s32 %s3315_s21, %s3388_s24  ;;  %p145_p0 = scmp.ne.s32.totalorder %s3311_s20, %s3307_s19 }
   0x6   : > { %p133_p1 = scmp.eq.s32.totalorder %s132_s26, 0  ;;  %p146_p2 = scmp.eq.s32.totalorder %s3384_s22, 1 }
   0x7   : > { %p151_p3 = scmp.ne.s32.totalorder %s3307_s19, %s3303_s18  ;;  %p152_p4 = scmp.eq.s32.totalorder %s2701_s23, 1 }
   0x8   : > { %s3399_s27 = scalar_select %p133_p1, %s3311_s20, %s135_s25  }
   0x9   : > { %p3401_p5 = por %p146_p2, %p145_p0  ;;  %p3405_p6 = por %p152_p4, %p151_p3 }
   0xa   : > { %p2704_p7 = scmp.ge.s32.totalorder %s3315_s21, 1  ;;  %p190_p8 = scmp.lt.s32.totalorder %s3315_s21, 3 }
   0xc   : > { %p191_p9 = pnand %p2704_p7, %p190_p8 }
   0xd   : > { %p218_p10 = scmp.lt.s32.totalorder (!%p191_p9), %s3384_s22, 1  ;;  %vm347_vm0 = vcmask (!%p191_p9), 23552   ;;  %vm349_vm1 = vcmask (!%p191_p9), 16384   ;;  %vm395_vm2 = vcmask (!%p191_p9), 48152   ;;  %v3317_v0 = vmov (!%p191_p9), 0.0   ;;  %s3318_s10 = smov (!%p191_p9), 12  }
   0xe   : > { %194 = sbr.rel (%p191_p9) target bundleno = 1029 (0x405), region = 40  ;;  %348 = vst.msk [vmem:[#allocation2] sm:$0xff] (!%p191_p9), %vm347_vm0, %v3317_v0  ;;  %vm425_vm3 = vcmask (!%p191_p9), 72752   ;;  %vm442_vm4 = vcmask (!%p191_p9), 90184   ;;  %vm4778_vm5 = vcmask (!%p191_p9), 96328   ;;  %s3319_s11 = smov (!%p191_p9), 119  }
   0xf   : > { %351 = vst.msk [vmem:[#allocation2 + $0x8] sm:$0x1] (!%p191_p9), %vm349_vm1, %v3317_v0  ;;  %352 = vst.msk [vmem:[#allocation2 + $0x10] sm:$0x1] (!%p191_p9), %vm349_vm1, %v3317_v0  ;;  %s3320_s12 = smov (!%p191_p9), 3   ;;  %s3321_s13 = smov (!%p191_p9), 9  }
  0x10   : > { %353 = vst.msk [vmem:[#allocation2 + $0x18] sm:$0x1] (!%p191_p9), %vm349_vm1, %v3317_v0  ;;  %354 = vst.msk [vmem:[#allocation2 + $0x20] sm:$0x1] (!%p191_p9), %vm349_vm1, %v3317_v0  ;;  %v223_v6 = vld [vmem:[%s4771_s1] sm:$0xff] (!%p191_p9)  ;;  %v224_v7 = vld [vmem:[%s4771_s1 + $0x8] sm:$0xff] (!%p191_p9) }
  0x11   : > { %355 = vst.msk [vmem:[#allocation2 + $0x28] sm:$0x1] (!%p191_p9), %vm349_vm1, %v3317_v0  ;;  %356 = vst.msk [vmem:[#allocation2 + $0x30] sm:$0x1] (!%p191_p9), %vm349_vm1, %v3317_v0  ;;  %vm650_vm6 = vcmask (!%p191_p9), 1042432   ;;  %v3478_v9 = vpack.c.bf16 (!%p191_p9), %v224_v7, %v223_v6  ;;  %v225_v10 = vld [vmem:[%s4771_s1 + $0x10] sm:$0xff] (!%p191_p9) }
  0x12   : > { %357 = vst.msk [vmem:[#allocation2 + $0x38] sm:$0x1] (!%p191_p9), %vm349_vm1, %v3317_v0  ;;  %350 = vst.msk [vmem:[#allocation2] sm:$0x1] (!%p191_p9), %vm349_vm1, %v3317_v0  ;;  %v226_v11 = vld [vmem:[%s4771_s1 + $0x18] sm:$0x7] (!%p191_p9) }
  0x13   : > { %396 = vst.msk [vmem:[#allocation2] sm:$0xff] (!%p191_p9), %vm395_vm2, %v3317_v0  ;;  %v3486_v12 = vpack.c.bf16 (!%p191_p9), %v226_v11, %v225_v10  ;;  %3056 = vmatprep.subr.bf16.mxu1 (!%p191_p9), %v3478_v9  ;;  %vm3322_vm7 = vmmov (!%p191_p9), 1   ;;  %3076 = vmatprep.subr.bf16.mxu0 (!%p191_p9), %v3478_v9  ;;  %s3324_s7 = smov (!%p191_p9), 125   ;;  %s3325_s8 = smov (!%p191_p9), 6   ;;  %vm492_vm9 = vcmask (!%p191_p9), 121952   ;;  %vm4777_vm10 = vcmask (!%p191_p9), 22528  }
  0x14   : > { %426 = vst.msk [vmem:[#allocation2] sm:$0xff] (!%p191_p9), %vm425_vm3, %v3317_v0  ;;  %vm3489_vm8 = vmpackc.low (!%p191_p9), %vm650_vm6, %vm3322_vm7  ;;  %3058 = vmatpush3.bf16.msra.mxu1 (!%p191_p9), %v3478_v9  ;;  %3078 = vmatpush3.bf16.msra.mxu0 (!%p191_p9), %v3478_v9  ;;  %s3326_s14 = smov (!%p191_p9), 15   ;;  %vm501_vm11 = vcmask (!%p191_p9), 146552   ;;  %vm519_vm12 = vcmask (!%p191_p9), 163984   ;;  %vm560_vm13 = vcmask (!%p191_p9), 170128   ;;  %vm593_vm14 = vcmask (!%p191_p9), 195752  }
  0x15   : > { %s219_s30 = scalar_select %p218_p10, %s3384_s22, 1  ;;  %443 = vst.msk [vmem:[#allocation2] sm:$0x1] %vm442_vm4, %v3317_v0  ;;  %3061 = vmatprep.subr.msk.bf16.mxu1 %vm3489_vm8, %v3486_v12  ;;  %3081 = vmatprep.subr.msk.bf16.mxu0 %vm3489_vm8, %v3486_v12  ;;  %vm602_vm15 = vcmask 220352   ;;  %vm625_vm6 = vcmask 220160   ;;  %vm4776_vm7 = vcmask 97352  }
  0x17   : > { %s2837_s6 = sshll.u32 %s219_s30, 8 }
  0x18   : > { %s3440_s9 = scalar_lea.vmem %s4770_s0, %s2837_s6  ;;  %s3323_s6 = smov 21   ;;  %3064 = vmatpush3.bf16.msk.msra.mxu1 %vm3489_vm8, %v3486_v12  ;;  %3084 = vmatpush3.bf16.msk.msra.mxu0 %vm3489_vm8, %v3486_v12 }
  0x19   : > { %v434_v1 = vld [vmem:[%s3440_s9] sm:$0xff]  ;;  %v3446_v2 = vld [vmem:[%s3440_s9 + $0x18] sm:$0xff]  ;;  %v3460_v4 = vld [vmem:[%s3440_s9 + $0x28] sm:$0xff]  ;;  %3066 = vmatprep.subr.bf16.mxu1 %v3478_v9 }
  0x1a   : > { %468 = vrot.lane.b32.xlu1 %v434_v1, %s3318_s10  ;;  %452 = vst.msk [vmem:[#allocation2 + $0x1] sm:$0x7f] %vm4778_vm5, %v434_v1  ;;  %365 = vrot.lane.b32.xlu0 %v3446_v2, %s3319_s11  ;;  %v3453_v3 = vld [vmem:[%s3440_s9 + $0x20] sm:$0xff]  ;;  %v3463_v5 = vld [vmem:[%s3440_s9 + $0x8] sm:$0xff] }
  0x1b   : > { %v3476_v8 = vld [vmem:[%s3440_s9 + $0x38] sm:$0xff]  ;;  %v3525_v15 = vld [vmem:[%s3440_s9 + $0x60] sm:$0xff]  ;;  %v3535_v17 = vld [vmem:[%s3440_s9 + $0x68] sm:$0xff] }
  0x1c   : > { %v3499_v14 = vld [vmem:[%s3440_s9 + $0x58] sm:$0xff]  ;;  %v3528_v16 = vld [vmem:[%s3440_s9 + $0x40] sm:$0xff]  ;;  %v3538_v18 = vld [vmem:[%s3440_s9 + $0x48] sm:$0xff] }
  0x1d   : > { %v3545_v19 = vld [vmem:[%s3440_s9 + $0x78] sm:$0xff]  ;;  %v3566_v21 = vld [vmem:[%s3440_s9 + $0x80] sm:$0xff]  ;;  %v3573_v22 = vld [vmem:[%s3440_s9 + $0x88] sm:$0xff] }
  0x1e   : > { %470 = vrot.lane.b32.xlu1 %v3453_v3, %s3318_s10  ;;  %397 = vrot.lane.b32.xlu0 %v3446_v2, %s3320_s12  ;;  %v3552_v20 = vld [vmem:[%s3440_s9 + $0x98] sm:$0xff]  ;;  %v3576_v23 = vld [vmem:[%s3440_s9 + $0xa0] sm:$0xff] }
  0x1f   : > { %v3583_v24 = vld [vmem:[%s3440_s9 + $0xa8] sm:$0xff]  ;;  %v3594_v25 = vld [vmem:[%s3440_s9 + $0xb8] sm:$0xff]  ;;  %v3616_v27 = vld [vmem:[%s3440_s9 + $0xc0] sm:$0xff] }
  0x20   : > { %v3601_v26 = vld [vmem:[%s3440_s9 + $0xd8] sm:$0xff]  ;;  %v3623_v28 = vld [vmem:[%s3440_s9 + $0xc8] sm:$0xff]  ;;  %v3626_v29 = vld [vmem:[%s3440_s9 + $0xe0] sm:$0xff] }
  0x21   : > { %v3633_v30 = vld [vmem:[%s3440_s9 + $0xe8] sm:$0xff]  ;;  %v3660_v31 = vld [vmem:[%s3440_s9 + $0x10] sm:$0xff] }
  0x22   : > { %538 = vrot.lane.b32.xlu1 %v3460_v4, %s3321_s13  ;;  %536 = vrot.lane.b32.xlu0 %v3463_v5, %s3321_s13  ;;  %v3667_v32 = vld [vmem:[%s3440_s9 + $0x30] sm:$0xff] }
  0x23   : > { %v3749_v49 = vld [vmem:[%s3440_s9 + $0x50] sm:$0xff] }
  0x24   : > { %v3762_v52 = vld [vmem:[%s3440_s9 + $0x70] sm:$0xff] }
  0x26   : > { %367 = vrot.lane.b32.xlu1 %v3476_v8, %s3319_s11  ;;  %569 = vrot.lane.b32.xlu0 %v3463_v5, %s3323_s6 }
  0x2a   : > { %369 = vrot.lane.b32.xlu1 %v3499_v14, %s3319_s11  ;;  %571 = vrot.lane.b32.xlu0 %v3460_v4, %s3323_s6 }
  0x2e   : > { %401 = vrot.lane.b32.xlu1 %v3499_v14, %s3320_s12  ;;  %399 = vrot.lane.b32.xlu0 %v3476_v8, %s3320_s12 }
  0x32   : > { %474 = vrot.lane.b32.xlu1 %v3525_v15, %s3318_s10  ;;  %472 = vrot.lane.b32.xlu0 %v3528_v16, %s3318_s10 }
  0x36   : > { %542 = vrot.lane.b32.xlu1 %v3535_v17, %s3321_s13  ;;  %540 = vrot.lane.b32.xlu0 %v3538_v18, %s3321_s13 }
  0x3a   : > { %371 = vrot.lane.b32.xlu1 %v3545_v19, %s3319_s11  ;;  %573 = vrot.lane.b32.xlu0 %v3538_v18, %s3323_s6 }
  0x3e   : > { %373 = vrot.lane.b32.xlu1 %v3552_v20, %s3319_s11  ;;  %575 = vrot.lane.b32.xlu0 %v3535_v17, %s3323_s6 }
  0x42   : > { %823 = vrot.lane.b32.xlu1 %v3446_v2, %s3324_s7  ;;  %403 = vrot.lane.b32.xlu0 %v3545_v19, %s3320_s12 }
  0x46   : > { %883 = vrot.lane.b32.xlu1 %v434_v1, %s3325_s8  ;;  %405 = vrot.lane.b32.xlu0 %v3552_v20, %s3320_s12 }
  0x4a   : > { %885 = vrot.lane.b32.xlu1 %v3453_v3, %s3325_s8  ;;  %476 = vrot.lane.b32.xlu0 %v3566_v21, %s3318_s10 }
  0x4e   : > { %544 = vrot.lane.b32.xlu1 %v3573_v22, %s3321_s13  ;;  %478 = vrot.lane.b32.xlu0 %v3576_v23, %s3318_s10 }
  0x52   : > { %546 = vrot.lane.b32.xlu1 %v3583_v24, %s3321_s13  ;;  %948 = vrot.lane.b32.xlu0 %v3463_v5, %s3326_s14 }
  0x56   : > { %950 = vrot.lane.b32.xlu1 %v3460_v4, %s3326_s14  ;;  %577 = vrot.lane.b32.xlu0 %v3573_v22, %s3323_s6 }
  0x5a   : > { %579 = vrot.lane.b32.xlu1 %v3583_v24, %s3323_s6  ;;  %375 = vrot.lane.b32.xlu0 %v3594_v25, %s3319_s11 }
  0x5e   : > { %377 = vrot.lane.b32.xlu1 %v3601_v26, %s3319_s11  ;;  %825 = vrot.lane.b32.xlu0 %v3476_v8, %s3324_s7 }
  0x62   : > { %827 = vrot.lane.b32.xlu1 %v3499_v14, %s3324_s7  ;;  %407 = vrot.lane.b32.xlu0 %v3594_v25, %s3320_s12 }
  0x66   : > { %887 = vrot.lane.b32.xlu1 %v3528_v16, %s3325_s8  ;;  %409 = vrot.lane.b32.xlu0 %v3601_v26, %s3320_s12 }
  0x6a   : > { %889 = vrot.lane.b32.xlu1 %v3525_v15, %s3325_s8  ;;  %480 = vrot.lane.b32.xlu0 %v3616_v27, %s3318_s10 }
  0x6e   : > { %548 = vrot.lane.b32.xlu1 %v3623_v28, %s3321_s13  ;;  %482 = vrot.lane.b32.xlu0 %v3626_v29, %s3318_s10 }
  0x72   : > { %550 = vrot.lane.b32.xlu1 %v3633_v30, %s3321_s13  ;;  %952 = vrot.lane.b32.xlu0 %v3538_v18, %s3326_s14 }
  0x76   : > { %954 = vrot.lane.b32.xlu1 %v3535_v17, %s3326_s14  ;;  %581 = vrot.lane.b32.xlu0 %v3623_v28, %s3323_s6 }
  0x7a   : > { %829 = vrot.lane.b32.xlu1 %v3545_v19, %s3324_s7  ;;  %583 = vrot.lane.b32.xlu0 %v3633_v30, %s3323_s6 }
  0x7e   : > { %831 = vrot.lane.b32.xlu1 %v3552_v20, %s3324_s7  ;;  %1207 = vrot.lane.b32.xlu0 %v3463_v5, %s3319_s11 }
  0x82   : > { %1239 = vrot.lane.b32.xlu1 %v3463_v5, %s3320_s12  ;;  %1209 = vrot.lane.b32.xlu0 %v3460_v4, %s3319_s11 }
  0x86   : > { %891 = vrot.lane.b32.xlu1 %v3566_v21, %s3325_s8  ;;  %1241 = vrot.lane.b32.xlu0 %v3460_v4, %s3320_s12 }
  0x8a   : > { %1312 = vrot.lane.b32.xlu1 %v3660_v31, %s3318_s10  ;;  %893 = vrot.lane.b32.xlu0 %v3576_v23, %s3325_s8 }
  0x8c   : > { %v469_v33 = vpop.permute.xlu1 %468  ;;  %v366_v34 = vpop.permute.xlu0 %365 }
  0x8d   : > { %493 = vst.msk [vmem:[#allocation2] sm:$0xff] %vm492_vm9, %v469_v33 }
  0x8e   : > { %388 = vst.msk [vmem:[#allocation2 + $0x9] sm:$0x7f] %vm4777_vm10, %v366_v34  ;;  %956 = vrot.lane.b32.xlu1 %v3573_v22, %s3326_s14  ;;  %1314 = vrot.lane.b32.xlu0 %v3667_v32, %s3318_s10 }
  0x8f   : > { %502 = vst.msk [vmem:[#allocation2] sm:$0xff] %vm501_vm11, %v469_v33 }
  0x90   : > { %520 = vst.msk [vmem:[#allocation2] sm:$0x1] %vm519_vm12, %v3317_v0  ;;  %v471_v35 = vpop.permute.xlu1 %470  ;;  %v398_v36 = vpop.permute.xlu0 %397 }
  0x91   : > { %418 = vst.msk [vmem:[#allocation2 + $0x8] sm:$0xff] %vm395_vm2, %v398_v36 }
  0x92   : > { %427 = vst.msk [vmem:[#allocation2 + $0x8] sm:$0xff] %vm425_vm3, %v398_v36  ;;  %958 = vrot.lane.b32.xlu1 %v3583_v24, %s3326_s14  ;;  %1376 = vrot.lane.b32.xlu0 %v3446_v2, %s3321_s13 }
  0x93   : > { %444 = vst.msk [vmem:[#allocation2 + $0x8] sm:$0x1] %vm442_vm4, %v3317_v0 }
  0x94   : > { %453 = vst.msk [vmem:[#allocation2 + $0x9] sm:$0x7f] %vm4778_vm5, %v3453_v3  ;;  %v539_v37 = vpop.permute.xlu1 %538  ;;  %v537_v38 = vpop.permute.xlu0 %536 }
  0x95   : > { %494 = vst.msk [vmem:[#allocation2 + $0x8] sm:$0xff] %vm492_vm9, %v471_v35 }
  0x96   : > { %503 = vst.msk [vmem:[#allocation2 + $0x8] sm:$0xff] %vm501_vm11, %v471_v35  ;;  %1408 = vrot.lane.b32.xlu1 %v3446_v2, %s3323_s6  ;;  %1378 = vrot.lane.b32.xlu0 %v3476_v8, %s3321_s13 }
  0x97   : > { %561 = vst.msk [vmem:[#allocation2 + $0x1] sm:$0x7f] %vm560_vm13, %v537_v38  ;;  %562 = vst.msk [vmem:[#allocation2 + $0x9] sm:$0x7f] %vm560_vm13, %v539_v37 }
  0x98   : > { %521 = vst.msk [vmem:[#allocation2 + $0x8] sm:$0x1] %vm519_vm12, %v3317_v0  ;;  %v368_v39 = vpop.permute.xlu1 %367  ;;  %v570_v40 = vpop.permute.xlu0 %569 }
  0x99   : > { %389 = vst.msk [vmem:[#allocation2 + $0x11] sm:$0x7f] %vm4777_vm10, %v368_v39 }
  0x9a   : > { %594 = vst.msk [vmem:[#allocation2] sm:$0xff] %vm593_vm14, %v570_v40  ;;  %1211 = vrot.lane.b32.xlu1 %v3538_v18, %s3319_s11  ;;  %833 = vrot.lane.b32.xlu0 %v3594_v25, %s3324_s7 }
  0x9b   : > { %603 = vst.msk [vmem:[#allocation2] sm:$0xff] %vm602_vm15, %v570_v40 }
  0x9c   : > { %v370_v41 = vpop.permute.xlu1 %369  ;;  %v572_v42 = vpop.permute.xlu0 %571 }
  0x9d   : > { %390 = vst.msk [vmem:[#allocation2 + $0x19] sm:$0x7f] %vm4777_vm10, %v370_v41 }
  0x9e   : > { %595 = vst.msk [vmem:[#allocation2 + $0x8] sm:$0xff] %vm593_vm14, %v572_v42  ;;  %835 = vrot.lane.b32.xlu1 %v3601_v26, %s3324_s7  ;;  %1410 = vrot.lane.b32.xlu0 %v3476_v8, %s3323_s6 }
  0x9f   : > { %604 = vst.msk [vmem:[#allocation2 + $0x8] sm:$0xff] %vm602_vm15, %v572_v42 }
  0xa0   : > { %v402_v43 = vpop.permute.xlu1 %401  ;;  %v400_v44 = vpop.permute.xlu0 %399 }
  0xa1   : > { %420 = vst.msk [vmem:[#allocation2 + $0x18] sm:$0xff] %vm395_vm2, %v402_v43  ;;  %419 = vst.msk [vmem:[#allocation2 + $0x10] sm:$0xff] %vm395_vm2, %v400_v44 }
  0xa2   : > { %v611_v45 = vld [vmem:[#allocation2] sm:$0xff]  ;;  %429 = vst.msk [vmem:[#allocation2 + $0x18] sm:$0xff] %vm425_vm3, %v402_v43  ;;  %428 = vst.msk [vmem:[#allocation2 + $0x10] sm:$0xff] %vm425_vm3, %v400_v44  ;;  %1243 = vrot.lane.b32.xlu1 %v3538_v18, %s3320_s12  ;;  %1213 = vrot.lane.b32.xlu0 %v3535_v17, %s3319_s11 }
  0xa3   : > { %815 = vst.msk [vmem:[#allocation2] sm:$0xff] %vm347_vm0, %v3317_v0  ;;  %2963 = vmatprep.mubr.msk.f32.mxu1 %vm625_vm6, %v611_v45  ;;  %v3945_v45 = vld [vmem:[%s3440_s9 + $0xf0] sm:$0xff] }
  0xa4   : > { %446 = vst.msk [vmem:[#allocation2 + $0x18] sm:$0x1] %vm442_vm4, %v3317_v0  ;;  %445 = vst.msk [vmem:[#allocation2 + $0x10] sm:$0x1] %vm442_vm4, %v3317_v0  ;;  %v475_v46 = vpop.permute.xlu1 %474  ;;  %v473_v47 = vpop.permute.xlu0 %472 }
  0xa5   : > { %455 = vst.msk [vmem:[#allocation2 + $0x19] sm:$0x7f] %vm4778_vm5, %v3525_v15  ;;  %454 = vst.msk [vmem:[#allocation2 + $0x11] sm:$0x7f] %vm4778_vm5, %v3528_v16  ;;  %v3851_v15 = vld [vmem:[%s3440_s9 + $0xb0] sm:$0xff] }
  0xa6   : > { %851 = vst.msk [vmem:[#allocation2] sm:$0xff] %vm395_vm2, %v3317_v0  ;;  %v612_v48 = vld [vmem:[#allocation2 + $0x8] sm:$0xff]  ;;  %895 = vrot.lane.b32.xlu1 %v3616_v27, %s3325_s8  ;;  %1245 = vrot.lane.b32.xlu0 %v3535_v17, %s3320_s12 }
  0xa7   : > { %859 = vst.msk [vmem:[#allocation2] sm:$0xff] %vm425_vm3, %v3317_v0  ;;  %2964 = vmatmul.mubr.msk.f32.vlgmr.msra.gmra.mrb[0].mxu1 %vm625_vm6, %v612_v48 }
  0xa8   : > { %496 = vst.msk [vmem:[#allocation2 + $0x18] sm:$0xff] %vm492_vm9, %v475_v46  ;;  %495 = vst.msk [vmem:[#allocation2 + $0x10] sm:$0xff] %vm492_vm9, %v473_v47  ;;  %v543_v50 = vpop.permute.xlu1 %542  ;;  %v541_v51 = vpop.permute.xlu0 %540  ;;  %3068 = vmatpush3.bf16.msra.mxu1 %v3478_v9 }
  0xa9   : > { %505 = vst.msk [vmem:[#allocation2 + $0x18] sm:$0xff] %vm501_vm11, %v475_v46  ;;  %504 = vst.msk [vmem:[#allocation2 + $0x10] sm:$0xff] %vm501_vm11, %v473_v47  ;;  %3071 = vmatprep.subr.msk.bf16.mxu1 %vm3489_vm8, %v3486_v12 }
  0xaa   : > { %523 = vst.msk [vmem:[#allocation2 + $0x18] sm:$0x1] %vm519_vm12, %v3317_v0  ;;  %522 = vst.msk [vmem:[#allocation2 + $0x10] sm:$0x1] %vm519_vm12, %v3317_v0  ;;  %1316 = vrot.lane.b32.xlu1 %v3749_v49, %s3318_s10  ;;  %897 = vrot.lane.b32.xlu0 %v3626_v29, %s3325_s8 }
  0xab   : > { %564 = vst.msk [vmem:[#allocation2 + $0x19] sm:$0x7f] %vm560_vm13, %v543_v50  ;;  %563 = vst.msk [vmem:[#allocation2 + $0x11] sm:$0x7f] %vm560_vm13, %v541_v51  ;;  %v3957_v50 = vld [vmem:[%s3440_s9 + $0xf8] sm:$0xff] }
  0xac   : > { %v372_v53 = vpop.permute.xlu1 %371  ;;  %v574_v54 = vpop.permute.xlu0 %573  ;;  %3074 = vmatpush3.bf16.msk.msra.mxu1 %vm3489_vm8, %v3486_v12 }
  0xad   : > { %391 = vst.msk [vmem:[#allocation2 + $0x21] sm:$0x7f] %vm4777_vm10, %v372_v53  ;;  %3086 = vmatprep.subr.bf16.mxu1 %v3478_v9 }
  0xae   : > { %596 = vst.msk [vmem:[#allocation2 + $0x10] sm:$0xff] %vm593_vm14, %v574_v54  ;;  %960 = vrot.lane.b32.xlu1 %v3623_v28, %s3326_s14  ;;  %1318 = vrot.lane.b32.xlu0 %v3762_v52, %s3318_s10 }
  0xaf   : > { %605 = vst.msk [vmem:[#allocation2 + $0x10] sm:$0xff] %vm602_vm15, %v574_v54 }
  0xb0   : > { %v374_v55 = vpop.permute.xlu1 %373  ;;  %v576_v56 = vpop.permute.xlu0 %575 }
  0xb1   : > { %392 = vst.msk [vmem:[#allocation2 + $0x29] sm:$0x7f] %vm4777_vm10, %v374_v55 }
  0xb2   : > { %597 = vst.msk [vmem:[#allocation2 + $0x18] sm:$0xff] %vm593_vm14, %v576_v56  ;;  %962 = vrot.lane.b32.xlu1 %v3633_v30, %s3326_s14  ;;  %1380 = vrot.lane.b32.xlu0 %v3499_v14, %s3321_s13 }
  0xb3   : > { %606 = vst.msk [vmem:[#allocation2 + $0x18] sm:$0xff] %vm602_vm15, %v576_v56 }
  0xb4   : > { %v824_v57 = vpop.permute.xlu1 %823  ;;  %v404_v58 = vpop.permute.xlu0 %403 }
  0xb5   : > { %844 = vst.msk [vmem:[#allocation2 + $0x8] sm:$0xff] %vm347_vm0, %v824_v57 }
  0xb6   : > { %421 = vst.msk [vmem:[#allocation2 + $0x20] sm:$0xff] %vm395_vm2, %v404_v58  ;;  %v613_v59 = vld [vmem:[#allocation2 + $0x10] sm:$0xff]  ;;  %852 = vst.msk [vmem:[#allocation2 + $0x8] sm:$0xff] %vm395_vm2, %v824_v57  ;;  %1412 = vrot.lane.b32.xlu1 %v3499_v14, %s3323_s6  ;;  %1382 = vrot.lane.b32.xlu0 %v3545_v19, %s3321_s13 }
  0xb7   : > { %430 = vst.msk [vmem:[#allocation2 + $0x20] sm:$0xff] %vm425_vm3, %v404_v58  ;;  %860 = vst.msk [vmem:[#allocation2 + $0x8] sm:$0xff] %vm425_vm3, %v824_v57  ;;  %2966 = vmatprep.mubr.msk.f32.mxu1 %vm625_vm6, %v613_v59 }
  0xb8   : > { %447 = vst.msk [vmem:[#allocation2 + $0x20] sm:$0x1] %vm442_vm4, %v3317_v0  ;;  %v884_v60 = vpop.permute.xlu1 %883  ;;  %v406_v61 = vpop.permute.xlu0 %405 }
  0xb9   : > { %456 = vst.msk [vmem:[#allocation2 + $0x21] sm:$0x7f] %vm4778_vm5, %v3566_v21 }
  0xba   : > { %908 = vst.msk [vmem:[#allocation2] sm:$0xff] %vm4776_vm7, %v884_v60  ;;  %v614_v62 = vld [vmem:[#allocation2 + $0x18] sm:$0xff]  ;;  %1414 = vrot.lane.b32.xlu1 %v3545_v19, %s3323_s6  ;;  %1215 = vrot.lane.b32.xlu0 %v3573_v22, %s3319_s11 }
  0xbb   : > { %422 = vst.msk [vmem:[#allocation2 + $0x28] sm:$0xff] %vm395_vm2, %v406_v61  ;;  %2967 = vmatmul.mubr.msk.f32.gmra.mrb[2].mxu1 %vm625_vm6, %v614_v62 }
  0xbc   : > { %916 = vst.msk [vmem:[#allocation2] sm:$0xff] %vm492_vm9, %v884_v60  ;;  %v886_v63 = vpop.permute.xlu1 %885  ;;  %v477_v1 = vpop.permute.xlu0 %476 }
  0xbd   : > { %431 = vst.msk [vmem:[#allocation2 + $0x28] sm:$0xff] %vm425_vm3, %v406_v61 }
  0xbe   : > { %924 = vst.msk [vmem:[#allocation2] sm:$0xff] %vm501_vm11, %v884_v60  ;;  %1217 = vrot.lane.b32.xlu1 %v3583_v24, %s3319_s11  ;;  %1650 = vrot.lane.b32.xlu0 %v3463_v5, %s3324_s7 }
  0xbf   : > { %448 = vst.msk [vmem:[#allocation2 + $0x28] sm:$0x1] %vm442_vm4, %v3317_v0 }
  0xc0   : > { %457 = vst.msk [vmem:[#allocation2 + $0x29] sm:$0x7f] %vm4778_vm5, %v3576_v23  ;;  %v545_v3 = vpop.permute.xlu1 %544  ;;  %v479_v6 = vpop.permute.xlu0 %478 }
  0xc1   : > { %909 = vst.msk [vmem:[#allocation2 + $0x8] sm:$0xff] %vm4776_vm7, %v886_v63  ;;  %vm972_vm7 = vcmask 171152  }
  0xc2   : > { %497 = vst.msk [vmem:[#allocation2 + $0x20] sm:$0xff] %vm492_vm9, %v477_v1  ;;  %917 = vst.msk [vmem:[#allocation2 + $0x8] sm:$0xff] %vm492_vm9, %v886_v63  ;;  %1652 = vrot.lane.b32.xlu1 %v3460_v4, %s3324_s7  ;;  %1247 = vrot.lane.b32.xlu0 %v3573_v22, %s3320_s12  ;;  %v3839_v4 = vld [vmem:[%s3440_s9 + $0x90] sm:$0xff] }
  0xc3   : > { %506 = vst.msk [vmem:[#allocation2 + $0x20] sm:$0xff] %vm501_vm11, %v477_v1  ;;  %925 = vst.msk [vmem:[#allocation2 + $0x8] sm:$0xff] %vm501_vm11, %v886_v63 }
  0xc4   : > { %524 = vst.msk [vmem:[#allocation2 + $0x20] sm:$0x1] %vm519_vm12, %v3317_v0  ;;  %v547_v5 = vpop.permute.xlu1 %546  ;;  %v949_v7 = vpop.permute.xlu0 %948 }
  0xc5   : > { %565 = vst.msk [vmem:[#allocation2 + $0x21] sm:$0x7f] %vm560_vm13, %v545_v3 }
  0xc6   : > { %498 = vst.msk [vmem:[#allocation2 + $0x28] sm:$0xff] %vm492_vm9, %v479_v6  ;;  %1714 = vrot.lane.b32.xlu1 %v3660_v31, %s3325_s8  ;;  %1249 = vrot.lane.b32.xlu0 %v3583_v24, %s3320_s12 }
  0xc7   : > { %507 = vst.msk [vmem:[#allocation2 + $0x28] sm:$0xff] %vm501_vm11, %v479_v6 }
  0xc8   : > { %525 = vst.msk [vmem:[#allocation2 + $0x28] sm:$0x1] %vm519_vm12, %v3317_v0  ;;  %v951_v10 = vpop.permute.xlu1 %950  ;;  %v578_v11 = vpop.permute.xlu0 %577 }
  0xc9   : > { %566 = vst.msk [vmem:[#allocation2 + $0x29] sm:$0x7f] %vm560_vm13, %v547_v5 }
  0xca   : > { %973 = vst.msk [vmem:[#allocation2] sm:$0xff] %vm972_vm7, %v949_v7  ;;  %974 = vst.msk [vmem:[#allocation2 + $0x8] sm:$0xff] %vm972_vm7, %v951_v10  ;;  %1716 = vrot.lane.b32.xlu1 %v3667_v32, %s3325_s8  ;;  %1320 = vrot.lane.b32.xlu0 %v3839_v4, %s3318_s10 }
  0xcb   : > { %981 = vst.msk [vmem:[#allocation2] sm:$0xff] %vm593_vm14, %v949_v7  ;;  %598 = vst.msk [vmem:[#allocation2 + $0x20] sm:$0xff] %vm593_vm14, %v578_v11 }
  0xcc   : > { %989 = vst.msk [vmem:[#allocation2] sm:$0xff] %vm602_vm15, %v949_v7  ;;  %607 = vst.msk [vmem:[#allocation2 + $0x20] sm:$0xff] %vm602_vm15, %v578_v11  ;;  %v580_v16 = vpop.permute.xlu1 %579  ;;  %v376_v21 = vpop.permute.xlu0 %375 }
  0xcd   : > { %982 = vst.msk [vmem:[#allocation2 + $0x8] sm:$0xff] %vm593_vm14, %v951_v10  ;;  %599 = vst.msk [vmem:[#allocation2 + $0x28] sm:$0xff] %vm593_vm14, %v580_v16 }
  0xce   : > { %990 = vst.msk [vmem:[#allocation2 + $0x8] sm:$0xff] %vm602_vm15, %v951_v10  ;;  %608 = vst.msk [vmem:[#allocation2 + $0x28] sm:$0xff] %vm602_vm15, %v580_v16  ;;  %1384 = vrot.lane.b32.xlu1 %v3552_v20, %s3321_s13  ;;  %1322 = vrot.lane.b32.xlu0 %v3851_v15, %s3318_s10 }
  0xcf   : > { %393 = vst.msk [vmem:[#allocation2 + $0x31] sm:$0x7f] %vm4777_vm10, %v376_v21 }
  0xd0   : > { %v378_v33 = vpop.permute.xlu1 %377  ;;  %v826_v34 = vpop.permute.xlu0 %825 }
  0xd1   : > { %394 = vst.msk [vmem:[#allocation2 + $0x39] sm:$0x7f] %vm4777_vm10, %v378_v33  ;;  %vm4784_vm10 = vcmask 97352  }
  0xd2   : > { %845 = vst.msk [vmem:[#allocation2 + $0x10] sm:$0xff] %vm347_vm0, %v826_v34  ;;  %1386 = vrot.lane.b32.xlu1 %v3594_v25, %s3321_s13  ;;  %1778 = vrot.lane.b32.xlu0 %v3446_v2, %s3326_s14 }
  0xd3   : > { %v3860_v23 = vld [vmem:[#allocation2] sm:$0xff]  ;;  %853 = vst.msk [vmem:[#allocation2 + $0x10] sm:$0xff] %vm395_vm2, %v826_v34 }
  0xd4   : > { %1191 = vst.msk [vmem:[#allocation2] sm:$0x1] %vm349_vm1, %v3317_v0  ;;  %v615_v35 = vld [vmem:[#allocation2 + $0x20] sm:$0xff]  ;;  %v828_v37 = vpop.permute.xlu1 %827  ;;  %v408_v38 = vpop.permute.xlu0 %407 }
  0xd5   : > { %v3871_v36 = vld [vmem:[#allocation2 + $0x8] sm:$0xff]  ;;  %861 = vst.msk [vmem:[#allocation2 + $0x10] sm:$0xff] %vm425_vm3, %v826_v34  ;;  %2969 = vmatprep.mubr.msk.f32.mxu1 %vm625_vm6, %v615_v35 }
  0xd6   : > { %1192 = vst.msk [vmem:[#allocation2 + $0x8] sm:$0x1] %vm349_vm1, %v3317_v0  ;;  %v616_v39 = vld [vmem:[#allocation2 + $0x28] sm:$0xff]  ;;  %1780 = vrot.lane.b32.xlu1 %v3476_v8, %s3326_s14  ;;  %1416 = vrot.lane.b32.xlu0 %v3552_v20, %s3323_s6 }
  0xd7   : > { %846 = vst.msk [vmem:[#allocation2 + $0x18] sm:$0xff] %vm347_vm0, %v828_v37  ;;  %2970 = vmatmul.mubr.msk.f32.gmra.mrb[4].mxu1 %vm625_vm6, %v616_v39 }
  0xd8   : > { %423 = vst.msk [vmem:[#allocation2 + $0x30] sm:$0xff] %vm395_vm2, %v408_v38  ;;  %854 = vst.msk [vmem:[#allocation2 + $0x18] sm:$0xff] %vm395_vm2, %v828_v37  ;;  %v888_v2 = vpop.permute.xlu1 %887  ;;  %v410_v40 = vpop.permute.xlu0 %409 }
  0xd9   : > { %432 = vst.msk [vmem:[#allocation2 + $0x30] sm:$0xff] %vm425_vm3, %v408_v38  ;;  %862 = vst.msk [vmem:[#allocation2 + $0x18] sm:$0xff] %vm425_vm3, %v828_v37 }
  0xda   : > { %449 = vst.msk [vmem:[#allocation2 + $0x30] sm:$0x1] %vm442_vm4, %v3317_v0  ;;  %1418 = vrot.lane.b32.xlu1 %v3594_v25, %s3323_s6  ;;  %1219 = vrot.lane.b32.xlu0 %v3623_v28, %s3319_s11 }
  0xdb   : > { %458 = vst.msk [vmem:[#allocation2 + $0x31] sm:$0x7f] %vm4778_vm5, %v3616_v27 }
  0xdc   : > { %910 = vst.msk [vmem:[#allocation2 + $0x10] sm:$0xff] %vm4784_vm10, %v888_v2  ;;  %v890_v8 = vpop.permute.xlu1 %889  ;;  %v481_v27 = vpop.permute.xlu0 %480 }
  0xdd   : > { %424 = vst.msk [vmem:[#allocation2 + $0x38] sm:$0xff] %vm395_vm2, %v410_v40 }
  0xde   : > { %918 = vst.msk [vmem:[#allocation2 + $0x10] sm:$0xff] %vm492_vm9, %v888_v2  ;;  %499 = vst.msk [vmem:[#allocation2 + $0x30] sm:$0xff] %vm492_vm9, %v481_v27  ;;  %1221 = vrot.lane.b32.xlu1 %v3633_v30, %s3319_s11  ;;  %1654 = vrot.lane.b32.xlu0 %v3538_v18, %s3324_s7 }
  0xdf   : > { %433 = vst.msk [vmem:[#allocation2 + $0x38] sm:$0xff] %vm425_vm3, %v410_v40 }
  0xe0   : > { %926 = vst.msk [vmem:[#allocation2 + $0x10] sm:$0xff] %vm501_vm11, %v888_v2  ;;  %508 = vst.msk [vmem:[#allocation2 + $0x30] sm:$0xff] %vm501_vm11, %v481_v27  ;;  %v483_v41 = vpop.permute.xlu0 %482 }
  0xe1   : > { %450 = vst.msk [vmem:[#allocation2 + $0x38] sm:$0x1] %vm442_vm4, %v3317_v0 }
  0xe2   : > { %459 = vst.msk [vmem:[#allocation2 + $0x39] sm:$0x7f] %vm4778_vm5, %v3626_v29  ;;  %v549_v29 = vpop.permute.xlu1 %548  ;;  %1656 = vrot.lane.b32.xlu1 %v3535_v17, %s3324_s7  ;;  %1251 = vrot.lane.b32.xlu0 %v3623_v28, %s3320_s12  ;;  %v3933_v17 = vld [vmem:[%s3440_s9 + $0xd0] sm:$0xff]  ;;  %s3327_s9 = smov 32  }
  0xe3   : > { %911 = vst.msk [vmem:[#allocation2 + $0x18] sm:$0xff] %vm4784_vm10, %v890_v8  ;;  %vm4785_vm10 = vcmask 22528  }
  0xe4   : > { %919 = vst.msk [vmem:[#allocation2 + $0x18] sm:$0xff] %vm492_vm9, %v890_v8  ;;  %500 = vst.msk [vmem:[#allocation2 + $0x38] sm:$0xff] %vm492_vm9, %v483_v41  ;;  %v953_v42 = vpop.permute.xlu0 %952 }
  0xe5   : > { %927 = vst.msk [vmem:[#allocation2 + $0x18] sm:$0xff] %vm501_vm11, %v890_v8  ;;  %509 = vst.msk [vmem:[#allocation2 + $0x38] sm:$0xff] %vm501_vm11, %v483_v41 }
  0xe6   : > { %526 = vst.msk [vmem:[#allocation2 + $0x30] sm:$0x1] %vm519_vm12, %v3317_v0  ;;  %527 = vst.msk [vmem:[#allocation2 + $0x38] sm:$0x1] %vm519_vm12, %v3317_v0  ;;  %v551_v18 = vpop.permute.xlu1 %550  ;;  %1718 = vrot.lane.b32.xlu1 %v3749_v49, %s3325_s8  ;;  %1253 = vrot.lane.b32.xlu0 %v3633_v30, %s3320_s12 }
  0xe7   : > { %567 = vst.msk [vmem:[#allocation2 + $0x31] sm:$0x7f] %vm560_vm13, %v549_v29  ;;  %568 = vst.msk [vmem:[#allocation2 + $0x39] sm:$0x7f] %vm560_vm13, %v551_v18 }
  0xe8   : > { %975 = vst.msk [vmem:[#allocation2 + $0x10] sm:$0xff] %vm972_vm7, %v953_v42  ;;  %v582_v44 = vpop.permute.xlu0 %581 }
  0xe9   : > { %983 = vst.msk [vmem:[#allocation2 + $0x10] sm:$0xff] %vm593_vm14, %v953_v42  ;;  %600 = vst.msk [vmem:[#allocation2 + $0x30] sm:$0xff] %vm593_vm14, %v582_v44 }
  0xea   : > { %991 = vst.msk [vmem:[#allocation2 + $0x10] sm:$0xff] %vm602_vm15, %v953_v42  ;;  %v955_v43 = vpop.permute.xlu1 %954  ;;  %609 = vst.msk [vmem:[#allocation2 + $0x30] sm:$0xff] %vm602_vm15, %v582_v44  ;;  %1720 = vrot.lane.b32.xlu1 %v3762_v52, %s3325_s8  ;;  %1324 = vrot.lane.b32.xlu0 %v3933_v17, %s3318_s10 }
  0xeb   : > { %976 = vst.msk [vmem:[#allocation2 + $0x18] sm:$0xff] %vm972_vm7, %v955_v43 }
  0xec   : > { %984 = vst.msk [vmem:[#allocation2 + $0x18] sm:$0xff] %vm593_vm14, %v955_v43  ;;  %v584_v47 = vpop.permute.xlu0 %583 }
  0xed   : > { %992 = vst.msk [vmem:[#allocation2 + $0x18] sm:$0xff] %vm602_vm15, %v955_v43 }
  0xee   : > { %v830_v46 = vpop.permute.xlu1 %829  ;;  %601 = vst.msk [vmem:[#allocation2 + $0x38] sm:$0xff] %vm593_vm14, %v584_v47  ;;  %1388 = vrot.lane.b32.xlu1 %v3601_v26, %s3321_s13  ;;  %1326 = vrot.lane.b32.xlu0 %v3945_v45, %s3318_s10  ;;  %s3328_s10 = smov 64  }
  0xef   : > { %847 = vst.msk [vmem:[#allocation2 + $0x20] sm:$0xff] %vm347_vm0, %v830_v46 }
  0xf0   : > { %855 = vst.msk [vmem:[#allocation2 + $0x20] sm:$0xff] %vm395_vm2, %v830_v46  ;;  %v1208_v53 = vpop.permute.xlu0 %1207 }
  0xf1   : > { %610 = vst.msk [vmem:[#allocation2 + $0x38] sm:$0xff] %vm602_vm15, %v584_v47  ;;  %v999_v48 = vld [vmem:[#allocation2 + $0x10] sm:$0xff] }
  0xf2   : > { %863 = vst.msk [vmem:[#allocation2 + $0x20] sm:$0xff] %vm425_vm3, %v830_v46  ;;  %v832_v51 = vpop.permute.xlu1 %831  ;;  %v617_v54 = vld [vmem:[#allocation2 + $0x30] sm:$0xff]  ;;  %1390 = vrot.lane.b32.xlu1 %v3957_v50, %s3321_s13  ;;  %1782 = vrot.lane.b32.xlu0 %v3499_v14, %s3326_s14 }
  0xf3   : > { %1193 = vst.msk [vmem:[#allocation2 + $0x10] sm:$0x1] %vm349_vm1, %v3317_v0  ;;  %2972 = vmatprep.mubr.msk.f32.mxu1 %vm625_vm6, %v617_v54 }
  0xf4   : > { %848 = vst.msk [vmem:[#allocation2 + $0x28] sm:$0xff] %vm347_vm0, %v832_v51  ;;  %v3968_v55 = vld [vmem:[#allocation2 + $0x18] sm:$0xff]  ;;  %v1210_v57 = vpop.permute.xlu0 %1209 }
  0xf5   : > { %1231 = vst.msk [vmem:[#allocation2 + $0x1] sm:$0x7f] %vm4785_vm10, %v1208_v53  ;;  %1232 = vst.msk [vmem:[#allocation2 + $0x9] sm:$0x7f] %vm4785_vm10, %v1210_v57  ;;  %vm4786_vm10 = vcmask 97352  }
  0xf6   : > { %856 = vst.msk [vmem:[#allocation2 + $0x28] sm:$0xff] %vm395_vm2, %v832_v51  ;;  %v1240_v56 = vpop.permute.xlu1 %1239  ;;  %1784 = vrot.lane.b32.xlu1 %v3545_v19, %s3326_s14  ;;  %1420 = vrot.lane.b32.xlu0 %v3601_v26, %s3323_s6 }
  0xf7   : > { %864 = vst.msk [vmem:[#allocation2 + $0x28] sm:$0xff] %vm425_vm3, %v832_v51 }
  0xf8   : > { %1194 = vst.msk [vmem:[#allocation2 + $0x18] sm:$0x1] %vm349_vm1, %v3317_v0  ;;  %v618_v58 = vld [vmem:[#allocation2 + $0x38] sm:$0xff]  ;;  %v1242_v59 = vpop.permute.xlu0 %1241 }
  0xf9   : > { %1263 = vst.msk [vmem:[#allocation2] sm:$0xff] %vm395_vm2, %v1240_v56  ;;  %2973 = vmatmul.mubr.msk.f32.gmra.mrb[6].mxu1 %vm625_vm6, %v618_v58  ;;  %1264 = vst.msk [vmem:[#allocation2 + $0x8] sm:$0xff] %vm395_vm2, %v1242_v59 }
  0xfa   : > { %1271 = vst.msk [vmem:[#allocation2] sm:$0xff] %vm425_vm3, %v1240_v56  ;;  %2983 = vmatprep.mubr.msk.f32.mxu1 %vm625_vm6, %v3860_v23  ;;  %v892_v14 = vpop.permute.xlu1 %891  ;;  %1272 = vst.msk [vmem:[#allocation2 + $0x8] sm:$0xff] %vm425_vm3, %v1242_v59  ;;  %1422 = vrot.lane.b32.xlu0 %v3957_v50, %s3323_s6  ;;  %s3329_s6 = smov 96  }
  0xfb   : > { %1288 = vst.msk [vmem:[#allocation2] sm:$0x1] %vm442_vm4, %v3317_v0  ;;  %1658 = vrot.lane.b32.xlu1 %v3573_v22, %s3324_s7  ;;  %1289 = vst.msk [vmem:[#allocation2 + $0x8] sm:$0x1] %vm442_vm4, %v3317_v0 }
  0xfc   : > { %1296 = vst.msk [vmem:[#allocation2 + $0x1] sm:$0x7f] %vm4778_vm5, %v3660_v31  ;;  %1297 = vst.msk [vmem:[#allocation2 + $0x9] sm:$0x7f] %vm4778_vm5, %v3667_v32  ;;  %v894_v31 = vpop.permute.xlu0 %893  ;;  %vm4787_vm5 = vcmask 97352  }
  0xfd   : > { %912 = vst.msk [vmem:[#allocation2 + $0x20] sm:$0xff] %vm4786_vm10, %v892_v14  ;;  %2984 = vmatmul.mubr.msk.f32.vlgmr.msra.gmra.mrb[8].mxu1 %vm625_vm6, %v3871_v36  ;;  %vm4779_vm10 = vcmask 261120  }
  0xfe   : > { %920 = vst.msk [vmem:[#allocation2 + $0x20] sm:$0xff] %vm492_vm9, %v892_v14  ;;  %2986 = vmatprep.mubr.msk.f32.mxu1 %vm625_vm6, %v999_v48  ;;  %v1313_v19 = vpop.permute.xlu1 %1312  ;;  %3088 = vmatpush3.bf16.msra.mxu1 %v3478_v9 }
  0xff   : > { %928 = vst.msk [vmem:[#allocation2 + $0x20] sm:$0xff] %vm501_vm11, %v892_v14  ;;  %3091 = vmatprep.subr.msk.bf16.mxu1 %vm3489_vm8, %v3486_v12  ;;  %1660 = vrot.lane.b32.xlu0 %v3583_v24, %s3324_s7 }
 0x100   : > { %323 = vst.msk [vmem:[#allocation3 + $0x1c0] sm:$0xff] %vm4779_vm10, %v3317_v0  ;;  %266 = vst.msk [vmem:[#allocation3] sm:$0xff] %vm4779_vm10, %v3317_v0  ;;  %1722 = vrot.lane.b32.xlu1 %v3839_v4, %s3325_s8  ;;  %v1315_v22 = vpop.permute.xlu0 %1314 }
 0x101   : > { %269 = vst.msk [vmem:[#allocation3 + $0x10] sm:$0xff] %vm4779_vm10, %v3317_v0  ;;  %271 = vst.msk [vmem:[#allocation3 + $0x20] sm:$0xff] %vm4779_vm10, %v3317_v0  ;;  %2987 = vmatmul.mubr.msk.f32.gmra.mrb[10].mxu1 %vm625_vm6, %v3968_v55 }
 0x102   : > { %273 = vst.msk [vmem:[#allocation3 + $0x30] sm:$0xff] %vm4779_vm10, %v3317_v0  ;;  %275 = vst.msk [vmem:[#allocation3 + $0x40] sm:$0xff] %vm4779_vm10, %v3317_v0  ;;  %v957_v9 = vpop.permute.xlu1 %956  ;;  %3094 = vmatpush3.bf16.msk.msra.mxu1 %vm3489_vm8, %v3486_v12 }
 0x103   : > { %277 = vst.msk [vmem:[#allocation3 + $0x50] sm:$0xff] %vm4779_vm10, %v3317_v0  ;;  %279 = vst.msk [vmem:[#allocation3 + $0x60] sm:$0xff] %vm4779_vm10, %v3317_v0  ;;  %1724 = vrot.lane.b32.xlu0 %v3851_v15, %s3325_s8 }
 0x104   : > { %281 = vst.msk [vmem:[#allocation3 + $0x70] sm:$0xff] %vm4779_vm10, %v3317_v0  ;;  %283 = vst.msk [vmem:[#allocation3 + $0x80] sm:$0xff] %vm4779_vm10, %v3317_v0  ;;  %1786 = vrot.lane.b32.xlu1 %v3552_v20, %s3326_s14  ;;  %v1377_v13 = vpop.permute.xlu0 %1376 }
 0x105   : > { %285 = vst.msk [vmem:[#allocation3 + $0x90] sm:$0xff] %vm4779_vm10, %v3317_v0  ;;  %287 = vst.msk [vmem:[#allocation3 + $0xa0] sm:$0xff] %vm4779_vm10, %v3317_v0 }
 0x106   : > { %289 = vst.msk [vmem:[#allocation3 + $0xb0] sm:$0xff] %vm4779_vm10, %v3317_v0  ;;  %291 = vst.msk [vmem:[#allocation3 + $0xc0] sm:$0xff] %vm4779_vm10, %v3317_v0  ;;  %v959_v12 = vpop.permute.xlu1 %958 }
 0x107   : > { %293 = vst.msk [vmem:[#allocation3 + $0xd0] sm:$0xff] %vm4779_vm10, %v3317_v0  ;;  %295 = vst.msk [vmem:[#allocation3 + $0xe0] sm:$0xff] %vm4779_vm10, %v3317_v0  ;;  %1788 = vrot.lane.b32.xlu0 %v3594_v25, %s3326_s14 }
 0x108   : > { %297 = vst.msk [vmem:[#allocation3 + $0xf0] sm:$0xff] %vm4779_vm10, %v3317_v0  ;;  %299 = vst.msk [vmem:[#allocation3 + $0x100] sm:$0xff] %vm4779_vm10, %v3317_v0  ;;  %1662 = vrot.lane.b32.xlu1 %v3623_v28, %s3324_s7  ;;  %v1379_v24 = vpop.permute.xlu0 %1378 }
 0x109   : > { %301 = vst.msk [vmem:[#allocation3 + $0x110] sm:$0xff] %vm4779_vm10, %v3317_v0  ;;  %303 = vst.msk [vmem:[#allocation3 + $0x120] sm:$0xff] %vm4779_vm10, %v3317_v0 }
 0x10a   : > { %305 = vst.msk [vmem:[#allocation3 + $0x130] sm:$0xff] %vm4779_vm10, %v3317_v0  ;;  %307 = vst.msk [vmem:[#allocation3 + $0x140] sm:$0xff] %vm4779_vm10, %v3317_v0  ;;  %v1409_v20 = vpop.permute.xlu1 %1408 }
 0x10b   : > { %309 = vst.msk [vmem:[#allocation3 + $0x150] sm:$0xff] %vm4779_vm10, %v3317_v0  ;;  %311 = vst.msk [vmem:[#allocation3 + $0x160] sm:$0xff] %vm4779_vm10, %v3317_v0  ;;  %1664 = vrot.lane.b32.xlu0 %v3633_v30, %s3324_s7 }
 0x10c   : > { %313 = vst.msk [vmem:[#allocation3 + $0x170] sm:$0xff] %vm4779_vm10, %v3317_v0  ;;  %315 = vst.msk [vmem:[#allocation3 + $0x180] sm:$0xff] %vm4779_vm10, %v3317_v0  ;;  %1726 = vrot.lane.b32.xlu1 %v3933_v17, %s3325_s8  ;;  %v834_v32 = vpop.permute.xlu0 %833 }
 0x10d   : > { %317 = vst.msk [vmem:[#allocation3 + $0x190] sm:$0xff] %vm4779_vm10, %v3317_v0  ;;  %321 = vst.msk [vmem:[#allocation3 + $0x1b0] sm:$0xff] %vm4779_vm10, %v3317_v0 }
 0x10e   : > { %325 = vst.msk [vmem:[#allocation3 + $0x1d0] sm:$0xff] %vm4779_vm10, %v3317_v0  ;;  %327 = vst.msk [vmem:[#allocation3 + $0x1e0] sm:$0xff] %vm4779_vm10, %v3317_v0  ;;  %v1212_v28 = vpop.permute.xlu1 %1211 }
 0x10f   : > { %329 = vst.msk [vmem:[#allocation3 + $0x1f0] sm:$0xff] %vm4779_vm10, %v3317_v0  ;;  %331 = vst.msk [vmem:[#allocation3 + $0x200] sm:$0xff] %vm4779_vm10, %v3317_v0  ;;  %1728 = vrot.lane.b32.xlu0 %v3945_v45, %s3325_s8  ;;  %s2838_s8 = sshll.u32 %s3384_s22, 10  ;;  %s3330_s22 = smov [#allocation5]  }
 0x110   : > { %333 = vst.msk [vmem:[#allocation3 + $0x210] sm:$0xff] %vm4779_vm10, %v3317_v0  ;;  %335 = vst.msk [vmem:[#allocation3 + $0x220] sm:$0xff] %vm4779_vm10, %v3317_v0  ;;  %1790 = vrot.lane.b32.xlu1 %v3601_v26, %s3326_s14  ;;  %v1411_v61 = vpop.permute.xlu0 %1410  ;;  %vm4791_vm10 = vcmask 97352   ;;  %s4721_s13 = scalar_lea.hbm %s4775_s5, %s2838_s8  ;;  %s3257_s17 = sshll.u32 %s3330_s22, 4  ;;  %s3258_s17 = int_to_ptr.vmem [resolvable:$false] %s3257_s17 }
 0x111   : > { %1336 = vst.msk [vmem:[#allocation2] sm:$0xff] %vm492_vm9, %v1313_v19  ;;  %1337 = vst.msk [vmem:[#allocation2 + $0x8] sm:$0xff] %vm492_vm9, %v1315_v22  ;;  %s3259_s23 = scalar_lea.vmem %s3258_s17, 2048 }
 0x112   : > { %913 = vst.msk [vmem:[#allocation2 + $0x28] sm:$0xff] %vm4787_vm5, %v894_v31  ;;  %vm4788_vm5 = vcmask 22528   ;;  %v836_v60 = vpop.permute.xlu1 %835 }
 0x113   : > { %1344 = vst.msk [vmem:[#allocation2] sm:$0xff] %vm501_vm11, %v1313_v19  ;;  %1345 = vst.msk [vmem:[#allocation2 + $0x8] sm:$0xff] %vm501_vm11, %v1315_v22  ;;  %1792 = vrot.lane.b32.xlu0 %v3957_v50, %s3326_s14 }
 0x114   : > { %921 = vst.msk [vmem:[#allocation2 + $0x28] sm:$0xff] %vm492_vm9, %v894_v31  ;;  %v1214_v63 = vpop.permute.xlu0 %1213  ;;  %vm4789_vm8 = vmmov %vm4788_vm5 }
 0x115   : > { %1360 = vst.msk [vmem:[#allocation2] sm:$0x1] %vm519_vm12, %v3317_v0  ;;  %1361 = vst.msk [vmem:[#allocation2 + $0x8] sm:$0x1] %vm519_vm12, %v3317_v0 }
 0x116   : > { %929 = vst.msk [vmem:[#allocation2 + $0x28] sm:$0xff] %vm501_vm11, %v894_v31  ;;  %v1244_v26 = vpop.permute.xlu1 %1243  ;;  %v2029_v31 = vld [vmem:[#allocation3 + $0x90] sm:$0xff] }
 0x117   : > { %977 = vst.msk [vmem:[#allocation2 + $0x20] sm:$0xff] %vm972_vm7, %v957_v9  ;;  %978 = vst.msk [vmem:[#allocation2 + $0x28] sm:$0xff] %vm972_vm7, %v959_v12  ;;  %2045 = vrot.lane.b32.xlu0 %v2029_v31, %s3327_s9 }
 0x118   : > { %985 = vst.msk [vmem:[#allocation2 + $0x20] sm:$0xff] %vm593_vm14, %v957_v9  ;;  %986 = vst.msk [vmem:[#allocation2 + $0x28] sm:$0xff] %vm593_vm14, %v959_v12  ;;  %v1246_v3 = vpop.permute.xlu0 %1245 }
 0x119   : > { %993 = vst.msk [vmem:[#allocation2 + $0x20] sm:$0xff] %vm602_vm15, %v957_v9  ;;  %994 = vst.msk [vmem:[#allocation2 + $0x28] sm:$0xff] %vm602_vm15, %v959_v12 }
 0x11a   : > { %1400 = vst.msk [vmem:[#allocation2 + $0x1] sm:$0x7f] %vm560_vm13, %v1377_v13  ;;  %1401 = vst.msk [vmem:[#allocation2 + $0x9] sm:$0x7f] %vm560_vm13, %v1379_v24  ;;  %v896_v1 = vpop.permute.xlu1 %895 }
 0x11b   : > { %1432 = vst.msk [vmem:[#allocation2] sm:$0xff] %vm593_vm14, %v1409_v20  ;;  %1433 = vst.msk [vmem:[#allocation2 + $0x8] sm:$0xff] %vm593_vm14, %v1411_v61 }
 0x11c   : > { %1440 = vst.msk [vmem:[#allocation2] sm:$0xff] %vm602_vm15, %v1409_v20  ;;  %1441 = vst.msk [vmem:[#allocation2 + $0x8] sm:$0xff] %vm602_vm15, %v1411_v61  ;;  %v898_v5 = vpop.permute.xlu0 %897 }
 0x11d   : > { %1233 = vst.msk [vmem:[#allocation2 + $0x11] sm:$0x7f] %vm4788_vm5, %v1212_v28  ;;  %vm4790_vm5 = vcmask 96328  }
 0x11e   : > { %849 = vst.msk [vmem:[#allocation2 + $0x30] sm:$0xff] %vm347_vm0, %v834_v32  ;;  %850 = vst.msk [vmem:[#allocation2 + $0x38] sm:$0xff] %vm347_vm0, %v836_v60 }
 0x11f   : > { %857 = vst.msk [vmem:[#allocation2 + $0x30] sm:$0xff] %vm395_vm2, %v834_v32  ;;  %858 = vst.msk [vmem:[#allocation2 + $0x38] sm:$0xff] %vm395_vm2, %v836_v60 }
 0x120   : > { %v1001_v25 = vld [vmem:[#allocation2 + $0x20] sm:$0xff]  ;;  %v1002_v30 = vld [vmem:[#allocation2 + $0x28] sm:$0xff]  ;;  %865 = vst.msk [vmem:[#allocation2 + $0x30] sm:$0xff] %vm425_vm3, %v834_v32  ;;  %866 = vst.msk [vmem:[#allocation2 + $0x38] sm:$0xff] %vm425_vm3, %v836_v60  ;;  %v1319_v10 = vpop.permute.xlu0 %1318 }
 0x121   : > { %2989 = vmatprep.mubr.msk.f32.mxu1 %vm625_vm6, %v1001_v25  ;;  %1195 = vst.msk [vmem:[#allocation2 + $0x20] sm:$0x1] %vm349_vm1, %v3317_v0  ;;  %1196 = vst.msk [vmem:[#allocation2 + $0x28] sm:$0x1] %vm349_vm1, %v3317_v0 }
 0x122   : > { %2990 = vmatmul.mubr.msk.f32.gmra.mrb[12].mxu1 %vm625_vm6, %v1002_v30  ;;  %1265 = vst.msk [vmem:[#allocation2 + $0x10] sm:$0xff] %vm395_vm2, %v1244_v26 }
 0x123   : > { %v1448_v62 = vld [vmem:[#allocation2] sm:$0xff]  ;;  %1234 = vst.msk [vmem:[#allocation2 + $0x19] sm:$0x7f] %vm4789_vm8, %v1214_v63  ;;  %v1449_v6 = vld [vmem:[#allocation2 + $0x8] sm:$0xff]  ;;  %vm4792_vm8 = vmmov %vm4790_vm5 }
 0x124   : > { %3003 = vmatprep.mubr.msk.f32.mxu0 %vm625_vm6, %v1448_v62  ;;  %1273 = vst.msk [vmem:[#allocation2 + $0x10] sm:$0xff] %vm425_vm3, %v1244_v26  ;;  %v1381_v11 = vpop.permute.xlu0 %1380 }
 0x125   : > { %1290 = vst.msk [vmem:[#allocation2 + $0x10] sm:$0x1] %vm442_vm4, %v3317_v0  ;;  %3004 = vmatmul.mubr.msk.f32.vlgmr.msra.gmra.mrb[0].mxu0 %vm625_vm6, %v1449_v6 }
 0x126   : > { %1298 = vst.msk [vmem:[#allocation2 + $0x11] sm:$0x7f] %vm4790_vm5, %v3749_v49  ;;  %v1317_v49 = vpop.permute.xlu1 %1316  ;;  %vm4793_vm5 = vcmask 22528  }
 0x127   : > { %914 = vst.msk [vmem:[#allocation2 + $0x30] sm:$0xff] %vm4791_vm10, %v896_v1  ;;  %915 = vst.msk [vmem:[#allocation2 + $0x38] sm:$0xff] %vm4791_vm10, %v898_v5 }
 0x128   : > { %1266 = vst.msk [vmem:[#allocation2 + $0x18] sm:$0xff] %vm395_vm2, %v1246_v3  ;;  %v1383_v21 = vpop.permute.xlu0 %1382 }
 0x129   : > { %922 = vst.msk [vmem:[#allocation2 + $0x30] sm:$0xff] %vm492_vm9, %v896_v1  ;;  %1338 = vst.msk [vmem:[#allocation2 + $0x10] sm:$0xff] %vm492_vm9, %v1317_v49 }
 0x12a   : > { %1274 = vst.msk [vmem:[#allocation2 + $0x18] sm:$0xff] %vm425_vm3, %v1246_v3  ;;  %v961_v7 = vpop.permute.xlu1 %960 }
 0x12b   : > { %930 = vst.msk [vmem:[#allocation2 + $0x30] sm:$0xff] %vm501_vm11, %v896_v1  ;;  %1346 = vst.msk [vmem:[#allocation2 + $0x10] sm:$0xff] %vm501_vm11, %v1317_v49  ;;  %v4342_v1 = vld [vmem:[%s4772_s2] ss:$0 sm:$0xff] }
 0x12c   : > { %1291 = vst.msk [vmem:[#allocation2 + $0x18] sm:$0x1] %vm442_vm4, %v3317_v0  ;;  %v1216_v34 = vpop.permute.xlu0 %1215 }
 0x12d   : > { %1299 = vst.msk [vmem:[#allocation2 + $0x19] sm:$0x7f] %vm4792_vm8, %v3762_v52  ;;  %vm4794_vm8 = vmmov %vm4793_vm5 }
 0x12e   : > { %923 = vst.msk [vmem:[#allocation2 + $0x38] sm:$0xff] %vm492_vm9, %v898_v5  ;;  %1339 = vst.msk [vmem:[#allocation2 + $0x18] sm:$0xff] %vm492_vm9, %v1319_v10  ;;  %v963_v52 = vpop.permute.xlu1 %962 }
 0x12f   : > { %1362 = vst.msk [vmem:[#allocation2 + $0x10] sm:$0x1] %vm519_vm12, %v3317_v0 }
 0x130   : > { %931 = vst.msk [vmem:[#allocation2 + $0x38] sm:$0xff] %vm501_vm11, %v898_v5  ;;  %1347 = vst.msk [vmem:[#allocation2 + $0x18] sm:$0xff] %vm501_vm11, %v1319_v10  ;;  %v1651_v37 = vpop.permute.xlu0 %1650 }
 0x131   : > { %979 = vst.msk [vmem:[#allocation2 + $0x30] sm:$0xff] %vm972_vm7, %v961_v7  ;;  %980 = vst.msk [vmem:[#allocation2 + $0x38] sm:$0xff] %vm972_vm7, %v963_v52 }
 0x132   : > { %987 = vst.msk [vmem:[#allocation2 + $0x30] sm:$0xff] %vm593_vm14, %v961_v7  ;;  %988 = vst.msk [vmem:[#allocation2 + $0x38] sm:$0xff] %vm593_vm14, %v963_v52  ;;  %v1413_v16 = vpop.permute.xlu1 %1412 }
 0x133   : > { %995 = vst.msk [vmem:[#allocation2 + $0x30] sm:$0xff] %vm602_vm15, %v961_v7  ;;  %996 = vst.msk [vmem:[#allocation2 + $0x38] sm:$0xff] %vm602_vm15, %v963_v52 }
 0x134   : > { %1363 = vst.msk [vmem:[#allocation2 + $0x18] sm:$0x1] %vm519_vm12, %v3317_v0  ;;  %v1248_v2 = vpop.permute.xlu0 %1247 }
 0x135   : > { %1402 = vst.msk [vmem:[#allocation2 + $0x11] sm:$0x7f] %vm560_vm13, %v1381_v11  ;;  %1403 = vst.msk [vmem:[#allocation2 + $0x19] sm:$0x7f] %vm560_vm13, %v1383_v21 }
 0x136   : > { %1434 = vst.msk [vmem:[#allocation2 + $0x10] sm:$0xff] %vm593_vm14, %v1413_v16  ;;  %v1415_v33 = vpop.permute.xlu1 %1414 }
 0x137   : > { %1442 = vst.msk [vmem:[#allocation2 + $0x10] sm:$0xff] %vm602_vm15, %v1413_v16 }
 0x138   : > { %1435 = vst.msk [vmem:[#allocation2 + $0x18] sm:$0xff] %vm593_vm14, %v1415_v33  ;;  %v1250_v27 = vpop.permute.xlu0 %1249 }
 0x139   : > { %1235 = vst.msk [vmem:[#allocation2 + $0x21] sm:$0x7f] %vm4793_vm5, %v1216_v34 }
 0x13a   : > { %v1003_v23 = vld [vmem:[#allocation2 + $0x30] sm:$0xff]  ;;  %1443 = vst.msk [vmem:[#allocation2 + $0x18] sm:$0xff] %vm602_vm15, %v1415_v33  ;;  %v1004_v35 = vld [vmem:[#allocation2 + $0x38] sm:$0xff]  ;;  %v1218_v36 = vpop.permute.xlu1 %1217 }
 0x13b   : > { %2992 = vmatprep.mubr.msk.f32.mxu1 %vm625_vm6, %v1003_v23  ;;  %1197 = vst.msk [vmem:[#allocation2 + $0x30] sm:$0x1] %vm349_vm1, %v3317_v0  ;;  %1198 = vst.msk [vmem:[#allocation2 + $0x38] sm:$0x1] %vm349_vm1, %v3317_v0  ;;  %vm4795_vm1 = vcmask 96328  }
 0x13c   : > { %2993 = vmatmul.mubr.msk.f32.gmra.mrb[14].mxu1 %vm625_vm6, %v1004_v35  ;;  %1236 = vst.msk [vmem:[#allocation2 + $0x29] sm:$0x7f] %vm4794_vm8, %v1218_v36  ;;  %vm4796_vm5 = vmmov %vm4795_vm1 }
 0x13d   : > { %1674 = vst.msk [vmem:[#allocation2] sm:$0xff] %vm347_vm0, %v1651_v37  ;;  %vm4797_vm8 = vmmov %vm4791_vm10 }
 0x13e   : > { %v1450_v38 = vld [vmem:[#allocation2 + $0x10] sm:$0xff]  ;;  %1682 = vst.msk [vmem:[#allocation2] sm:$0xff] %vm395_vm2, %v1651_v37  ;;  %v1653_v39 = vpop.permute.xlu1 %1652  ;;  %1267 = vst.msk [vmem:[#allocation2 + $0x20] sm:$0xff] %vm395_vm2, %v1248_v2 }
 0x13f   : > { %3006 = vmatprep.mubr.msk.f32.mxu0 %vm625_vm6, %v1450_v38  ;;  %1690 = vst.msk [vmem:[#allocation2] sm:$0xff] %vm425_vm3, %v1651_v37  ;;  %1275 = vst.msk [vmem:[#allocation2 + $0x20] sm:$0xff] %vm425_vm3, %v1248_v2 }
 0x140   : > { %1675 = vst.msk [vmem:[#allocation2 + $0x8] sm:$0xff] %vm347_vm0, %v1653_v39 }
 0x141   : > { %v1451_v40 = vld [vmem:[#allocation2 + $0x18] sm:$0xff]  ;;  %1683 = vst.msk [vmem:[#allocation2 + $0x8] sm:$0xff] %vm395_vm2, %v1653_v39  ;;  %1268 = vst.msk [vmem:[#allocation2 + $0x28] sm:$0xff] %vm395_vm2, %v1250_v27 }
 0x142   : > { %3007 = vmatmul.mubr.msk.f32.gmra.mrb[2].mxu0 %vm625_vm6, %v1451_v40  ;;  %1691 = vst.msk [vmem:[#allocation2 + $0x8] sm:$0xff] %vm425_vm3, %v1653_v39  ;;  %v1715_v8 = vpop.permute.xlu1 %1714  ;;  %1276 = vst.msk [vmem:[#allocation2 + $0x28] sm:$0xff] %vm425_vm3, %v1250_v27 }
 0x143   : > { %1292 = vst.msk [vmem:[#allocation2 + $0x20] sm:$0x1] %vm442_vm4, %v3317_v0  ;;  %1293 = vst.msk [vmem:[#allocation2 + $0x28] sm:$0x1] %vm442_vm4, %v3317_v0 }
 0x144   : > { %1300 = vst.msk [vmem:[#allocation2 + $0x21] sm:$0x7f] %vm4795_vm1, %v3839_v4  ;;  %v1321_v4 = vpop.permute.xlu0 %1320  ;;  %vm4798_vm1 = vcmask 22528  }
 0x145   : > { %1738 = vst.msk [vmem:[#allocation2] sm:$0xff] %vm4791_vm10, %v1715_v8  ;;  %vm4799_vm10 = vmmov %vm4798_vm1 }
 0x146   : > { %1746 = vst.msk [vmem:[#allocation2] sm:$0xff] %vm492_vm9, %v1715_v8  ;;  %v1717_v29 = vpop.permute.xlu1 %1716  ;;  %1340 = vst.msk [vmem:[#allocation2 + $0x20] sm:$0xff] %vm492_vm9, %v1321_v4 }
 0x147   : > { %1754 = vst.msk [vmem:[#allocation2] sm:$0xff] %vm501_vm11, %v1715_v8  ;;  %1348 = vst.msk [vmem:[#allocation2 + $0x20] sm:$0xff] %vm501_vm11, %v1321_v4 }
 0x148   : > { %1301 = vst.msk [vmem:[#allocation2 + $0x29] sm:$0x7f] %vm4796_vm5, %v3851_v15  ;;  %v1323_v18 = vpop.permute.xlu0 %1322 }
 0x149   : > { %1739 = vst.msk [vmem:[#allocation2 + $0x8] sm:$0xff] %vm4797_vm8, %v1717_v29 }
 0x14a   : > { %1747 = vst.msk [vmem:[#allocation2 + $0x8] sm:$0xff] %vm492_vm9, %v1717_v29  ;;  %v1385_v41 = vpop.permute.xlu1 %1384  ;;  %1341 = vst.msk [vmem:[#allocation2 + $0x28] sm:$0xff] %vm492_vm9, %v1323_v18 }
 0x14b   : > { %1755 = vst.msk [vmem:[#allocation2 + $0x8] sm:$0xff] %vm501_vm11, %v1717_v29  ;;  %1349 = vst.msk [vmem:[#allocation2 + $0x28] sm:$0xff] %vm501_vm11, %v1323_v18 }
 0x14c   : > { %1364 = vst.msk [vmem:[#allocation2 + $0x20] sm:$0x1] %vm519_vm12, %v3317_v0  ;;  %1365 = vst.msk [vmem:[#allocation2 + $0x28] sm:$0x1] %vm519_vm12, %v3317_v0  ;;  %v1779_v42 = vpop.permute.xlu0 %1778 }
 0x14d   : > { %1404 = vst.msk [vmem:[#allocation2 + $0x21] sm:$0x7f] %vm560_vm13, %v1385_v41 }
 0x14e   : > { %v1387_v15 = vpop.permute.xlu1 %1386  ;;  %1802 = vst.msk [vmem:[#allocation2] sm:$0xff] %vm972_vm7, %v1779_v42 }
 0x14f   : > { %1405 = vst.msk [vmem:[#allocation2 + $0x29] sm:$0x7f] %vm560_vm13, %v1387_v15 }
 0x150   : > { %1810 = vst.msk [vmem:[#allocation2] sm:$0xff] %vm593_vm14, %v1779_v42  ;;  %v1417_v44 = vpop.permute.xlu0 %1416 }
 0x151   : > { %1818 = vst.msk [vmem:[#allocation2] sm:$0xff] %vm602_vm15, %v1779_v42 }
 0x152   : > { %v1781_v43 = vpop.permute.xlu1 %1780  ;;  %1436 = vst.msk [vmem:[#allocation2 + $0x20] sm:$0xff] %vm593_vm14, %v1417_v44 }
 0x153   : > { %1803 = vst.msk [vmem:[#allocation2 + $0x8] sm:$0xff] %vm972_vm7, %v1781_v43 }
 0x154   : > { %1811 = vst.msk [vmem:[#allocation2 + $0x8] sm:$0xff] %vm593_vm14, %v1781_v43  ;;  %v1220_v47 = vpop.permute.xlu0 %1219 }
 0x155   : > { %1444 = vst.msk [vmem:[#allocation2 + $0x20] sm:$0xff] %vm602_vm15, %v1417_v44  ;;  %1819 = vst.msk [vmem:[#allocation2 + $0x8] sm:$0xff] %vm602_vm15, %v1781_v43 }
 0x156   : > { %v1419_v46 = vpop.permute.xlu1 %1418  ;;  %1237 = vst.msk [vmem:[#allocation2 + $0x31] sm:$0x7f] %vm4798_vm1, %v1220_v47  ;;  %vm4800_vm1 = vmmov %vm4796_vm5 }
 0x157   : > { %1437 = vst.msk [vmem:[#allocation2 + $0x28] sm:$0xff] %vm593_vm14, %v1419_v46 }
 0x158   : > { %1445 = vst.msk [vmem:[#allocation2 + $0x28] sm:$0xff] %vm602_vm15, %v1419_v46  ;;  %v1826_v48 = vld [vmem:[#allocation2] sm:$0xff]  ;;  %v1655_v51 = vpop.permute.xlu0 %1654 }
 0x159   : > { %3023 = vmatprep.mubr.msk.f32.mxu1 %vm625_vm6, %v1826_v48  ;;  %1676 = vst.msk [vmem:[#allocation2 + $0x10] sm:$0xff] %vm347_vm0, %v1655_v51 }
 0x15a   : > { %v1222_v50 = vpop.permute.xlu1 %1221  ;;  %1684 = vst.msk [vmem:[#allocation2 + $0x10] sm:$0xff] %vm395_vm2, %v1655_v51 }
 0x15b   : > { %1238 = vst.msk [vmem:[#allocation2 + $0x39] sm:$0x7f] %vm4799_vm10, %v1222_v50  ;;  %vm4801_vm10 = vmmov %vm4797_vm8 }
 0x15c   : > { %v1452_v53 = vld [vmem:[#allocation2 + $0x20] sm:$0xff]  ;;  %v1827_v54 = vld [vmem:[#allocation2 + $0x8] sm:$0xff]  ;;  %1692 = vst.msk [vmem:[#allocation2 + $0x10] sm:$0xff] %vm425_vm3, %v1655_v51  ;;  %v1252_v56 = vpop.permute.xlu0 %1251 }
 0x15d   : > { %3009 = vmatprep.mubr.msk.f32.mxu0 %vm625_vm6, %v1452_v53  ;;  %3024 = vmatmul.mubr.msk.f32.vlgmr.msra.gmra.mrb[16].mxu1 %vm625_vm6, %v1827_v54  ;;  %1269 = vst.msk [vmem:[#allocation2 + $0x30] sm:$0xff] %vm395_vm2, %v1252_v56 }
 0x15e   : > { %v1657_v55 = vpop.permute.xlu1 %1656  ;;  %1277 = vst.msk [vmem:[#allocation2 + $0x30] sm:$0xff] %vm425_vm3, %v1252_v56 }
 0x15f   : > { %1677 = vst.msk [vmem:[#allocation2 + $0x18] sm:$0xff] %vm347_vm0, %v1657_v55  ;;  %v1453_v57 = vld [vmem:[#allocation2 + $0x28] sm:$0xff] }
 0x160   : > { %1685 = vst.msk [vmem:[#allocation2 + $0x18] sm:$0xff] %vm395_vm2, %v1657_v55  ;;  %3010 = vmatmul.mubr.msk.f32.gmra.mrb[4].mxu0 %vm625_vm6, %v1453_v57  ;;  %v1254_v14 = vpop.permute.xlu0 %1253 }
 0x161   : > { %1693 = vst.msk [vmem:[#allocation2 + $0x18] sm:$0xff] %vm425_vm3, %v1657_v55 }
 0x162   : > { %1294 = vst.msk [vmem:[#allocation2 + $0x30] sm:$0x1] %vm442_vm4, %v3317_v0  ;;  %v1719_v58 = vpop.permute.xlu1 %1718 }
 0x163   : > { %1302 = vst.msk [vmem:[#allocation2 + $0x31] sm:$0x7f] %vm4796_vm5, %v3933_v17  ;;  %vm267_vm5 = vcmask 253952  }
 0x164   : > { %1740 = vst.msk [vmem:[#allocation2 + $0x10] sm:$0xff] %vm4797_vm8, %v1719_v58  ;;  %v1325_v17 = vpop.permute.xlu0 %1324 }
 0x165   : > { %1270 = vst.msk [vmem:[#allocation2 + $0x38] sm:$0xff] %vm395_vm2, %v1254_v14 }
 0x166   : > { %1748 = vst.msk [vmem:[#allocation2 + $0x10] sm:$0xff] %vm492_vm9, %v1719_v58  ;;  %v1721_v59 = vpop.permute.xlu1 %1720  ;;  %1342 = vst.msk [vmem:[#allocation2 + $0x30] sm:$0xff] %vm492_vm9, %v1325_v17 }
 0x167   : > { %1278 = vst.msk [vmem:[#allocation2 + $0x38] sm:$0xff] %vm425_vm3, %v1254_v14 }
 0x168   : > { %1756 = vst.msk [vmem:[#allocation2 + $0x10] sm:$0xff] %vm501_vm11, %v1719_v58  ;;  %1350 = vst.msk [vmem:[#allocation2 + $0x30] sm:$0xff] %vm501_vm11, %v1325_v17  ;;  %v1327_v19 = vpop.permute.xlu0 %1326 }
 0x169   : > { %1295 = vst.msk [vmem:[#allocation2 + $0x38] sm:$0x1] %vm442_vm4, %v3317_v0  ;;  %vm4802_vm4 = vmmov %vm4797_vm8 }
 0x16a   : > { %1303 = vst.msk [vmem:[#allocation2 + $0x39] sm:$0x7f] %vm4800_vm1, %v3945_v45  ;;  %v1389_v45 = vpop.permute.xlu1 %1388  ;;  %vm4805_vm8 = vmmov %vm4802_vm4 }
 0x16b   : > { %1741 = vst.msk [vmem:[#allocation2 + $0x18] sm:$0xff] %vm4801_vm10, %v1721_v59 }
 0x16c   : > { %1749 = vst.msk [vmem:[#allocation2 + $0x18] sm:$0xff] %vm492_vm9, %v1721_v59  ;;  %1343 = vst.msk [vmem:[#allocation2 + $0x38] sm:$0xff] %vm492_vm9, %v1327_v19  ;;  %v1783_v22 = vpop.permute.xlu0 %1782 }
 0x16d   : > { %306 = vst.msk [vmem:[#allocation3 + $0x138] sm:$0x1] %vm267_vm5, %v3317_v0  ;;  %268 = vst.msk [vmem:[#allocation3 + $0x8] sm:$0x1] %vm267_vm5, %v3317_v0 }
 0x16e   : > { %270 = vst.msk [vmem:[#allocation3 + $0x18] sm:$0x1] %vm267_vm5, %v3317_v0  ;;  %272 = vst.msk [vmem:[#allocation3 + $0x28] sm:$0x1] %vm267_vm5, %v3317_v0  ;;  %v1391_v9 = vpop.permute.xlu1 %1390 }
 0x16f   : > { %274 = vst.msk [vmem:[#allocation3 + $0x38] sm:$0x1] %vm267_vm5, %v3317_v0  ;;  %276 = vst.msk [vmem:[#allocation3 + $0x48] sm:$0x1] %vm267_vm5, %v3317_v0 }
 0x170   : > { %278 = vst.msk [vmem:[#allocation3 + $0x58] sm:$0x1] %vm267_vm5, %v3317_v0  ;;  %280 = vst.msk [vmem:[#allocation3 + $0x68] sm:$0x1] %vm267_vm5, %v3317_v0  ;;  %v1421_v20 = vpop.permute.xlu0 %1420 }
 0x171   : > { %282 = vst.msk [vmem:[#allocation3 + $0x78] sm:$0x1] %vm267_vm5, %v3317_v0  ;;  %284 = vst.msk [vmem:[#allocation3 + $0x88] sm:$0x1] %vm267_vm5, %v3317_v0 }
 0x172   : > { %304 = vst.msk [vmem:[#allocation3 + $0x128] sm:$0x1] %vm267_vm5, %v3317_v0  ;;  %308 = vst.msk [vmem:[#allocation3 + $0x148] sm:$0x1] %vm267_vm5, %v3317_v0  ;;  %v1785_v13 = vpop.permute.xlu1 %1784 }
 0x173   : > { %310 = vst.msk [vmem:[#allocation3 + $0x158] sm:$0x1] %vm267_vm5, %v3317_v0  ;;  %312 = vst.msk [vmem:[#allocation3 + $0x168] sm:$0x1] %vm267_vm5, %v3317_v0 }
 0x174   : > { %314 = vst.msk [vmem:[#allocation3 + $0x178] sm:$0x1] %vm267_vm5, %v3317_v0  ;;  %316 = vst.msk [vmem:[#allocation3 + $0x188] sm:$0x1] %vm267_vm5, %v3317_v0  ;;  %v2078_v12 = vld [vmem:[#allocation3 + $0x1] sm:$0xff] }
 0x175   : > { %318 = vst.msk [vmem:[#allocation3 + $0x198] sm:$0x1] %vm267_vm5, %v3317_v0  ;;  %2094 = vrot.lane.b32.xlu0 %v2078_v12, %s3328_s10 }
 0x176   : > { %1757 = vst.msk [vmem:[#allocation2 + $0x18] sm:$0xff] %vm501_vm11, %v1721_v59  ;;  %1351 = vst.msk [vmem:[#allocation2 + $0x38] sm:$0xff] %vm501_vm11, %v1327_v19  ;;  %v1659_v24 = vpop.permute.xlu1 %1658 }
 0x177   : > { %1366 = vst.msk [vmem:[#allocation2 + $0x30] sm:$0x1] %vm519_vm12, %v3317_v0  ;;  %1367 = vst.msk [vmem:[#allocation2 + $0x38] sm:$0x1] %vm519_vm12, %v3317_v0  ;;  %v1423_v0 = vpop.permute.xlu0 %1422 }
 0x178   : > { %1406 = vst.msk [vmem:[#allocation2 + $0x31] sm:$0x7f] %vm560_vm13, %v1389_v45  ;;  %1407 = vst.msk [vmem:[#allocation2 + $0x39] sm:$0x7f] %vm560_vm13, %v1391_v9 }
 0x179   : > { %1804 = vst.msk [vmem:[#allocation2 + $0x10] sm:$0xff] %vm972_vm7, %v1783_v22  ;;  %1805 = vst.msk [vmem:[#allocation2 + $0x18] sm:$0xff] %vm972_vm7, %v1785_v13 }
 0x17a   : > { %1812 = vst.msk [vmem:[#allocation2 + $0x10] sm:$0xff] %vm593_vm14, %v1783_v22  ;;  %1438 = vst.msk [vmem:[#allocation2 + $0x30] sm:$0xff] %vm593_vm14, %v1421_v20  ;;  %v1723_v32 = vpop.permute.xlu1 %1722  ;;  %v2965_v6 = vpop.f32.mrb[0].mxu1 }
 0x17b   : > { %1820 = vst.msk [vmem:[#allocation2 + $0x10] sm:$0xff] %vm602_vm15, %v1783_v22  ;;  %1446 = vst.msk [vmem:[#allocation2 + $0x30] sm:$0xff] %vm602_vm15, %v1421_v20  ;;  %v1661_v28 = vpop.permute.xlu0 %1660  ;;  %v726_v49 = vadd.f32 %v2965_v6, %v4342_v1  ;;  %v720_v5 = vpop.f32.mrb[1].mxu1 }
 0x17c   : > { %1813 = vst.msk [vmem:[#allocation2 + $0x18] sm:$0xff] %vm593_vm14, %v1785_v13  ;;  %1439 = vst.msk [vmem:[#allocation2 + $0x38] sm:$0xff] %vm593_vm14, %v1423_v0  ;;  %v721_v7 = vadd.f32 %v4342_v1, %v720_v5 }
 0x17d   : > { %1821 = vst.msk [vmem:[#allocation2 + $0x18] sm:$0xff] %vm602_vm15, %v1785_v13  ;;  %1447 = vst.msk [vmem:[#allocation2 + $0x38] sm:$0xff] %vm602_vm15, %v1423_v0  ;;  %v768_v11 = vmul.f32 0.70710677, %v726_v49  ;;  %v760_v38 = vmul.f32 0.5, %v726_v49 }
 0x17e   : > { %1678 = vst.msk [vmem:[#allocation2 + $0x20] sm:$0xff] %vm347_vm0, %v1659_v24  ;;  %1679 = vst.msk [vmem:[#allocation2 + $0x28] sm:$0xff] %vm347_vm0, %v1661_v28  ;;  %v1787_v62 = vpop.permute.xlu1 %1786  ;;  %v767_v16 = vmul.f32 0.70710677, %v721_v7  ;;  %v759_v40 = vmul.f32 0.5, %v721_v7 }
 0x17f   : > { %1686 = vst.msk [vmem:[#allocation2 + $0x20] sm:$0xff] %vm395_vm2, %v1659_v24  ;;  %1687 = vst.msk [vmem:[#allocation2 + $0x28] sm:$0xff] %vm395_vm2, %v1661_v28  ;;  %v1725_v61 = vpop.permute.xlu0 %1724  ;;  %3189 = verf.f32 %v768_v11 }
 0x180   : > { %1694 = vst.msk [vmem:[#allocation2 + $0x20] sm:$0xff] %vm425_vm3, %v1659_v24  ;;  %1695 = vst.msk [vmem:[#allocation2 + $0x28] sm:$0xff] %vm425_vm3, %v1661_v28  ;;  %3191 = verf.f32 %v767_v16 }
 0x181   : > { %1742 = vst.msk [vmem:[#allocation2 + $0x20] sm:$0xff] %vm4802_vm4, %v1723_v32  ;;  %vm4803_vm12 = vmmov %vm4802_vm4 }
 0x182   : > { %v1828_v25 = vld [vmem:[#allocation2 + $0x10] sm:$0xff]  ;;  %1750 = vst.msk [vmem:[#allocation2 + $0x20] sm:$0xff] %vm492_vm9, %v1723_v32  ;;  %v1663_v3 = vpop.permute.xlu1 %1662  ;;  %vm4804_vm13 = vmmov %vm4802_vm4 }
 0x183   : > { %3026 = vmatprep.mubr.msk.f32.mxu1 %vm625_vm6, %v1828_v25  ;;  %v1454_v30 = vld [vmem:[#allocation2 + $0x30] sm:$0xff]  ;;  %1758 = vst.msk [vmem:[#allocation2 + $0x20] sm:$0xff] %vm501_vm11, %v1723_v32  ;;  %v1789_v63 = vpop.permute.xlu0 %1788  ;;  %v260_v32 = vld [vmem:[%s4773_s3 + $0x100] sm:$0xff] }
 0x184   : > { %3012 = vmatprep.mubr.msk.f32.mxu0 %vm625_vm6, %v1454_v30  ;;  %v1829_v60 = vld [vmem:[#allocation2 + $0x18] sm:$0xff]  ;;  %1743 = vst.msk [vmem:[#allocation2 + $0x28] sm:$0xff] %vm4803_vm12, %v1725_v61  ;;  %v261_v30 = vld [vmem:[%s4773_s3 + $0x108] sm:$0xff] }
 0x185   : > { %3027 = vmatmul.mubr.msk.f32.gmra.mrb[18].mxu1 %vm625_vm6, %v1829_v60  ;;  %v1455_v26 = vld [vmem:[#allocation2 + $0x38] sm:$0xff]  ;;  %1806 = vst.msk [vmem:[#allocation2 + $0x20] sm:$0xff] %vm972_vm7, %v1787_v62  ;;  %v3127_v60 = vpack.c.bf16 %v261_v30, %v260_v32 }
 0x186   : > { %1751 = vst.msk [vmem:[#allocation2 + $0x28] sm:$0xff] %vm492_vm9, %v1725_v61  ;;  %3013 = vmatmul.mubr.msk.f32.gmra.mrb[6].mxu0 %vm625_vm6, %v1455_v26  ;;  %v1727_v52 = vpop.permute.xlu1 %1726  ;;  %v263_v26 = vld [vmem:[%s4773_s3 + $0x118] sm:$0xff] }
 0x187   : > { %1814 = vst.msk [vmem:[#allocation2 + $0x20] sm:$0xff] %vm593_vm14, %v1787_v62  ;;  %v1665_v10 = vpop.permute.xlu0 %1664  ;;  %3128 = vmatprep.subr.bf16.mxu1 %v3127_v60 }
 0x188   : > { %1759 = vst.msk [vmem:[#allocation2 + $0x28] sm:$0xff] %vm501_vm11, %v1725_v61  ;;  %3130 = vmatpush3.bf16.msra.mxu1 %v3127_v60 }
 0x189   : > { %1822 = vst.msk [vmem:[#allocation2 + $0x20] sm:$0xff] %vm602_vm15, %v1787_v62  ;;  %v3190_v36 = vpop.eup %3189  ;;  %v262_v62 = vld [vmem:[%s4773_s3 + $0x110] sm:$0xff] }
 0x18a   : > { %1807 = vst.msk [vmem:[#allocation2 + $0x28] sm:$0xff] %vm972_vm7, %v1789_v63  ;;  %v1791_v33 = vpop.permute.xlu1 %1790  ;;  %v3192_v37 = vpop.eup %3191  ;;  %v784_v39 = vadd.f32 1.0, %v3190_v36 }
 0x18b   : > { %1680 = vst.msk [vmem:[#allocation2 + $0x30] sm:$0xff] %vm347_vm0, %v1663_v3  ;;  %1681 = vst.msk [vmem:[#allocation2 + $0x38] sm:$0xff] %vm347_vm0, %v1665_v10  ;;  %v1729_v23 = vpop.permute.xlu0 %1728  ;;  %v783_v8 = vadd.f32 1.0, %v3192_v37  ;;  %vm4806_vm0 = vcmask 261120  }
 0x18c   : > { %1815 = vst.msk [vmem:[#allocation2 + $0x28] sm:$0xff] %vm593_vm14, %v1789_v63  ;;  %v792_v27 = vmul.f32 %v784_v39, %v760_v38  ;;  %vm4815_vm1 = vmmov %vm4806_vm0 }
 0x18d   : > { %1688 = vst.msk [vmem:[#allocation2 + $0x30] sm:$0xff] %vm395_vm2, %v1663_v3  ;;  %1689 = vst.msk [vmem:[#allocation2 + $0x38] sm:$0xff] %vm395_vm2, %v1665_v10  ;;  %v791_v29 = vmul.f32 %v783_v8, %v759_v40 }
 0x18e   : > { %1823 = vst.msk [vmem:[#allocation2 + $0x28] sm:$0xff] %vm602_vm15, %v1789_v63  ;;  %v2968_v4 = vpop.f32.mrb[2].mxu1  ;;  %vm4807_vm2 = vmmov %vm4806_vm0 }
 0x18f   : > { %1696 = vst.msk [vmem:[#allocation2 + $0x30] sm:$0xff] %vm425_vm3, %v1663_v3  ;;  %1697 = vst.msk [vmem:[#allocation2 + $0x38] sm:$0xff] %vm425_vm3, %v1665_v10  ;;  %v1793_v35 = vpop.permute.xlu0 %1792  ;;  %v736_v18 = vadd.f32 %v2968_v4, %v4342_v1  ;;  %v730_v15 = vpop.f32.mrb[3].mxu1  ;;  %v3131_v3 = vpack.c.bf16 %v263_v26, %v262_v62 }
 0x190   : > { %1744 = vst.msk [vmem:[#allocation2 + $0x30] sm:$0xff] %vm4804_vm13, %v1727_v52  ;;  %v1830_v21 = vld [vmem:[#allocation2 + $0x20] sm:$0xff]  ;;  %v731_v42 = vadd.f32 %v4342_v1, %v730_v15  ;;  %vm4808_vm3 = vmmov %vm4806_vm0  ;;  %vm2069_vm13 = vcmask 523520  }
 0x191   : > { %1752 = vst.msk [vmem:[#allocation2 + $0x30] sm:$0xff] %vm492_vm9, %v1727_v52  ;;  %3029 = vmatprep.mubr.msk.f32.mxu1 %vm625_vm6, %v1830_v21  ;;  %v770_v43 = vmul.f32 0.70710677, %v736_v18  ;;  %v762_v51 = vmul.f32 0.5, %v736_v18  ;;  %vm4816_vm10 = vmmov %vm4806_vm0  ;;  %3132 = vmatprep.subr.bf16.mxu1 %v3131_v3 }
 0x192   : > { %1760 = vst.msk [vmem:[#allocation2 + $0x30] sm:$0xff] %vm501_vm11, %v1727_v52  ;;  %v769_v44 = vmul.f32 0.70710677, %v731_v42  ;;  %v761_v54 = vmul.f32 0.5, %v731_v42  ;;  %vm4817_vm5 = vmmov %vm4806_vm0  ;;  %3134 = vmatpush3.bf16.msra.mxu1 %v3131_v3 }
 0x193   : > { %1745 = vst.msk [vmem:[#allocation2 + $0x38] sm:$0xff] %vm4805_vm8, %v1729_v23  ;;  %3193 = verf.f32 %v770_v43  ;;  %v2046_v8 = vpop.permute.xlu0 %2045  ;;  %vm4818_vm4 = vmmov %vm4806_vm0 }
 0x194   : > { %1808 = vst.msk [vmem:[#allocation2 + $0x30] sm:$0xff] %vm972_vm7, %v1791_v33  ;;  %3195 = verf.f32 %v769_v44  ;;  %v2012_v44 = vld [vmem:[#allocation3] sm:$0xff]  ;;  %vm4819_vm12 = vmmov %vm4806_vm0 }
 0x195   : > { %1753 = vst.msk [vmem:[#allocation2 + $0x38] sm:$0xff] %vm492_vm9, %v1729_v23  ;;  %v1831_v34 = vld [vmem:[#allocation2 + $0x28] sm:$0xff]  ;;  %vm4809_vm9 = vmmov %vm4806_vm0 }
 0x196   : > { %1816 = vst.msk [vmem:[#allocation2 + $0x30] sm:$0xff] %vm593_vm14, %v1791_v33  ;;  %3030 = vmatmul.mubr.msk.f32.gmra.mrb[20].mxu1 %vm625_vm6, %v1831_v34  ;;  %vm4820_vm8 = vmmov %vm4806_vm0 }
 0x197   : > { %1761 = vst.msk [vmem:[#allocation2 + $0x38] sm:$0xff] %vm501_vm11, %v1729_v23  ;;  %vm4810_vm11 = vmmov %vm4806_vm0 }
 0x198   : > { %1824 = vst.msk [vmem:[#allocation2 + $0x30] sm:$0xff] %vm602_vm15, %v1791_v33 }
 0x199   : > { %1809 = vst.msk [vmem:[#allocation2 + $0x38] sm:$0xff] %vm972_vm7, %v1793_v35  ;;  %vm4814_vm7 = vmmov %vm4806_vm0 }
 0x19a   : > { %1817 = vst.msk [vmem:[#allocation2 + $0x38] sm:$0xff] %vm593_vm14, %v1793_v35  ;;  %vm4811_vm14 = vmmov %vm4806_vm0 }
 0x19b   : > { %1825 = vst.msk [vmem:[#allocation2 + $0x38] sm:$0xff] %vm602_vm15, %v1793_v35  ;;  %vm4812_vm15 = vmmov %vm4806_vm0 }
 0x19c   : > { %801 = vst.msk [vmem:[#allocation3 + $0x1c0] sm:$0xff] %vm4806_vm0, %v792_v27 }
 0x19d   : > { %800 = vst.msk [vmem:[#allocation3 + $0x1b0] sm:$0xff] %vm4807_vm2, %v791_v29  ;;  %v3194_v48 = vpop.eup %3193  ;;  %vm4821_vm2 = vmmov %vm4815_vm1 }
 0x19e   : > { %v3196_v50 = vpop.eup %3195  ;;  %v786_v53 = vadd.f32 1.0, %v3194_v48  ;;  %2020 = vst.msk [vmem:[#allocation4] sm:$0xff] %vm4819_vm12, %v2012_v44  ;;  %vm4832_vm12 = vmmov %vm4815_vm1 }
 0x19f   : > { %v1832_v2 = vld [vmem:[#allocation2 + $0x30] sm:$0xff]  ;;  %v785_v55 = vadd.f32 1.0, %v3196_v50  ;;  %2070 = vst.msk [vmem:[#allocation4] sm:$0xff] %vm2069_vm13, %v2046_v8 }
 0x1a0   : > { %3032 = vmatprep.mubr.msk.f32.mxu1 %vm625_vm6, %v1832_v2  ;;  %v794_v56 = vmul.f32 %v786_v53, %v762_v51 }
 0x1a1   : > { %v793_v57 = vmul.f32 %v785_v55, %v761_v54 }
 0x1a2   : > { %v1833_v41 = vld [vmem:[#allocation2 + $0x38] sm:$0xff]  ;;  %803 = vst.msk [vmem:[#allocation3 + $0x1e0] sm:$0xff] %vm4810_vm11, %v794_v56  ;;  %vm4824_vm11 = vmmov %vm4815_vm1 }
 0x1a3   : > { %3033 = vmatmul.mubr.msk.f32.gmra.mrb[22].mxu1 %vm625_vm6, %v1833_v41  ;;  %v2177_v46 = vld [vmem:[#allocation3 + $0x1c0] sm:$0xff]  ;;  %802 = vst.msk [vmem:[#allocation3 + $0x1d0] sm:$0xff] %vm4811_vm14, %v793_v57  ;;  %vm4813_vm6 = vmmov %vm4806_vm0  ;;  %vm2118_vm0 = vcmask 785920  }
 0x1a4   : > { %2185 = vst.msk [vmem:[#allocation4 + $0x20] sm:$0xff] %vm4808_vm3, %v2177_v46  ;;  %v2176_v47 = vld [vmem:[#allocation3 + $0x1b0] sm:$0xff]  ;;  %vm4822_vm3 = vmmov %vm4815_vm1 }
 0x1a5   : > { %2184 = vst.msk [vmem:[#allocation4 + $0x8] sm:$0xff] %vm4809_vm9, %v2176_v47  ;;  %vm4823_vm9 = vmmov %vm4815_vm1 }
 0x1a6   : > { %vm4825_vm14 = vmmov %vm4815_vm1 }
 0x1a9   : > { %v2179_v58 = vld [vmem:[#allocation3 + $0x1e0] sm:$0xff] }
 0x1aa   : > { %v2971_v14 = vpop.f32.mrb[4].mxu1  ;;  %2187 = vst.msk [vmem:[#allocation4 + $0x50] sm:$0xff] %vm4812_vm15, %v2179_v58  ;;  %v2178_v59 = vld [vmem:[#allocation3 + $0x1d0] sm:$0xff]  ;;  %vm4826_vm15 = vmmov %vm4815_vm1 }
 0x1ab   : > { %v746_v17 = vadd.f32 %v2971_v14, %v4342_v1  ;;  %v740_v45 = vpop.f32.mrb[5].mxu1  ;;  %2186 = vst.msk [vmem:[#allocation4 + $0x38] sm:$0xff] %vm4813_vm6, %v2178_v59  ;;  %vm4827_vm6 = vmmov %vm4815_vm1 }
 0x1ac   : > { %v741_v19 = vadd.f32 %v4342_v1, %v740_v45 }
 0x1ad   : > { %v772_v31 = vmul.f32 0.70710677, %v746_v17  ;;  %v764_v13 = vmul.f32 0.5, %v746_v17 }
 0x1ae   : > { %v771_v9 = vmul.f32 0.70710677, %v741_v19  ;;  %v763_v0 = vmul.f32 0.5, %v741_v19 }
 0x1af   : > { %3197 = verf.f32 %v772_v31 }
 0x1b0   : > { %3199 = verf.f32 %v771_v9 }
 0x1b9   : > { %v3198_v22 = vpop.eup %3197 }
 0x1ba   : > { %v3200_v12 = vpop.eup %3199  ;;  %v788_v20 = vadd.f32 1.0, %v3198_v22 }
 0x1bb   : > { %v787_v24 = vadd.f32 1.0, %v3200_v12 }
 0x1bc   : > { %v796_v25 = vmul.f32 %v788_v20, %v764_v13 }
 0x1bd   : > { %v795_v28 = vmul.f32 %v787_v24, %v763_v0 }
 0x1be   : > { %805 = vst.msk [vmem:[#allocation3 + $0x200] sm:$0xff] %vm4814_vm7, %v796_v25  ;;  %vm4828_vm7 = vmmov %vm4815_vm1 }
 0x1bf   : > { %804 = vst.msk [vmem:[#allocation3 + $0x1f0] sm:$0xff] %vm4815_vm1, %v795_v28 }
 0x1c5   : > { %v2181_v61 = vld [vmem:[#allocation3 + $0x200] sm:$0xff] }
 0x1c6   : > { %2189 = vst.msk [vmem:[#allocation4 + $0x80] sm:$0xff] %vm4816_vm10, %v2181_v61  ;;  %v2180_v63 = vld [vmem:[#allocation3 + $0x1f0] sm:$0xff]  ;;  %vm4829_vm10 = vmmov %vm4815_vm1 }
 0x1c7   : > { %2188 = vst.msk [vmem:[#allocation4 + $0x68] sm:$0xff] %vm4817_vm5, %v2180_v63  ;;  %vm4830_vm5 = vmmov %vm4815_vm1 }
 0x1cc   : > { %v2974_v6 = vpop.f32.mrb[6].mxu1 }
 0x1cd   : > { %v756_v49 = vadd.f32 %v2974_v6, %v4342_v1  ;;  %v750_v5 = vpop.f32.mrb[7].mxu1 }
 0x1ce   : > { %v751_v7 = vadd.f32 %v4342_v1, %v750_v5 }
 0x1cf   : > { %v774_v10 = vmul.f32 0.70710677, %v756_v49  ;;  %v766_v29 = vmul.f32 0.5, %v756_v49 }
 0x1d0   : > { %v773_v52 = vmul.f32 0.70710677, %v751_v7  ;;  %v2985_v11 = vpop.f32.mrb[8].mxu1  ;;  %v765_v41 = vmul.f32 0.5, %v751_v7 }
 0x1d1   : > { %3201 = verf.f32 %v774_v10  ;;  %v1101_v16 = vadd.f32 %v2985_v11, %v4342_v1  ;;  %v1095_v21 = vpop.f32.mrb[9].mxu1 }
 0x1d2   : > { %3203 = verf.f32 %v773_v52  ;;  %v1096_v23 = vadd.f32 %v4342_v1, %v1095_v21 }
 0x1d3   : > { %v1143_v33 = vmul.f32 0.70710677, %v1101_v16  ;;  %v1135_v47 = vmul.f32 0.5, %v1101_v16 }
 0x1d4   : > { %v1142_v34 = vmul.f32 0.70710677, %v1096_v23  ;;  %v2988_v35 = vpop.f32.mrb[10].mxu1  ;;  %v1134_v50 = vmul.f32 0.5, %v1096_v23 }
 0x1d5   : > { %3205 = verf.f32 %v1143_v33  ;;  %v1111_v36 = vadd.f32 %v2988_v35, %v4342_v1  ;;  %v1105_v37 = vpop.f32.mrb[11].mxu1 }
 0x1d6   : > { %3207 = verf.f32 %v1142_v34  ;;  %v1106_v38 = vadd.f32 %v4342_v1, %v1105_v37 }
 0x1d7   : > { %v1145_v39 = vmul.f32 0.70710677, %v1111_v36  ;;  %v1137_v58 = vmul.f32 0.5, %v1111_v36 }
 0x1d8   : > { %v1144_v2 = vmul.f32 0.70710677, %v1106_v38  ;;  %v1136_v17 = vmul.f32 0.5, %v1106_v38 }
 0x1d9   : > { %3209 = verf.f32 %v1145_v39 }
 0x1da   : > { %3211 = verf.f32 %v1144_v2 }
 0x1db   : > { %v3202_v40 = vpop.eup %3201 }
 0x1dc   : > { %v3204_v27 = vpop.eup %3203  ;;  %v790_v4 = vadd.f32 1.0, %v3202_v40 }
 0x1dd   : > { %v789_v18 = vadd.f32 1.0, %v3204_v27 }
 0x1de   : > { %v798_v15 = vmul.f32 %v790_v4, %v766_v29 }
 0x1df   : > { %v3206_v42 = vpop.eup %3205  ;;  %v797_v43 = vmul.f32 %v789_v18, %v765_v41 }
 0x1e0   : > { %v3208_v46 = vpop.eup %3207  ;;  %807 = vst.msk [vmem:[#allocation3 + $0x220] sm:$0xff] %vm4818_vm4, %v798_v15  ;;  %v1159_v48 = vadd.f32 1.0, %v3206_v42  ;;  %vm4831_vm4 = vmmov %vm4815_vm1 }
 0x1e1   : > { %806 = vst.msk [vmem:[#allocation3 + $0x210] sm:$0xff] %vm4820_vm8, %v797_v43  ;;  %v1158_v51 = vadd.f32 1.0, %v3208_v46  ;;  %vm4833_vm8 = vmmov %vm4815_vm1 }
 0x1e2   : > { %v1167_v54 = vmul.f32 %v1159_v48, %v1135_v47 }
 0x1e3   : > { %v3210_v55 = vpop.eup %3209  ;;  %v1166_v56 = vmul.f32 %v1158_v51, %v1134_v50 }
 0x1e4   : > { %v3212_v57 = vpop.eup %3211  ;;  %1176 = vst.msk [vmem:[#allocation3 + $0x131] sm:$0xff] %vm4821_vm2, %v1167_v54  ;;  %v1161_v14 = vadd.f32 1.0, %v3210_v55  ;;  %vm4834_vm2 = vmmov %vm4815_vm1 }
 0x1e5   : > { %1175 = vst.msk [vmem:[#allocation3 + $0x121] sm:$0xff] %vm4822_vm3, %v1166_v56  ;;  %v1160_v45 = vadd.f32 1.0, %v3212_v57  ;;  %vm4835_vm3 = vmmov %vm4815_vm1 }
 0x1e6   : > { %v1169_v9 = vmul.f32 %v1161_v14, %v1137_v58 }
 0x1e7   : > { %v2095_v53 = vpop.permute.xlu0 %2094  ;;  %v1168_v12 = vmul.f32 %v1160_v45, %v1136_v17  ;;  %v2183_v20 = vld [vmem:[#allocation3 + $0x220] sm:$0xff] }
 0x1e8   : > { %2119 = vst.msk [vmem:[#allocation4] sm:$0xff] %vm2118_vm0, %v2095_v53  ;;  %v2182_v24 = vld [vmem:[#allocation3 + $0x210] sm:$0xff] }
 0x1e9   : > { %1178 = vst.msk [vmem:[#allocation3 + $0x151] sm:$0xff] %vm4823_vm9, %v1169_v9  ;;  %vm4836_vm9 = vmmov %vm4815_vm1 }
 0x1ea   : > { %2191 = vst.msk [vmem:[#allocation4 + $0xb0] sm:$0xff] %vm4824_vm11, %v2183_v20  ;;  %vm4837_vm11 = vmmov %vm4815_vm1 }
 0x1eb   : > { %1177 = vst.msk [vmem:[#allocation3 + $0x141] sm:$0xff] %vm4825_vm14, %v1168_v12  ;;  %v2193_v25 = vld [vmem:[#allocation3 + $0x131] sm:$0xff]  ;;  %vm4838_vm14 = vmmov %vm4815_vm1 }
 0x1ec   : > { %2190 = vst.msk [vmem:[#allocation4 + $0x98] sm:$0xff] %vm4826_vm15, %v2182_v24  ;;  %v2128_v28 = vld [vmem:[#allocation3 + $0x130] sm:$0xff]  ;;  %2210 = vrot.lane.b32.xlu1 %v2193_v25, %s3327_s9  ;;  %v2192_v32 = vld [vmem:[#allocation3 + $0x121] sm:$0xff]  ;;  %vm4839_vm15 = vmmov %vm4815_vm1 }
 0x1ed   : > { %2145 = vrot.lane.b32.xlu0 %v2128_v28, %s3329_s6  ;;  %v2127_v30 = vld [vmem:[#allocation3 + $0x120] sm:$0xff] }
 0x1f0   : > { %2208 = vrot.lane.b32.xlu1 %v2192_v32, %s3327_s9  ;;  %v2195_v49 = vld [vmem:[#allocation3 + $0x151] sm:$0xff] }
 0x1f1   : > { %2143 = vrot.lane.b32.xlu0 %v2127_v30, %s3329_s6  ;;  %v2130_v5 = vld [vmem:[#allocation3 + $0x150] sm:$0xff] }
 0x1f2   : > { %v2194_v33 = vld [vmem:[#allocation3 + $0x141] sm:$0xff] }
 0x1f3   : > { %v2129_v34 = vld [vmem:[#allocation3 + $0x140] sm:$0xff] }
 0x1f4   : > { %2214 = vrot.lane.b32.xlu1 %v2195_v49, %s3327_s9 }
 0x1f5   : > { %v2991_v59 = vpop.f32.mrb[12].mxu1  ;;  %2149 = vrot.lane.b32.xlu0 %v2130_v5, %s3329_s6 }
 0x1f6   : > { %v1121_v19 = vadd.f32 %v2991_v59, %v4342_v1  ;;  %v1115_v31 = vpop.f32.mrb[13].mxu1 }
 0x1f7   : > { %v1116_v22 = vadd.f32 %v4342_v1, %v1115_v31 }
 0x1f8   : > { %v1147_v13 = vmul.f32 0.70710677, %v1121_v19  ;;  %v3005_v60 = vpop.f32.mrb[0].mxu0  ;;  %v1139_v10 = vmul.f32 0.5, %v1121_v19  ;;  %2212 = vrot.lane.b32.xlu1 %v2194_v33, %s3327_s9 }
 0x1f9   : > { %v1146_v0 = vmul.f32 0.70710677, %v1116_v22  ;;  %v1552_v61 = vadd.f32 %v3005_v60, %v4342_v1  ;;  %v1546_v62 = vpop.f32.mrb[1].mxu0  ;;  %v1138_v11 = vmul.f32 0.5, %v1116_v22  ;;  %2147 = vrot.lane.b32.xlu0 %v2129_v34, %s3329_s6 }
 0x1fa   : > { %3213 = verf.f32 %v1147_v13  ;;  %v1547_v26 = vadd.f32 %v4342_v1, %v1546_v62 }
 0x1fb   : > { %3215 = verf.f32 %v1146_v0  ;;  %v1594_v63 = vmul.f32 0.70710677, %v1552_v61  ;;  %v1586_v37 = vmul.f32 0.5, %v1552_v61 }
 0x1fc   : > { %v1593_v6 = vmul.f32 0.70710677, %v1547_v26  ;;  %v1585_v40 = vmul.f32 0.5, %v1547_v26 }
 0x1fd   : > { %3217 = verf.f32 %v1594_v63 }
 0x1fe   : > { %3219 = verf.f32 %v1593_v6 }
 0x204   : > { %v3214_v3 = vpop.eup %3213 }
 0x205   : > { %v3216_v7 = vpop.eup %3215  ;;  %v1163_v52 = vadd.f32 1.0, %v3214_v3 }
 0x206   : > { %v1162_v16 = vadd.f32 1.0, %v3216_v7 }
 0x207   : > { %v1171_v21 = vmul.f32 %v1163_v52, %v1139_v10  ;;  %v3218_v35 = vpop.eup %3217 }
 0x208   : > { %v1170_v23 = vmul.f32 %v1162_v16, %v1138_v11  ;;  %v3220_v36 = vpop.eup %3219  ;;  %v1610_v38 = vadd.f32 1.0, %v3218_v35 }
 0x209   : > { %1180 = vst.msk [vmem:[#allocation3 + $0x171] sm:$0xff] %vm4827_vm6, %v1171_v21  ;;  %v1609_v8 = vadd.f32 1.0, %v3220_v36  ;;  %vm4840_vm6 = vmmov %vm4815_vm1 }
 0x20a   : > { %1179 = vst.msk [vmem:[#allocation3 + $0x161] sm:$0xff] %vm4828_vm7, %v1170_v23  ;;  %v1618_v27 = vmul.f32 %v1610_v38, %v1586_v37  ;;  %vm4841_vm7 = vmmov %vm4815_vm1 }
 0x20b   : > { %v1617_v29 = vmul.f32 %v1609_v8, %v1585_v40 }
 0x20c   : > { %1627 = vst.msk [vmem:[#allocation3 + $0xb0] sm:$0xff] %vm4815_vm1, %v1618_v27 }
 0x20d   : > { %1626 = vst.msk [vmem:[#allocation3 + $0xa0] sm:$0xff] %vm4829_vm10, %v1617_v29  ;;  %vm4842_vm10 = vmmov %vm4815_vm1 }
 0x20f   : > { %v2994_v18 = vpop.f32.mrb[14].mxu1 }
 0x210   : > { %v2197_v39 = vld [vmem:[#allocation3 + $0x171] sm:$0xff]  ;;  %v1131_v15 = vadd.f32 %v2994_v18, %v4342_v1  ;;  %v1125_v42 = vpop.f32.mrb[15].mxu1 }
 0x211   : > { %v2132_v2 = vld [vmem:[#allocation3 + $0x170] sm:$0xff]  ;;  %2218 = vrot.lane.b32.xlu1 %v2197_v39, %s3327_s9  ;;  %v2196_v4 = vld [vmem:[#allocation3 + $0x161] sm:$0xff]  ;;  %v1126_v43 = vadd.f32 %v4342_v1, %v1125_v42 }
 0x212   : > { %2153 = vrot.lane.b32.xlu0 %v2132_v2, %s3329_s6  ;;  %v2131_v41 = vld [vmem:[#allocation3 + $0x160] sm:$0xff]  ;;  %v1149_v44 = vmul.f32 0.70710677, %v1131_v15  ;;  %v1141_v57 = vmul.f32 0.5, %v1131_v15 }
 0x213   : > { %v1148_v46 = vmul.f32 0.70710677, %v1126_v43  ;;  %v1140_v14 = vmul.f32 0.5, %v1126_v43  ;;  %v2289_v28 = vld [vmem:[#allocation3 + $0xb0] sm:$0xff] }
 0x214   : > { %3221 = verf.f32 %v1149_v44  ;;  %v2288_v30 = vld [vmem:[#allocation3 + $0xa0] sm:$0xff] }
 0x215   : > { %2216 = vrot.lane.b32.xlu1 %v2196_v4, %s3327_s9  ;;  %3223 = verf.f32 %v1148_v46  ;;  %v3008_v47 = vpop.f32.mrb[2].mxu0  ;;  %v244_v44 = vld [vmem:[%s4773_s3 + $0x80] sm:$0xff]  ;;  %v245_v46 = vld [vmem:[%s4773_s3 + $0x88] sm:$0xff] }
 0x216   : > { %2151 = vrot.lane.b32.xlu0 %v2131_v41, %s3329_s6  ;;  %v1562_v48 = vadd.f32 %v3008_v47, %v4342_v1  ;;  %v1556_v50 = vpop.f32.mrb[3].mxu0 }
 0x217   : > { %v1557_v51 = vadd.f32 %v4342_v1, %v1556_v50  ;;  %v228_v50 = vld [vmem:[%s4773_s3] sm:$0xff] }
 0x218   : > { %v1596_v53 = vmul.f32 0.70710677, %v1562_v48  ;;  %v1588_v9 = vmul.f32 0.5, %v1562_v48  ;;  %v3095_v48 = vpack.c.bf16 %v245_v46, %v244_v44  ;;  %v236_v46 = vld [vmem:[%s4773_s3 + $0x40] sm:$0xff] }
 0x219   : > { %v1595_v54 = vmul.f32 0.70710677, %v1557_v51  ;;  %v1587_v12 = vmul.f32 0.5, %v1557_v51  ;;  %v229_v51 = vld [vmem:[%s4773_s3 + $0x8] sm:$0xff] }
 0x21a   : > { %3225 = verf.f32 %v1596_v53  ;;  %v246_v53 = vld [vmem:[%s4773_s3 + $0x90] sm:$0xff]  ;;  %3096 = vmatprep.subr.bf16.mxu0 %v3095_v48 }
 0x21b   : > { %3227 = verf.f32 %v1595_v54 }
 0x21e   : > { %v3222_v55 = vpop.eup %3221 }
 0x21f   : > { %v3224_v56 = vpop.eup %3223  ;;  %v1165_v58 = vadd.f32 1.0, %v3222_v55 }
 0x220   : > { %v1164_v59 = vadd.f32 1.0, %v3224_v56  ;;  %v3097_v56 = vpack.c.bf16 %v229_v51, %v228_v50 }
 0x221   : > { %v1173_v17 = vmul.f32 %v1165_v58, %v1141_v57  ;;  %v247_v57 = vld [vmem:[%s4773_s3 + $0x98] sm:$0xff]  ;;  %v230_v58 = vld [vmem:[%s4773_s3 + $0x10] sm:$0xff] }
 0x222   : > { %v1172_v45 = vmul.f32 %v1164_v59, %v1140_v14  ;;  %v231_v14 = vld [vmem:[%s4773_s3 + $0x18] sm:$0xff]  ;;  %3098 = vmatpush3.bf16.msra.mxu0 %v3097_v56 }
 0x223   : > { %1182 = vst.msk [vmem:[#allocation3 + $0x191] sm:$0xff] %vm4830_vm5, %v1173_v17  ;;  %vm4843_vm5 = vmmov %vm4815_vm1  ;;  %v255_v56 = vld [vmem:[%s4773_s3 + $0xd8] sm:$0xff] }
 0x224   : > { %1181 = vst.msk [vmem:[#allocation3 + $0x181] sm:$0xff] %vm4831_vm4, %v1172_v45  ;;  %v3226_v19 = vpop.eup %3225  ;;  %v3099_v45 = vpack.c.bf16 %v247_v57, %v246_v53  ;;  %vm4844_vm4 = vmmov %vm4815_vm1 }
 0x225   : > { %v3228_v31 = vpop.eup %3227  ;;  %v1612_v22 = vadd.f32 1.0, %v3226_v19  ;;  %v248_v19 = vld [vmem:[%s4773_s3 + $0xa0] sm:$0xff] }
 0x226   : > { %v1611_v13 = vadd.f32 1.0, %v3228_v31  ;;  %v249_v31 = vld [vmem:[%s4773_s3 + $0xa8] sm:$0xff]  ;;  %3100 = vmatprep.subr.bf16.mxu0 %v3099_v45 }
 0x227   : > { %v1620_v20 = vmul.f32 %v1612_v22, %v1588_v9 }
 0x228   : > { %v1619_v0 = vmul.f32 %v1611_v13, %v1587_v12 }
 0x229   : > { %1629 = vst.msk [vmem:[#allocation3 + $0xd0] sm:$0xff] %vm4832_vm12, %v1620_v20  ;;  %vm4845_vm12 = vmmov %vm4815_vm1 }
 0x22a   : > { %1628 = vst.msk [vmem:[#allocation3 + $0xc0] sm:$0xff] %vm4833_vm8, %v1619_v0  ;;  %vm4846_vm8 = vmmov %vm4815_vm1 }
 0x22b   : > { %v2198_v24 = vld [vmem:[#allocation3 + $0x181] sm:$0xff] }
 0x22c   : > { %v2133_v25 = vld [vmem:[#allocation3 + $0x180] sm:$0xff]  ;;  %2220 = vrot.lane.b32.xlu1 %v2198_v24, %s3327_s9  ;;  %v3101_v24 = vpack.c.bf16 %v231_v14, %v230_v58  ;;  %v238_v58 = vld [vmem:[%s4773_s3 + $0x50] sm:$0xff]  ;;  %v239_v14 = vld [vmem:[%s4773_s3 + $0x58] sm:$0xff] }
 0x22d   : > { %2155 = vrot.lane.b32.xlu0 %v2133_v25, %s3329_s6 }
 0x22e   : > { %3102 = vmatpush3.bf16.msra.mxu0 %v3101_v24 }
 0x230   : > { %2306 = vrot.lane.b32.xlu1 %v2289_v28, %s3329_s6  ;;  %v3025_v32 = vpop.f32.mrb[16].mxu1  ;;  %v2291_v5 = vld [vmem:[#allocation3 + $0xd0] sm:$0xff] }
 0x231   : > { %2049 = vrot.lane.b32.xlu0 %v2289_v28, %s3327_s9  ;;  %v1930_v60 = vadd.f32 %v3025_v32, %v4342_v1  ;;  %v1924_v61 = vpop.f32.mrb[17].mxu1  ;;  %v2290_v11 = vld [vmem:[#allocation3 + $0xc0] sm:$0xff]  ;;  %v3103_v32 = vpack.c.bf16 %v249_v31, %v248_v19 }
 0x232   : > { %v1925_v62 = vadd.f32 %v4342_v1, %v1924_v61 }
 0x233   : > { %v1972_v26 = vmul.f32 0.70710677, %v1930_v60  ;;  %v3011_v63 = vpop.f32.mrb[4].mxu0  ;;  %v1964_v23 = vmul.f32 0.5, %v1930_v60  ;;  %v233_v60 = vld [vmem:[%s4773_s3 + $0x28] sm:$0xff]  ;;  %3104 = vmatprep.subr.bf16.mxu0 %v3103_v32 }
 0x234   : > { %2304 = vrot.lane.b32.xlu1 %v2288_v30, %s3329_s6  ;;  %v1971_v3 = vmul.f32 0.70710677, %v1925_v62  ;;  %v1572_v6 = vadd.f32 %v3011_v63, %v4342_v1  ;;  %v1566_v49 = vpop.f32.mrb[5].mxu0  ;;  %v1963_v34 = vmul.f32 0.5, %v1925_v62  ;;  %v241_v32 = vld [vmem:[%s4773_s3 + $0x68] sm:$0xff] }
 0x235   : > { %2047 = vrot.lane.b32.xlu0 %v2288_v30, %s3327_s9  ;;  %3229 = verf.f32 %v1972_v26  ;;  %v1567_v7 = vadd.f32 %v4342_v1, %v1566_v49  ;;  %v232_v30 = vld [vmem:[%s4773_s3 + $0x20] sm:$0xff] }
 0x236   : > { %3231 = verf.f32 %v1971_v3  ;;  %v1598_v10 = vmul.f32 0.70710677, %v1572_v6  ;;  %v1590_v2 = vmul.f32 0.5, %v1572_v6  ;;  %v3105_v26 = vpack.c.bf16 %v233_v60, %v232_v30  ;;  %v250_v3 = vld [vmem:[%s4773_s3 + $0xb0] sm:$0xff]  ;;  %v251_v6 = vld [vmem:[%s4773_s3 + $0xb8] sm:$0xff] }
 0x237   : > { %v1597_v52 = vmul.f32 0.70710677, %v1567_v7  ;;  %v1589_v8 = vmul.f32 0.5, %v1567_v7 }
 0x238   : > { %2310 = vrot.lane.b32.xlu1 %v2291_v5, %s3329_s6  ;;  %3233 = verf.f32 %v1598_v10  ;;  %3106 = vmatpush3.bf16.msra.mxu0 %v3105_v26 }
 0x239   : > { %2053 = vrot.lane.b32.xlu0 %v2291_v5, %s3327_s9  ;;  %3235 = verf.f32 %v1597_v52  ;;  %v3107_v52 = vpack.c.bf16 %v251_v6, %v250_v3  ;;  %v258_v3 = vld [vmem:[%s4773_s3 + $0xf0] sm:$0xff]  ;;  %v259_v6 = vld [vmem:[%s4773_s3 + $0xf8] sm:$0xff] }
 0x23b   : > { %3108 = vmatprep.subr.bf16.mxu0 %v3107_v52  ;;  %v242_v52 = vld [vmem:[%s4773_s3 + $0x70] sm:$0xff] }
 0x23c   : > { %2308 = vrot.lane.b32.xlu1 %v2290_v11, %s3329_s6 }
 0x23d   : > { %2051 = vrot.lane.b32.xlu0 %v2290_v11, %s3327_s9  ;;  %v234_v11 = vld [vmem:[%s4773_s3 + $0x30] sm:$0xff] }
 0x23f   : > { %v3230_v16 = vpop.eup %3229 }
 0x240   : > { %v3232_v21 = vpop.eup %3231  ;;  %v1988_v33 = vadd.f32 1.0, %v3230_v16  ;;  %v235_v16 = vld [vmem:[%s4773_s3 + $0x38] sm:$0xff] }
 0x241   : > { %v1987_v35 = vadd.f32 1.0, %v3232_v21 }
 0x242   : > { %v3234_v36 = vpop.eup %3233  ;;  %v1996_v37 = vmul.f32 %v1988_v33, %v1964_v23 }
 0x243   : > { %v3236_v38 = vpop.eup %3235  ;;  %v1995_v39 = vmul.f32 %v1987_v35, %v1963_v34  ;;  %v1614_v40 = vadd.f32 1.0, %v3234_v36  ;;  %v3109_v35 = vpack.c.bf16 %v235_v16, %v234_v11  ;;  %v243_v11 = vld [vmem:[%s4773_s3 + $0x78] sm:$0xff] }
 0x244   : > { %2005 = vst.msk [vmem:[#allocation3 + $0x21] sm:$0xff] %vm4834_vm2, %v1996_v37  ;;  %v1613_v27 = vadd.f32 1.0, %v3236_v38  ;;  %vm2167_vm2 = vcmask 1048320  }
 0x245   : > { %2004 = vst.msk [vmem:[#allocation3 + $0x11] sm:$0xff] %vm4835_vm3, %v1995_v39  ;;  %v1622_v29 = vmul.f32 %v1614_v40, %v1590_v2  ;;  %3110 = vmatpush3.bf16.msra.mxu0 %v3109_v35  ;;  %vm4847_vm3 = vmmov %vm4815_vm1 }
 0x246   : > { %v1621_v4 = vmul.f32 %v1613_v27, %v1589_v8 }
 0x247   : > { %1631 = vst.msk [vmem:[#allocation3 + $0xf0] sm:$0xff] %vm4836_vm9, %v1622_v29  ;;  %v252_v29 = vld [vmem:[%s4773_s3 + $0xc0] sm:$0xff]  ;;  %vm4848_vm9 = vmmov %vm4815_vm1 }
 0x248   : > { %1630 = vst.msk [vmem:[#allocation3 + $0xe0] sm:$0xff] %vm4837_vm11, %v1621_v4  ;;  %v253_v4 = vld [vmem:[%s4773_s3 + $0xc8] sm:$0xff]  ;;  %vm4849_vm11 = vmmov %vm4815_vm1 }
 0x249   : > { %v3111_v44 = vpack.c.bf16 %v253_v4, %v252_v29 }
 0x24b   : > { %v2337_v41 = vld [vmem:[#allocation3 + $0x21] sm:$0xff]  ;;  %3112 = vmatprep.subr.bf16.mxu0 %v3111_v44 }
 0x24c   : > { %v4462_v18 = vld [vmem:[#allocation3 + $0x20] sm:$0xff]  ;;  %v2336_v15 = vld [vmem:[#allocation3 + $0x11] sm:$0xff]  ;;  %2345 = vst.msk [vmem:[#allocation4 + $0x28] sm:$0xff] %vm4838_vm14, %v2337_v41  ;;  %vm4850_vm14 = vmmov %vm4815_vm1 }
 0x24d   : > { %v4465_v42 = vld [vmem:[#allocation3 + $0x10] sm:$0xff]  ;;  %2022 = vst.msk [vmem:[#allocation4 + $0x30] sm:$0xff] %vm4839_vm15, %v4462_v18  ;;  %vm4851_vm15 = vmmov %vm4815_vm1 }
 0x24e   : > { %2344 = vst.msk [vmem:[#allocation4 + $0x10] sm:$0xff] %vm4840_vm6, %v2336_v15  ;;  %v2293_v43 = vld [vmem:[#allocation3 + $0xf0] sm:$0xff]  ;;  %vm4852_vm6 = vmmov %vm4815_vm1 }
 0x24f   : > { %2021 = vst.msk [vmem:[#allocation4 + $0x18] sm:$0xff] %vm4841_vm7, %v4465_v42  ;;  %2314 = vrot.lane.b32.xlu1 %v2293_v43, %s3329_s6  ;;  %2057 = vrot.lane.b32.xlu0 %v2293_v43, %s3327_s9  ;;  %v2292_v17 = vld [vmem:[#allocation3 + $0xe0] sm:$0xff]  ;;  %vm4853_vm7 = vmmov %vm4815_vm1 }
 0x253   : > { %2312 = vrot.lane.b32.xlu1 %v2292_v17, %s3329_s6  ;;  %2055 = vrot.lane.b32.xlu0 %v2292_v17, %s3327_s9  ;;  %v2357_v28 = vld [vmem:[#allocation4 + $0x28] sm:$0xff] }
 0x255   : > { %v2354_v0 = vld [vmem:[#allocation4 + $0x10] sm:$0xff] }
 0x256   : > { %3043 = vmatprep.mubr.msk.f32.mxu1 %vm4815_vm1, %v2354_v0 }
 0x257   : > { %3044 = vmatmul.mubr.msk.f32.vlgmr.msra.gmra.mrb[24].mxu1 %vm4842_vm10, %v2357_v28  ;;  %2098 = vrot.lane.b32.xlu0 %v2337_v41, %s3328_s10  ;;  %v240_v28 = vld [vmem:[%s4773_s3 + $0x60] sm:$0xff]  ;;  %vm4854_vm10 = vmmov %vm4815_vm1 }
 0x258   : > { %v3028_v47 = vpop.f32.mrb[18].mxu1 }
 0x259   : > { %v1940_v54 = vadd.f32 %v3028_v47, %v4342_v1  ;;  %v1934_v55 = vpop.f32.mrb[19].mxu1  ;;  %v3014_v22 = vpop.f32.mrb[6].mxu0  ;;  %v237_v47 = vld [vmem:[%s4773_s3 + $0x48] sm:$0xff] }
 0x25a   : > { %v1935_v59 = vadd.f32 %v4342_v1, %v1934_v55  ;;  %v1582_v13 = vadd.f32 %v3014_v22, %v4342_v1  ;;  %v1576_v20 = vpop.f32.mrb[7].mxu0  ;;  %v3113_v50 = vpack.c.bf16 %v237_v47, %v236_v46  ;;  %v254_v55 = vld [vmem:[%s4773_s3 + $0xd0] sm:$0xff] }
 0x25b   : > { %v1974_v9 = vmul.f32 0.70710677, %v1940_v54  ;;  %v1577_v25 = vadd.f32 %v4342_v1, %v1576_v20  ;;  %2096 = vrot.lane.b32.xlu0 %v2336_v15, %s3328_s10  ;;  %v1966_v5 = vmul.f32 0.5, %v1940_v54  ;;  %v3115_v57 = vpack.c.bf16 %v255_v56, %v254_v55  ;;  %v257_v20 = vld [vmem:[%s4773_s3 + $0xe8] sm:$0xff]  ;;  %v2199_v55 = vld [vmem:[#allocation3 + $0x191] sm:$0xff] }
 0x25c   : > { %v1973_v12 = vmul.f32 0.70710677, %v1935_v59  ;;  %v1600_v61 = vmul.f32 0.70710677, %v1582_v13  ;;  %v1965_v21 = vmul.f32 0.5, %v1935_v59  ;;  %v1592_v40 = vmul.f32 0.5, %v1582_v13  ;;  %3114 = vmatpush3.bf16.msra.mxu0 %v3113_v50 }
 0x25d   : > { %3237 = verf.f32 %v1974_v9  ;;  %v1599_v62 = vmul.f32 0.70710677, %v1577_v25  ;;  %v1591_v41 = vmul.f32 0.5, %v1577_v25  ;;  %v3117_v59 = vpack.c.bf16 %v239_v14, %v238_v58  ;;  %3116 = vmatprep.subr.bf16.mxu0 %v3115_v57  ;;  %v256_v9 = vld [vmem:[%s4773_s3 + $0xe0] sm:$0xff]  ;;  %v2134_v56 = vld [vmem:[#allocation3 + $0x190] sm:$0xff] }
 0x25e   : > { %3239 = verf.f32 %v1973_v12  ;;  %v2211_v53 = vpop.permute.xlu1 %2210  ;;  %v3119_v25 = vpack.c.bf16 %v257_v20, %v256_v9 }
 0x25f   : > { %3241 = verf.f32 %v1600_v61  ;;  %v4554_v54 = vpop.permute.xlu0 %2145  ;;  %2233 = vst.msk [vmem:[#allocation4 + $0x20] sm:$0xff] %vm2069_vm13, %v2211_v53  ;;  %v3121_v61 = vpack.c.bf16 %v241_v32, %v240_v28 }
 0x260   : > { %3243 = verf.f32 %v1599_v62  ;;  %3118 = vmatpush3.bf16.msra.mxu0 %v3117_v59 }
 0x261   : > { %3120 = vmatprep.subr.bf16.mxu0 %v3119_v25 }
 0x262   : > { %v2209_v17 = vpop.permute.xlu1 %2208 }
 0x263   : > { %v2144_v45 = vpop.permute.xlu0 %2143  ;;  %2232 = vst.msk [vmem:[#allocation4 + $0x8] sm:$0xff] %vm2069_vm13, %v2209_v17 }
 0x264   : > { %2168 = vst.msk [vmem:[#allocation4] sm:$0xff] %vm2167_vm2, %v2144_v45  ;;  %3122 = vmatpush3.bf16.msra.mxu0 %v3121_v61 }
 0x266   : > { %v2215_v30 = vpop.permute.xlu1 %2214 }
 0x267   : > { %v3238_v63 = vpop.eup %3237  ;;  %2235 = vst.msk [vmem:[#allocation4 + $0x50] sm:$0xff] %vm2069_vm13, %v2215_v30 }
 0x268   : > { %v3240_v49 = vpop.eup %3239  ;;  %v1990_v7 = vadd.f32 1.0, %v3238_v63 }
 0x269   : > { %v3031_v10 = vpop.f32.mrb[20].mxu1  ;;  %v1989_v23 = vadd.f32 1.0, %v3240_v49  ;;  %v3242_v36 = vpop.eup %3241 }
 0x26a   : > { %v4533_v33 = vadd.f32 %v3031_v10, %v4342_v1  ;;  %v1944_v34 = vpop.f32.mrb[21].mxu1  ;;  %v1998_v37 = vmul.f32 %v1990_v7, %v1966_v5  ;;  %v3244_v39 = vpop.eup %3243  ;;  %v1616_v8 = vadd.f32 1.0, %v3242_v36  ;;  %v3123_v10 = vpack.c.bf16 %v259_v6, %v258_v3 }
 0x26b   : > { %v4536_v38 = vadd.f32 %v4342_v1, %v1944_v34  ;;  %v1997_v2 = vmul.f32 %v1989_v23, %v1965_v21  ;;  %v1615_v15 = vadd.f32 1.0, %v3244_v39  ;;  %v3125_v23 = vpack.c.bf16 %v243_v11, %v242_v52  ;;  %v2213_v34 = vpop.permute.xlu1 %2212  ;;  %v2352_v11 = vld [vmem:[#allocation4] sm:$0xff] }
 0x26c   : > { %v1976_v27 = vmul.f32 0.70710677, %v4533_v33  ;;  %2007 = vst.msk [vmem:[#allocation3 + $0x41] sm:$0xff] %vm4843_vm5, %v1998_v37  ;;  %v1624_v48 = vmul.f32 %v1616_v8, %v1592_v40  ;;  %v1968_v5 = vmul.f32 0.5, %v4533_v33  ;;  %3124 = vmatprep.subr.bf16.mxu0 %v3123_v10  ;;  %vm4855_vm5 = vmmov %vm4815_vm1 }
 0x26d   : > { %v1975_v43 = vmul.f32 0.70710677, %v4536_v38  ;;  %2006 = vst.msk [vmem:[#allocation3 + $0x31] sm:$0xff] %vm4844_vm4, %v1997_v2  ;;  %v1623_v51 = vmul.f32 %v1615_v15, %v1591_v41  ;;  %v1967_v16 = vmul.f32 0.5, %v4536_v38  ;;  %3126 = vmatpush3.bf16.msra.mxu0 %v3125_v23  ;;  %vm4856_vm4 = vmmov %vm4815_vm1 }
 0x26e   : > { %3245 = verf.f32 %v1976_v27  ;;  %1633 = vst.msk [vmem:[#allocation3 + $0x110] sm:$0xff] %vm4845_vm12, %v1624_v48  ;;  %vm4857_vm12 = vmmov %vm4815_vm1  ;;  %v2150_v48 = vpop.permute.xlu0 %2149 }
 0x26f   : > { %3247 = verf.f32 %v1975_v43  ;;  %1632 = vst.msk [vmem:[#allocation3 + $0x100] sm:$0xff] %vm4846_vm8, %v1623_v51  ;;  %vm4858_vm8 = vmmov %vm4815_vm1 }
 0x270   : > { %2234 = vst.msk [vmem:[#allocation4 + $0x38] sm:$0xff] %vm2069_vm13, %v2213_v34 }
 0x272   : > { %v2148_v57 = vpop.permute.xlu0 %2147 }
 0x273   : > { %v2082_v19 = vld [vmem:[#allocation3 + $0x41] sm:$0xff] }
 0x274   : > { %v4573_v31 = vld [vmem:[#allocation3 + $0x40] sm:$0xff]  ;;  %2102 = vrot.lane.b32.xlu0 %v2082_v19, %s3328_s10  ;;  %v2081_v12 = vld [vmem:[#allocation3 + $0x31] sm:$0xff]  ;;  %2347 = vst.msk [vmem:[#allocation4 + $0x58] sm:$0xff] %vm4847_vm3, %v2082_v19  ;;  %vm4859_vm3 = vmmov %vm4815_vm1 }
 0x275   : > { %v4580_v13 = vld [vmem:[#allocation3 + $0x30] sm:$0xff]  ;;  %2024 = vst.msk [vmem:[#allocation4 + $0x60] sm:$0xff] %vm4848_vm9, %v4573_v31  ;;  %vm4860_vm9 = vmmov %vm4815_vm1 }
 0x276   : > { %v3034_v22 = vpop.f32.mrb[22].mxu1  ;;  %2346 = vst.msk [vmem:[#allocation4 + $0x40] sm:$0xff] %vm4849_vm11, %v2081_v12  ;;  %v2294_v63 = vld [vmem:[#allocation3 + $0x100] sm:$0xff]  ;;  %vm4861_vm11 = vmmov %vm4815_vm1  ;;  %v2295_v19 = vld [vmem:[#allocation3 + $0x110] sm:$0xff] }
 0x277   : > { %v1960_v0 = vadd.f32 %v3034_v22, %v4342_v1  ;;  %v1954_v24 = vpop.f32.mrb[23].mxu1  ;;  %2023 = vst.msk [vmem:[#allocation4 + $0x48] sm:$0xff] %vm4850_vm14, %v4580_v13  ;;  %2316 = vrot.lane.b32.xlu1 %v2294_v63, %s3329_s6  ;;  %vm4862_vm14 = vmmov %vm4815_vm1 }
 0x278   : > { %v1955_v60 = vadd.f32 %v4342_v1, %v1954_v24  ;;  %v3246_v62 = vpop.eup %3245  ;;  %2100 = vrot.lane.b32.xlu0 %v2081_v12, %s3328_s10 }
 0x279   : > { %v1978_v26 = vmul.f32 0.70710677, %v1960_v0  ;;  %v3248_v49 = vpop.eup %3247  ;;  %v1992_v7 = vadd.f32 1.0, %v3246_v62 }
 0x27a   : > { %v1977_v1 = vmul.f32 0.70710677, %v1955_v60  ;;  %v1991_v21 = vadd.f32 1.0, %v3248_v49 }
 0x27b   : > { %3249 = verf.f32 %v1978_v26  ;;  %v2000_v33 = vmul.f32 %v1992_v7, %v1968_v5  ;;  %2258 = vrot.lane.b32.xlu1 %v4462_v18, %s3328_s10  ;;  %v2363_v37 = vld [vmem:[#allocation4 + $0x58] sm:$0xff]  ;;  %v1970_v18 = vmul.f32 0.5, %v1960_v0 }
 0x27c   : > { %3251 = verf.f32 %v1977_v1  ;;  %v1999_v35 = vmul.f32 %v1991_v21, %v1967_v16 }
 0x27d   : > { %2009 = vst.msk [vmem:[#allocation3 + $0x61] sm:$0xff] %vm4851_vm15, %v2000_v33  ;;  %v2360_v36 = vld [vmem:[#allocation4 + $0x40] sm:$0xff]  ;;  %vm4863_vm15 = vmmov %vm4815_vm1 }
 0x27e   : > { %2008 = vst.msk [vmem:[#allocation3 + $0x51] sm:$0xff] %vm4852_vm6, %v1999_v35  ;;  %3046 = vmatprep.mubr.msk.f32.mxu1 %vm4853_vm7, %v2360_v36  ;;  %vm4864_vm6 = vmmov %vm4815_vm1 }
 0x27f   : > { %3047 = vmatmul.mubr.msk.f32.gmra.mrb[26].mxu1 %vm4815_vm1, %v2363_v37  ;;  %2256 = vrot.lane.b32.xlu1 %v4465_v42, %s3328_s10  ;;  %v1969_v42 = vmul.f32 0.5, %v1955_v60  ;;  %vm4865_vm7 = vmmov %vm4815_vm1 }
 0x283   : > { %v2219_v38 = vpop.permute.xlu1 %2218  ;;  %2262 = vrot.lane.b32.xlu1 %v4573_v31, %s3328_s10 }
 0x284   : > { %2237 = vst.msk [vmem:[#allocation4 + $0x80] sm:$0xff] %vm2069_vm13, %v2219_v38  ;;  %v2084_v2 = vld [vmem:[#allocation3 + $0x61] sm:$0xff]  ;;  %v2154_v14 = vpop.permute.xlu0 %2153 }
 0x285   : > { %v3250_v39 = vpop.eup %3249  ;;  %v2245_v40 = vld [vmem:[#allocation3 + $0x60] sm:$0xff]  ;;  %2106 = vrot.lane.b32.xlu0 %v2084_v2, %s3328_s10  ;;  %v2083_v29 = vld [vmem:[#allocation3 + $0x51] sm:$0xff]  ;;  %2349 = vst.msk [vmem:[#allocation4 + $0x88] sm:$0xff] %vm4854_vm10, %v2084_v2 }
 0x286   : > { %v3252_v8 = vpop.eup %3251  ;;  %v1994_v27 = vadd.f32 1.0, %v3250_v39  ;;  %v2244_v4 = vld [vmem:[#allocation3 + $0x50] sm:$0xff]  ;;  %2026 = vst.msk [vmem:[#allocation4 + $0x90] sm:$0xff] %vm4855_vm5, %v2245_v40 }
 0x287   : > { %v1993_v41 = vadd.f32 1.0, %v3252_v8  ;;  %2348 = vst.msk [vmem:[#allocation4 + $0x70] sm:$0xff] %vm4856_vm4, %v2083_v29  ;;  %v2217_v43 = vpop.permute.xlu1 %2216  ;;  %2260 = vrot.lane.b32.xlu1 %v4580_v13, %s3328_s10 }
 0x288   : > { %2025 = vst.msk [vmem:[#allocation4 + $0x78] sm:$0xff] %vm4857_vm12, %v2244_v4  ;;  %v2002_v15 = vmul.f32 %v1994_v27, %v1970_v18  ;;  %v2152_v45 = vpop.permute.xlu0 %2151 }
 0x289   : > { %v2001_v44 = vmul.f32 %v1993_v41, %v1969_v42  ;;  %2236 = vst.msk [vmem:[#allocation4 + $0x68] sm:$0xff] %vm2069_vm13, %v2217_v43  ;;  %2104 = vrot.lane.b32.xlu0 %v2083_v29, %s3328_s10 }
 0x28a   : > { %2011 = vst.msk [vmem:[#allocation3 + $0x81] sm:$0xff] %vm4858_vm8, %v2002_v15 }
 0x28b   : > { %2010 = vst.msk [vmem:[#allocation3 + $0x71] sm:$0xff] %vm4859_vm3, %v2001_v44  ;;  %2266 = vrot.lane.b32.xlu1 %v2245_v40, %s3328_s10 }
 0x28c   : > { %v2369_v47 = vld [vmem:[#allocation4 + $0x88] sm:$0xff] }
 0x28d   : > { %2059 = vrot.lane.b32.xlu0 %v2294_v63, %s3327_s9 }
 0x28e   : > { %v2366_v46 = vld [vmem:[#allocation4 + $0x70] sm:$0xff] }
 0x28f   : > { %3049 = vmatprep.mubr.msk.f32.mxu1 %vm4860_vm9, %v2366_v46  ;;  %2264 = vrot.lane.b32.xlu1 %v2244_v4, %s3328_s10 }
 0x290   : > { %3050 = vmatmul.mubr.msk.f32.gmra.mrb[28].mxu1 %vm4861_vm11, %v2369_v47 }
 0x291   : > { %v2343_v50 = vld [vmem:[#allocation3 + $0x81] sm:$0xff] }
 0x292   : > { %v2085_v51 = vld [vmem:[#allocation3 + $0x71] sm:$0xff]  ;;  %2351 = vst.msk [vmem:[#allocation4 + $0xb8] sm:$0xff] %vm4862_vm14, %v2343_v50  ;;  %v2247_v17 = vld [vmem:[#allocation3 + $0x80] sm:$0xff] }
 0x293   : > { %v2246_v53 = vld [vmem:[#allocation3 + $0x70] sm:$0xff]  ;;  %2108 = vrot.lane.b32.xlu0 %v2085_v51, %s3328_s10  ;;  %2350 = vst.msk [vmem:[#allocation4 + $0xa0] sm:$0xff] %vm4863_vm15, %v2085_v51  ;;  %2222 = vrot.lane.b32.xlu1 %v2199_v55, %s3327_s9  ;;  %s215_s9 = sand.u32 1, %s3307_s19  }
 0x294   : > { %2027 = vst.msk [vmem:[#allocation4 + $0xa8] sm:$0xff] %vm4864_vm6, %v2246_v53  ;;  %s2705_s30 = sshll.u32 %s215_s9, 6  ;;  %s4729_s15 = scalar_lea.sflag [#allocation6], %s215_s9 }
 0x295   : > { %s4700_s7 = scalar_lea.vmem [#allocation5], %s2705_s30 }
 0x296   : > { %s2639_s14 = sshll.u32 %s4700_s7, 4  ;;  %s4723_s14 = int_to_ptr.vmem [resolvable:$true] %s2639_s14 }
 0x297   : > { %2157 = vrot.lane.b32.xlu0 %v2134_v56, %s3329_s6  ;;  %2268 = vrot.lane.b32.xlu1 %v2246_v53, %s3328_s10  ;;  %s3253_s16 = scalar_lea.vmem %s4723_s14, 1024  ;;  %p3260_p0 = scmp.lt.s32.totalorder %s4723_s14, %s3258_s17 }
 0x298   : > { %p3254_p11 = scmp.ne.s32.totalorder %s4723_s14, %s3253_s16  ;;  %p3261_p1 = scmp.lt.s32.totalorder %s3259_s23, %s3253_s16 }
 0x299   : > { %v2375_v59 = vld [vmem:[#allocation4 + $0xb8] sm:$0xff] }
 0x29a   : > { %v2372_v58 = vld [vmem:[#allocation4 + $0xa0] sm:$0xff]  ;;  %p3255_p12 = pnand %p3254_p11, %p3401_p5  ;;  %p3262_p2 = por %p3261_p1, %p3260_p0 }
 0x29b   : > { %3052 = vmatprep.mubr.msk.f32.mxu1 %vm4865_vm7, %v2372_v58  ;;  %2270 = vrot.lane.b32.xlu1 %v2247_v17, %s3328_s10 }
 0x29c   : > { %3053 = vmatmul.mubr.msk.f32.gmra.mrb[30].mxu1 %vm4815_vm1, %v2375_v59  ;;  %p3256_p13 = pneg %p3255_p12 }
 0x29e   : > { %v2221_v31 = vpop.permute.xlu1 %2220  ;;  %p3263_p3 = pnand %p3262_p2, %p3256_p13 }
 0x29f   : > { %2318 = vrot.lane.b32.xlu1 %v2295_v19, %s3329_s6  ;;  %v2156_v9 = vpop.permute.xlu0 %2155  ;;  %2238 = vst.msk [vmem:[#allocation4 + $0x98] sm:$0xff] %vm2069_vm13, %v2221_v31 }
 0x2a2   : > { %v2307_v24 = vpop.permute.xlu1 %2306 }
 0x2a3   : > { %v2050_v22 = vpop.permute.xlu0 %2049 }
 0x2a4   : > { %2072 = vst.msk [vmem:[#allocation4 + $0x30] sm:$0xff] %vm2069_vm13, %v2050_v22 }
 0x2a6   : > { %v2305_v28 = vpop.permute.xlu1 %2304 }
 0x2a7   : > { %v2048_v12 = vpop.permute.xlu0 %2047 }
 0x2a8   : > { %2071 = vst.msk [vmem:[#allocation4 + $0x18] sm:$0xff] %vm2069_vm13, %v2048_v12 }
 0x2aa   : > { %v2311_v60 = vpop.permute.xlu1 %2310 }
 0x2ab   : > { %v2054_v13 = vpop.permute.xlu0 %2053 }
 0x2ac   : > { %2074 = vst.msk [vmem:[#allocation4 + $0x60] sm:$0xff] %vm2069_vm13, %v2054_v13 }
 0x2ae   : > { %v2309_v61 = vpop.permute.xlu1 %2308 }
 0x2af   : > { %v2052_v20 = vpop.permute.xlu0 %2051 }
 0x2b0   : > { %2073 = vst.msk [vmem:[#allocation4 + $0x48] sm:$0xff] %vm2069_vm13, %v2052_v20 }
 0x2c1   : > { %v2058_v0 = vpop.permute.xlu0 %2057  ;;  %v2315_v62 = vpop.permute.xlu1 %2314 }
 0x2c2   : > { %2076 = vst.msk [vmem:[#allocation4 + $0x90] sm:$0xff] %vm2069_vm13, %v2058_v0 }
 0x2c5   : > { %v2056_v25 = vpop.permute.xlu0 %2055  ;;  %v2313_v26 = vpop.permute.xlu1 %2312 }
 0x2c6   : > { %2075 = vst.msk [vmem:[#allocation4 + $0x78] sm:$0xff] %vm2069_vm13, %v2056_v25 }
 0x2c9   : > { %v2099_v32 = vpop.permute.xlu0 %2098 }
 0x2ca   : > { %2121 = vst.msk [vmem:[#allocation4 + $0x30] sm:$0xff] %vm2118_vm0, %v2099_v32 }
 0x2cb   : > { %2170 = vst.msk [vmem:[#allocation4 + $0x30] sm:$0xff] %vm2167_vm2, %v2148_v57 }
 0x2cd   : > { %v2097_v30 = vpop.permute.xlu0 %2096 }
 0x2ce   : > { %2120 = vst.msk [vmem:[#allocation4 + $0x18] sm:$0xff] %vm2118_vm0, %v2097_v30 }
 0x2cf   : > { %2169 = vst.msk [vmem:[#allocation4 + $0x18] sm:$0xff] %vm2167_vm2, %v4554_v54 }
 0x2d2   : > { %v2358_v37 = vld [vmem:[#allocation4 + $0x30] sm:$0xff] }
 0x2d6   : > { %v2355_v33 = vld [vmem:[#allocation4 + $0x18] sm:$0xff] }
 0x2e6   : > { %v2103_v63 = vpop.permute.xlu0 %2102 }
 0x2e7   : > { %2123 = vst.msk [vmem:[#allocation4 + $0x60] sm:$0xff] %vm2118_vm0, %v2103_v63 }
 0x2e8   : > { %2172 = vst.msk [vmem:[#allocation4 + $0x60] sm:$0xff] %vm2167_vm2, %v2152_v45 }
 0x2e9   : > { %v2317_v3 = vpop.permute.xlu1 %2316 }
 0x2ea   : > { %v2101_v6 = vpop.permute.xlu0 %2100 }
 0x2eb   : > { %2122 = vst.msk [vmem:[#allocation4 + $0x48] sm:$0xff] %vm2118_vm0, %v2101_v6 }
 0x2ec   : > { %2171 = vst.msk [vmem:[#allocation4 + $0x48] sm:$0xff] %vm2167_vm2, %v2150_v48 }
 0x2ed   : > { %v2259_v49 = vpop.permute.xlu1 %2258 }
 0x2ee   : > { %2281 = vst.msk [vmem:[#allocation4 + $0x20] sm:$0xff] %vm2118_vm0, %v2259_v49 }
 0x2ef   : > { %2329 = vst.msk [vmem:[#allocation4 + $0x20] sm:$0xff] %vm2167_vm2, %v2307_v24  ;;  %v2364_v27 = vld [vmem:[#allocation4 + $0x60] sm:$0xff] }
 0x2f1   : > { %v2257_v54 = vpop.permute.xlu1 %2256 }
 0x2f2   : > { %2280 = vst.msk [vmem:[#allocation4 + $0x8] sm:$0xff] %vm2118_vm0, %v2257_v54 }
 0x2f3   : > { %2328 = vst.msk [vmem:[#allocation4 + $0x8] sm:$0xff] %vm2167_vm2, %v2305_v28  ;;  %v2361_v40 = vld [vmem:[#allocation4 + $0x48] sm:$0xff] }
 0x2f5   : > { %v2263_v5 = vpop.permute.xlu1 %2262 }
 0x2f6   : > { %2283 = vst.msk [vmem:[#allocation4 + $0x50] sm:$0xff] %vm2118_vm0, %v2263_v5  ;;  %v2356_v16 = vld [vmem:[#allocation4 + $0x20] sm:$0xff] }
 0x2f7   : > { %v2107_v7 = vpop.permute.xlu0 %2106  ;;  %2331 = vst.msk [vmem:[#allocation4 + $0x50] sm:$0xff] %vm2167_vm2, %v2311_v60 }
 0x2f8   : > { %2125 = vst.msk [vmem:[#allocation4 + $0x90] sm:$0xff] %vm2118_vm0, %v2107_v7 }
 0x2f9   : > { %2174 = vst.msk [vmem:[#allocation4 + $0x90] sm:$0xff] %vm2167_vm2, %v2156_v9  ;;  %v2261_v1 = vpop.permute.xlu1 %2260 }
 0x2fa   : > { %2282 = vst.msk [vmem:[#allocation4 + $0x38] sm:$0xff] %vm2118_vm0, %v2261_v1  ;;  %v2353_v52 = vld [vmem:[#allocation4 + $0x8] sm:$0xff] }
 0x2fb   : > { %v2105_v10 = vpop.permute.xlu0 %2104  ;;  %2330 = vst.msk [vmem:[#allocation4 + $0x38] sm:$0xff] %vm2167_vm2, %v2309_v61  ;;  %2470 = vmatprep.mubr.f32.mxu0 %v2353_v52 }
 0x2fc   : > { %2124 = vst.msk [vmem:[#allocation4 + $0x78] sm:$0xff] %vm2118_vm0, %v2105_v10  ;;  %2471 = vmatmul.mubr.f32.vlgmr.msra.gmra.mrb[8].mxu0 %v2352_v11 }
 0x2fd   : > { %2173 = vst.msk [vmem:[#allocation4 + $0x78] sm:$0xff] %vm2167_vm2, %v2154_v14  ;;  %v2267_v21 = vpop.permute.xlu1 %2266  ;;  %2475 = vmatprep.mubr.f32.mxu0 %v2356_v16  ;;  %v2823_v14 = vld [vmem:[%s4774_s4] ss:$0 sm:$0xff] }
 0x2fe   : > { %2285 = vst.msk [vmem:[#allocation4 + $0x80] sm:$0xff] %vm2118_vm0, %v2267_v21  ;;  %v2362_v38 = vld [vmem:[#allocation4 + $0x50] sm:$0xff] }
 0x2ff   : > { %v2060_v23 = vpop.permute.xlu0 %2059  ;;  %2333 = vst.msk [vmem:[#allocation4 + $0x80] sm:$0xff] %vm2167_vm2, %v2315_v62 }
 0x300   : > { %2077 = vst.msk [vmem:[#allocation4 + $0xa8] sm:$0xff] %vm2069_vm13, %v2060_v23  ;;  %2476 = vmatmul.mubr.f32.gmra.mrb[10].mxu0 %v2355_v33  ;;  %v2370_v43 = vld [vmem:[#allocation4 + $0x90] sm:$0xff] }
 0x301   : > { %v2265_v34 = vpop.permute.xlu1 %2264 }
 0x302   : > { %2284 = vst.msk [vmem:[#allocation4 + $0x68] sm:$0xff] %vm2118_vm0, %v2265_v34  ;;  %v2359_v36 = vld [vmem:[#allocation4 + $0x38] sm:$0xff] }
 0x303   : > { %2332 = vst.msk [vmem:[#allocation4 + $0x68] sm:$0xff] %vm2167_vm2, %v2313_v26  ;;  %2480 = vmatprep.mubr.f32.mxu0 %v2359_v36 }
 0x304   : > { %2481 = vmatmul.mubr.f32.gmra.mrb[12].mxu0 %v2358_v37  ;;  %v2367_v42 = vld [vmem:[#allocation4 + $0x78] sm:$0xff] }
 0x305   : > { %v2109_v35 = vpop.permute.xlu0 %2108  ;;  %v2223_v39 = vpop.permute.xlu1 %2222  ;;  %2485 = vmatprep.mubr.f32.mxu0 %v2362_v38 }
 0x306   : > { %2126 = vst.msk [vmem:[#allocation4 + $0xa8] sm:$0xff] %vm2118_vm0, %v2109_v35  ;;  %v2368_v29 = vld [vmem:[#allocation4 + $0x80] sm:$0xff] }
 0x307   : > { %2239 = vst.msk [vmem:[#allocation4 + $0xb0] sm:$0xff] %vm2069_vm13, %v2223_v39  ;;  %vm2616_vm13 = vcmask 523264  }
 0x308   : > { %2486 = vmatmul.mubr.f32.gmra.mrb[14].mxu0 %v2361_v40 }
 0x309   : > { %v2158_v2 = vpop.permute.xlu0 %2157  ;;  %v2269_v8 = vpop.permute.xlu1 %2268 }
 0x30a   : > { %2175 = vst.msk [vmem:[#allocation4 + $0xa8] sm:$0xff] %vm2167_vm2, %v2158_v2  ;;  %v2365_v18 = vld [vmem:[#allocation4 + $0x68] sm:$0xff] }
 0x30b   : > { %2286 = vst.msk [vmem:[#allocation4 + $0x98] sm:$0xff] %vm2118_vm0, %v2269_v8  ;;  %2490 = vmatprep.mubr.f32.mxu0 %v2365_v18 }
 0x30c   : > { %2334 = vst.msk [vmem:[#allocation4 + $0x98] sm:$0xff] %vm2167_vm2, %v2317_v3  ;;  %2491 = vmatmul.mubr.f32.gmra.mrb[16].mxu0 %v2364_v27 }
 0x30d   : > { %v2271_v4 = vpop.permute.xlu1 %2270  ;;  %2495 = vmatprep.mubr.f32.mxu0 %v2368_v29 }
 0x30e   : > { %2287 = vst.msk [vmem:[#allocation4 + $0xb0] sm:$0xff] %vm2118_vm0, %v2271_v4 }
 0x310   : > { %2496 = vmatmul.mubr.f32.gmra.mrb[18].mxu0 %v2367_v42 }
 0x311   : > { %v2319_v41 = vpop.permute.xlu1 %2318  ;;  %v2373_v46 = vld [vmem:[#allocation4 + $0xa8] sm:$0xff] }
 0x312   : > { %2335 = vst.msk [vmem:[#allocation4 + $0xb0] sm:$0xff] %vm2167_vm2, %v2319_v41 }
 0x313   : > { %v2371_v15 = vld [vmem:[#allocation4 + $0x98] sm:$0xff] }
 0x314   : > { %2500 = vmatprep.mubr.f32.mxu0 %v2371_v15 }
 0x315   : > { %2501 = vmatmul.mubr.f32.gmra.mrb[20].mxu0 %v2370_v43 }
 0x319   : > { %v2374_v44 = vld [vmem:[#allocation4 + $0xb0] sm:$0xff] }
 0x31a   : > { %2505 = vmatprep.mubr.f32.mxu0 %v2374_v44 }
 0x31b   : > { %2506 = vmatmul.mubr.f32.gmra.mrb[22].mxu0 %v2373_v46 }
 0x32a   : > { %v3045_v47 = vpop.f32.mrb[24].mxu1 }
 0x32b   : > { %v2577_v48 = vpop.f32.mrb[25].mxu1 }
 0x352   : > { %v3048_v50 = vpop.f32.mrb[26].mxu1 }
 0x353   : > { %v2587_v51 = vpop.f32.mrb[27].mxu1 }
 0x363   : > { %v3051_v53 = vpop.f32.mrb[28].mxu1 }
 0x364   : > { %v2597_v55 = vpop.f32.mrb[29].mxu1 }
 0x36f   : > { %v3054_v56 = vpop.f32.mrb[30].mxu1 }
 0x370   : > { %v2607_v57 = vpop.f32.mrb[31].mxu1 }
 0x3cf   : > { %v2919_v58 = vpop.f32.mrb[8].mxu0 }
 0x3d0   : > { %v2920_v59 = vpop.f32.mrb[9].mxu0 }
 0x3d1   : > { %v2921_v17 = vadd.f32 %v2920_v59, %v2919_v58 }
 0x3d3   : > { %v2473_v45 = vadd.f32 %v2921_v17, %v2823_v14  ;;  %v2922_v19 = vpop.f32.mrb[10].mxu0 }
 0x3d4   : > { %v2923_v31 = vpop.f32.mrb[11].mxu0 }
 0x3d5   : > { %v2578_v9 = vadd.f32 %v2577_v48, %v2473_v45  ;;  %v2924_v22 = vadd.f32 %v2923_v31, %v2922_v19 }
 0x3d7   : > { %2617 = vst.msk [vmem:[%s4700_s7] sm:$0xff] %vm2616_vm13, %v2578_v9  ;;  %v2478_v12 = vadd.f32 %v2924_v22, %v2823_v14  ;;  %v2925_v13 = vpop.f32.mrb[12].mxu0 }
 0x3d8   : > { %v2926_v20 = vpop.f32.mrb[13].mxu0 }
 0x3d9   : > { %v2583_v0 = vadd.f32 %v3045_v47, %v2478_v12  ;;  %v2927_v24 = vadd.f32 %v2926_v20, %v2925_v13 }
 0x3db   : > { %2618 = vst.msk [vmem:[%s4700_s7 + $0x8] sm:$0xff] %vm2616_vm13, %v2583_v0  ;;  %v2483_v25 = vadd.f32 %v2927_v24, %v2823_v14  ;;  %v2928_v28 = vpop.f32.mrb[14].mxu0 }
 0x3dc   : > { %v2929_v32 = vpop.f32.mrb[15].mxu0 }
 0x3dd   : > { %v2588_v30 = vadd.f32 %v2587_v51, %v2483_v25  ;;  %v2930_v60 = vadd.f32 %v2929_v32, %v2928_v28 }
 0x3df   : > { %2619 = vst.msk [vmem:[%s4700_s7 + $0x10] sm:$0xff] %vm2616_vm13, %v2588_v30  ;;  %v2488_v61 = vadd.f32 %v2930_v60, %v2823_v14  ;;  %v2931_v62 = vpop.f32.mrb[16].mxu0 }
 0x3e0   : > { %v2932_v26 = vpop.f32.mrb[17].mxu0 }
 0x3e1   : > { %v2593_v63 = vadd.f32 %v3048_v50, %v2488_v61  ;;  %v2933_v3 = vadd.f32 %v2932_v26, %v2931_v62 }
 0x3e3   : > { %2620 = vst.msk [vmem:[%s4700_s7 + $0x18] sm:$0xff] %vm2616_vm13, %v2593_v63  ;;  %v2493_v6 = vadd.f32 %v2933_v3, %v2823_v14  ;;  %v2934_v49 = vpop.f32.mrb[18].mxu0 }
 0x3e4   : > { %v2935_v54 = vpop.f32.mrb[19].mxu0 }
 0x3e5   : > { %v2598_v5 = vadd.f32 %v2597_v55, %v2493_v6  ;;  %v2936_v7 = vadd.f32 %v2935_v54, %v2934_v49 }
 0x3e7   : > { %2621 = vst.msk [vmem:[%s4700_s7 + $0x20] sm:$0xff] %vm2616_vm13, %v2598_v5  ;;  %v2498_v1 = vadd.f32 %v2936_v7, %v2823_v14 }
 0x3e8   : > { %v2937_v10 = vpop.f32.mrb[20].mxu0 }
 0x3e9   : > { %v2938_v52 = vpop.f32.mrb[21].mxu0  ;;  %v2603_v11 = vadd.f32 %v3051_v53, %v2498_v1 }
 0x3ea   : > { %v2939_v16 = vadd.f32 %v2938_v52, %v2937_v10 }
 0x3eb   : > { %2622 = vst.msk [vmem:[%s4700_s7 + $0x28] sm:$0xff] %vm2616_vm13, %v2603_v11 }
 0x3ec   : > { %v2503_v21 = vadd.f32 %v2939_v16, %v2823_v14 }
 0x3ee   : > { %v2608_v23 = vadd.f32 %v2607_v57, %v2503_v21  ;;  %v2940_v33 = vpop.f32.mrb[22].mxu0 }
 0x3ef   : > { %v2941_v34 = vpop.f32.mrb[23].mxu0 }
 0x3f0   : > { %2623 = vst.msk [vmem:[%s4700_s7 + $0x30] sm:$0xff] %vm2616_vm13, %v2608_v23  ;;  %v2942_v35 = vadd.f32 %v2941_v34, %v2940_v33 }
 0x3f2   : > { %v2508_v36 = vadd.f32 %v2942_v35, %v2823_v14 }
 0x3f4   : > { %v2613_v37 = vadd.f32 %v3054_v56, %v2508_v36 }
 0x3f6   : > { %2624 = vst.msk [vmem:[%s4700_s7 + $0x38] sm:$0xff] %vm2616_vm13, %v2613_v37 }
 0x3f7   : > { %3266 = shalt.err (!%p3263_p3)
}
 0x3f8   : > { %s3267_s25 = scalar_lea.hbm %s4721_s13, 1024  ;;  %s3271_s10 = scalar_lea.hbm %s4775_s5, 2048 }
 0x3f9   : > { %p3268_p4 = scmp.ne.s32.totalorder %s4721_s13, %s3267_s25  ;;  %p3272_p9 = scmp.lt.u32.totalorder %s4721_s13, %s4775_s5 }
 0x3fa   : > { %p3273_p10 = scmp.lt.u32.totalorder %s3271_s10, %s3267_s25  ;;  %p3275_p12 = scmp.lt.u32.totalorder %s3267_s25, %s4721_s13 }
 0x3fb   : > { %p3269_p7 = pnand %p3268_p4, %p3401_p5 }
 0x3fc   : > { %p3274_p11 = por %p3273_p10, %p3272_p9 }
 0x3fd   : > { %p3270_p8 = pneg %p3269_p7 }
 0x3fe   : > { %p3276_p13 = por %p3275_p12, %p3274_p11 }
 0x400   : > { %p3277_p0 = pnand %p3276_p13, %p3270_p8 }
 0x402   : > { %3280 = shalt.err (!%p3277_p0)
}
 0x403   : > { %s3331_s7 = smov 128   ;;  %s3332_s8 = smov 8  }
 0x404   : > { %3135 = dma.vmem_to_hbm [thread:$0]  (%p3401_p5), %s4723_s14, 1024, %s4721_s13, %s4729_s15, %s3331_s7, %s3331_s7, %s3332_s8  }
 0x405 PF: > { %p3141_p1 = scmp.ge.s32.totalorder %s3315_s21, 2  ;;  %s2654_s11 = sand.u32 1, %s3303_s18  }
 0x406   : > { %s2655_s12 = scalar_lea.sflag [#allocation6], %s2654_s11 }
 0x407   : > { %p3138_p2 = pnand %p3141_p1, %p3405_p6 }
 0x409   : > { %3298 = dma.done.wait (!%p3138_p2), %s2655_s12, 1024  }
 0x40a   : > { %3300 = vsyncadd (!%p3138_p2), %s2655_s12, 4294966272  ;;  %p15_p3 = scmp.ge.s32.totalorder %s3388_s24, 4   ;;  %s4866_s18 = smov %s3307_s19 }
 0x40b   : > { %s4867_s19 = smov %s3311_s20  ;;  %s4868_s20 = smov %s3399_s27 }
 0x40c   : > { %s4869_s21 = smov %s3388_s24  ;;  %17 = sbr.rel (!%p15_p3) target bundleno = 3 (0x3), region = 84 }
 0x413   :  { %2660 = vsyncpa [#allocation6], 1 }
 0x414   :  { %2662 = vsyncpa [#allocation6 + $0x1], 1 }

</bundles_post_ra>
